<compile_context>
chip_gen: v6e
topology: v6e:2x2x1
jax: 0.10.0
libtpu: 0.0.40
codegen_flags: <defaults>
</compile_context>

<pallas_src>
import functools

import jax
import jax.numpy as jnp
from jax import lax
from jax.experimental import pallas as pl
from jax.experimental.pallas import tpu as pltpu


def _round_up(x, m):
    return (x + m - 1) // m * m


def odelstm_kernel(x_ref, h_ref, c_ref, ts_ref,
                   w_ih_ref, w_hh_ref, bg_ref,
                   w1_ref, b1_ref, w2_ref, b2_ref,
                   newh_ref, newc_ref,
                   *, hidden_size, gate_pitch, split_rk4):
    H = hidden_size
    Hp = gate_pitch                      # 128-padded per-gate column pitch

    x = x_ref[...]
    h = h_ref[...]
    c = c_ref[...].astype(jnp.float32)
    Bt = c.shape[0]

    # ---- LSTMCell gates: two accumulating dots against resident weights ----
    gates = (jnp.dot(x, w_ih_ref[...], preferred_element_type=jnp.float32)
             + jnp.dot(h, w_hh_ref[...], preferred_element_type=jnp.float32)
             + bg_ref[...])

    # Gate columns are padded to a 128-lane pitch, so every slice below starts
    # on a lane boundary (no mid-vreg selects even when H % 128 != 0).
    def gate(g):
        return gates[:, g * Hp: g * Hp + H]

    i_g = jax.nn.sigmoid(gate(0))
    f_g = jax.nn.sigmoid(gate(1))
    g_g = jnp.tanh(gate(2))
    o_g = jax.nn.sigmoid(gate(3))
    new_c = f_g * c + i_g * g_g
    new_h = o_g * jnp.tanh(new_c)

    # Store new_c early: frees gate/cell vregs before the 24-matmul RK4 chain
    # and lets the writeback DMA overlap the ODE solve.
    newc_ref[...] = new_c.astype(newc_ref.dtype)

    # ---- f_node: Linear(H,H) -> Tanh -> Linear(H,H) ----
    w1 = w1_ref[...]
    w2 = w2_ref[...]
    b1 = b1_ref[...]
    b2 = b2_ref[...]
    mm_dtype = w1.dtype  # bf16 on the narrow-weight fast path, f32 otherwise

    def f_node(y):
        mid = jnp.tanh(
            jnp.dot(y.astype(mm_dtype), w1,
                    preferred_element_type=jnp.float32) + b1)
        return (jnp.dot(mid.astype(mm_dtype), w2,
                        preferred_element_type=jnp.float32) + b2)

    # ---- solve_fixed: 3 x RK4 with dt = ts/3 ----
    # Only dt is materialized full-width; 0.5 and 1/6 are scalar constants at
    # the use sites, and the body accumulates incrementally so only ~4 full
    # width arrays (y, dt, k, acc) stay live at once.
    dt = jnp.broadcast_to(ts_ref[...].astype(jnp.float32) * (1.0 / 3.0),
                          (Bt, H))

    if split_rk4:
        # Two independent half-batch RK4 chains interleaved in one loop body:
        # each chain's strictly serial matmuls hide the other's MXU fill/drain.
        half = Bt // 2
        da, db = dt[:half], dt[half:]

        def step2(_, carry):
            ya, yb = carry
            ka = f_node(ya)                       # k1
            kb = f_node(yb)
            aa, ab = ka, kb
            ka = f_node(ya + (ka * 0.5) * da)     # k2
            kb = f_node(yb + (kb * 0.5) * db)
            aa = aa + 2.0 * ka
            ab = ab + 2.0 * kb
            ka = f_node(ya + (ka * 0.5) * da)     # k3
            kb = f_node(yb + (kb * 0.5) * db)
            aa = aa + 2.0 * ka
            ab = ab + 2.0 * kb
            ka = f_node(ya + ka * da)             # k4
            kb = f_node(yb + kb * db)
            aa = aa + ka
            ab = ab + kb
            return (ya + da * (aa * (1.0 / 6.0)),
                    yb + db * (ab * (1.0 / 6.0)))

        ya, yb = lax.fori_loop(0, 3, step2, (new_h[:half], new_h[half:]),
                               unroll=True)
        newh_ref[0:half, :] = ya.astype(newh_ref.dtype)
        newh_ref[half:Bt, :] = yb.astype(newh_ref.dtype)
    else:
        def step(_, y):
            k = f_node(y)                         # k1
            acc = k
            k = f_node(y + (k * 0.5) * dt)        # k2
            acc = acc + 2.0 * k
            k = f_node(y + (k * 0.5) * dt)        # k3
            acc = acc + 2.0 * k
            k = f_node(y + k * dt)                # k4
            acc = acc + k
            return y + dt * (acc * (1.0 / 6.0))

        y = lax.fori_loop(0, 3, step, new_h, unroll=True)
        newh_ref[...] = y.astype(newh_ref.dtype)


@functools.partial(jax.jit,
                   static_argnames=("block_b", "compute_dtype",
                                    "single_buffer_weights"))
def ode_lstm_cell(x, h, c, ts, packed_params, *, block_b=None,
                  compute_dtype=jnp.float32, single_buffer_weights=True):
    """ODE-LSTM cell forward (fixed_rk4).  Returns (new_h, new_c)."""
    B, H = h.shape
    D_in = x.shape[1]
    h_dtype, c_dtype = h.dtype, c.dtype
    w_ih_t, w_hh_t, b_gates, w1_t, b1, w2_t, b2 = packed_params
    Hp = w_ih_t.shape[1] // 4            # 128-padded per-gate column pitch

    ts2 = ts.reshape(B, 1).astype(jnp.float32)
    if compute_dtype != jnp.float32:
        # bf16 matmul operands (v6e/v7x fast path; halves resident weight VMEM
        # on v7x's 64 MiB). Accumulation and elementwise math stay f32.
        x = x.astype(compute_dtype)
        h = h.astype(compute_dtype)

    if block_b is None:
        if B >= 16:
            # >= 2 batch tiles so v7x's two TensorCores both get work; tiles
            # are multiples of 8 sublanes, capped at 256 rows (128-high MXU
            # friendly, keeps vreg pressure bounded on v5e).
            per_core = _round_up(-(-B // 2), 8)
            block_b = max(8, min(256, per_core))
        else:
            block_b = min(B, 8)
    grid = (pl.cdiv(B, block_b),)

    # Interleave two half-tile RK4 chains when the tile splits into two
    # sublane-aligned halves.
    split_rk4 = (block_b >= 16) and (block_b % 16 == 0)

    act = lambda feat: pl.BlockSpec((block_b, feat), lambda i: (i, 0))
    if single_buffer_weights:
        # Constant block index -> never re-DMA'd; single-buffer to halve the
        # weights' VMEM footprint.
        resident = lambda a: pl.BlockSpec(a.shape, lambda i: (0, 0),
                                          pipeline_mode=pl.Buffered(1))
    else:
        resident = lambda a: pl.BlockSpec(a.shape, lambda i: (0, 0))

    weights = (w_ih_t, w_hh_t, b_gates, w1_t, b1, w2_t, b2)
    f32b = 4
    weight_bytes = sum(int(a.size) * a.dtype.itemsize for a in weights)
    buf_factor = 1 if single_buffer_weights else 2
    act_tile_bytes = (block_b * D_in * x.dtype.itemsize      # x
                      + block_b * H * h.dtype.itemsize       # h
                      + block_b * (H + 1) * f32b             # c, ts
                      + block_b * 2 * H * f32b)              # new_h, new_c
    # In-kernel temporaries: padded gate matrix + ~10 live H-wide arrays.
    scratch_bytes = block_b * 4 * Hp * f32b + 10 * block_b * H * f32b
    vmem_needed = (buf_factor * weight_bytes + 2 * act_tile_bytes
                   + scratch_bytes + (2 << 20))
    vmem_limit = int(min(max(vmem_needed, 16 << 20), 64 << 20))

    cost = pl.CostEstimate(
        flops=int(2 * B * (D_in + H) * 4 * Hp + 48 * B * H * H),
        transcendentals=int(17 * B * H),
        bytes_accessed=int(weight_bytes
                           + B * D_in * x.dtype.itemsize
                           + B * H * h.dtype.itemsize
                           + B * (H + 1) * f32b
                           + B * 2 * H * f32b))

    kernel = functools.partial(odelstm_kernel, hidden_size=H, gate_pitch=Hp,
                               split_rk4=split_rk4)

    out = pl.pallas_call(
        kernel,
        out_shape=(jax.ShapeDtypeStruct((B, H), h_dtype),
                   jax.ShapeDtypeStruct((B, H), c_dtype)),
        grid=grid,
        in_specs=[
            act(D_in),            # x
            act(H),               # h
            act(H),               # c
            act(1),               # ts
            resident(w_ih_t),     # (D_in, 4*Hp)
            resident(w_hh_t),     # (H,    4*Hp)
            resident(b_gates),    # (1,    4*Hp)
            resident(w1_t),       # (H, H)
            resident(b1),         # (1, H)
            resident(w2_t),       # (H, H)
            resident(b2),         # (1, H)
        ],
        out_specs=(act(H), act(H)),
        compiler_params=pltpu.CompilerParams(
            dimension_semantics=("parallel",),
            vmem_limit_bytes=vmem_limit),
        cost_estimate=cost,
        # TODO(synk): when stepping this cell over a sequence, alias c -> new_c
        # via input_output_aliases to avoid fresh HBM state buffers per step.
    )(x, h, c, ts2, *weights)
    return out  # (new_h, new_c)


def init_params(key, input_size, hidden_size):
    """PyTorch-layout params, uniform(-1/sqrt(H), 1/sqrt(H)) init."""
    H = hidden_size
    bound = 1.0 / jnp.sqrt(jnp.float32(H))
    ks = jax.random.split(key, 8)
    u = lambda k, s: jax.random.uniform(k, s, jnp.float32, -bound, bound)
    w_ih = u(ks[0], (4 * H, input_size))   # torch layout (4H, in), order i,f,g,o
    w_hh = u(ks[1], (4 * H, H))
    b_ih = u(ks[2], (4 * H,))
    b_hh = u(ks[3], (4 * H,))
    w1 = u(ks[4], (H, H))
    b1 = u(ks[5], (H,))
    w2 = u(ks[6], (H, H))
    b2 = u(ks[7], (H,))
    return (w_ih, w_hh, b_ih, b_hh, w1, b1, w2, b2)


def pack_params(torch_params, hidden_size, compute_dtype=jnp.float32):
    """Repack PyTorch-layout params into the kernel layout (done once).

    Gate weight/bias columns are transposed and padded to a 128-lane pitch per
    gate so in-kernel gate slices start on lane boundaries; f_node weights are
    transposed; biases made 2-D.
    """
    w_ih, w_hh, b_ih, b_hh, w1, b1, w2, b2 = torch_params
    H = hidden_size
    Hp = _round_up(H, 128)

    def pad_gates_t(w):                         # (4H, D) -> (D, 4*Hp)
        D = w.shape[1]
        out = jnp.zeros((D, 4 * Hp), jnp.float32)
        for g in range(4):
            out = out.at[:, g * Hp: g * Hp + H].set(w[g * H:(g + 1) * H, :].T)
        return out

    b = b_ih + b_hh
    b_gates = jnp.zeros((1, 4 * Hp), jnp.float32)
    for g in range(4):
        b_gates = b_gates.at[0, g * Hp: g * Hp + H].set(b[g * H:(g + 1) * H])

    w_ih_t = pad_gates_t(w_ih)
    w_hh_t = pad_gates_t(w_hh)
    w1_t, w2_t = w1.T, w2.T
    if compute_dtype != jnp.float32:
        w_ih_t = w_ih_t.astype(compute_dtype)
        w_hh_t = w_hh_t.astype(compute_dtype)
        w1_t = w1_t.astype(compute_dtype)
        w2_t = w2_t.astype(compute_dtype)
    return (w_ih_t, w_hh_t, b_gates, w1_t, b1.reshape(1, H),
            w2_t, b2.reshape(1, H))


def ref_forward(x, h, c, ts, torch_params):
    """Pure-JAX reference mirroring the PyTorch module (fixed_rk4)."""
    w_ih, w_hh, b_ih, b_hh, w1, b1, w2, b2 = torch_params
    H = h.shape[1]
    gates = x @ w_ih.T + b_ih + h @ w_hh.T + b_hh
    i_g = jax.nn.sigmoid(gates[:, :H])
    f_g = jax.nn.sigmoid(gates[:, H:2 * H])
    g_g = jnp.tanh(gates[:, 2 * H:3 * H])
    o_g = jax.nn.sigmoid(gates[:, 3 * H:])
    new_c = f_g * c + i_g * g_g
    new_h = o_g * jnp.tanh(new_c)

    def f_node(y):
        return jnp.tanh(y @ w1.T + b1) @ w2.T + b2

    dt = ts.reshape(-1, 1) * (1.0 / 3.0)
    y = new_h
    for _ in range(3):
        k1 = f_node(y)
        k2 = f_node(y + k1 * dt * 0.5)
        k3 = f_node(y + k2 * dt * 0.5)
        k4 = f_node(y + k3 * dt)
        y = y + dt * (k1 + 2 * k2 + 2 * k3 + k4) / 6.0
    return y, new_c


if __name__ == "__main__":
    batch, input_size, hidden_size = 16, 16, 32
    key = jax.random.PRNGKey(0)
    k_x, k_h, k_c, k_t, k_p = jax.random.split(key, 5)

    x = jax.random.normal(k_x, (batch, input_size), jnp.float32)
    h = jax.random.normal(k_h, (batch, hidden_size), jnp.float32)
    c = jax.random.normal(k_c, (batch, hidden_size), jnp.float32)
    ts = jax.random.uniform(k_t, (batch,), jnp.float32, 0.1, 1.0)

    torch_params = init_params(k_p, input_size, hidden_size)
    kernel_params = pack_params(torch_params, hidden_size)
    ref_h, ref_c = ref_forward(x, h, c, ts, torch_params)

    def run(**kw):
        try:
            return jax.block_until_ready(
                ode_lstm_cell(x, h, c, ts, kernel_params, **kw))
        except Exception:
            # Narrow fallback: if this jax build rejects the single-buffer
            # weight hint (pl.Buffered(1)), retry with default buffering.
            # Semantics are identical; only VMEM footprint differs.
            return jax.block_until_ready(
                ode_lstm_cell(x, h, c, ts, kernel_params,
                              single_buffer_weights=False, **kw))

    # Default tiling: two 8-row batch tiles (exercises the parallel grid).
    new_h, new_c = run()
    assert jnp.allclose(new_h, ref_h, atol=1e-5, rtol=1e-5)
    assert jnp.allclose(new_c, ref_c, atol=1e-5, rtol=1e-5)

    # Single 16-row tile: exercises the interleaved two-chain RK4 path.
    new_h2, new_c2 = run(block_b=16)
    assert jnp.allclose(new_h2, ref_h, atol=1e-5, rtol=1e-5)
    assert jnp.allclose(new_c2, ref_c, atol=1e-5, rtol=1e-5)

    print("KERNEL_OK")
</pallas_src>

<mosaic_0001>
module attributes {stable_mosaic.version = 11 : i64} {
  func.func @odelstm_kernel(%arg0: i32, %arg1: memref<8x16xf32, #tpu.memory_space<vmem>>, %arg2: memref<8x32xf32, #tpu.memory_space<vmem>>, %arg3: memref<8x32xf32, #tpu.memory_space<vmem>>, %arg4: memref<8x1xf32, #tpu.memory_space<vmem>>, %arg5: memref<16x512xf32, #tpu.memory_space<vmem>>, %arg6: memref<32x512xf32, #tpu.memory_space<vmem>>, %arg7: memref<1x512xf32, #tpu.memory_space<vmem>>, %arg8: memref<32x32xf32, #tpu.memory_space<vmem>>, %arg9: memref<1x32xf32, #tpu.memory_space<vmem>>, %arg10: memref<32x32xf32, #tpu.memory_space<vmem>>, %arg11: memref<1x32xf32, #tpu.memory_space<vmem>>, %arg12: memref<8x32xf32, #tpu.memory_space<vmem>>, %arg13: memref<8x32xf32, #tpu.memory_space<vmem>>) attributes {dimension_semantics = [#tpu.dimension_semantics<parallel>], iteration_bounds = array<i64: 2>, scalar_prefetch = 0 : i64, scratch_operands = 0 : i64, tpu.core_type = #tpu.core_type<tc>, window_params = [{transform_indices = @transform_0, window_bounds = array<i64: 8, 16>}, {transform_indices = @transform_1, window_bounds = array<i64: 8, 32>}, {transform_indices = @transform_2, window_bounds = array<i64: 8, 32>}, {transform_indices = @transform_3, window_bounds = array<i64: 8, 1>}, {pipeline_mode = #tpu.pipeline_mode<synchronous>, transform_indices = @transform_4, window_bounds = array<i64: 16, 512>}, {pipeline_mode = #tpu.pipeline_mode<synchronous>, transform_indices = @transform_5, window_bounds = array<i64: 32, 512>}, {pipeline_mode = #tpu.pipeline_mode<synchronous>, transform_indices = @transform_6, window_bounds = array<i64: 1, 512>}, {pipeline_mode = #tpu.pipeline_mode<synchronous>, transform_indices = @transform_7, window_bounds = array<i64: 32, 32>}, {pipeline_mode = #tpu.pipeline_mode<synchronous>, transform_indices = @transform_8, window_bounds = array<i64: 1, 32>}, {pipeline_mode = #tpu.pipeline_mode<synchronous>, transform_indices = @transform_9, window_bounds = array<i64: 32, 32>}, {pipeline_mode = #tpu.pipeline_mode<synchronous>, transform_indices = @transform_10, window_bounds = array<i64: 1, 32>}, {transform_indices = @transform_11, window_bounds = array<i64: 8, 32>}, {transform_indices = @transform_12, window_bounds = array<i64: 8, 32>}]} {
    %c0 = arith.constant 0 : index
    %c0_0 = arith.constant 0 : index
    %0 = vector.load %arg1[%c0, %c0_0] : memref<8x16xf32, #tpu.memory_space<vmem>>, vector<8x16xf32>
    %c0_1 = arith.constant 0 : index
    %c0_2 = arith.constant 0 : index
    %1 = vector.load %arg2[%c0_1, %c0_2] : memref<8x32xf32, #tpu.memory_space<vmem>>, vector<8x32xf32>
    %c0_3 = arith.constant 0 : index
    %c0_4 = arith.constant 0 : index
    %2 = vector.load %arg3[%c0_3, %c0_4] : memref<8x32xf32, #tpu.memory_space<vmem>>, vector<8x32xf32>
    %c0_5 = arith.constant 0 : index
    %c0_6 = arith.constant 0 : index
    %3 = vector.load %arg5[%c0_5, %c0_6] : memref<16x512xf32, #tpu.memory_space<vmem>>, vector<16x512xf32>
    %cst = arith.constant dense<0.000000e+00> : vector<8x512xf32>
    %4 = tpu.matmul %0, %3, %cst {dimension_numbers = #tpu.dot_dimension_numbers<[1], [0], [0], [1], [0, 0, 1, 1], [], []>} : vector<8x16xf32>, vector<16x512xf32>, vector<8x512xf32> -> vector<8x512xf32>
    %c0_7 = arith.constant 0 : index
    %c0_8 = arith.constant 0 : index
    %5 = vector.load %arg6[%c0_7, %c0_8] : memref<32x512xf32, #tpu.memory_space<vmem>>, vector<32x512xf32>
    %cst_9 = arith.constant dense<0.000000e+00> : vector<8x512xf32>
    %6 = tpu.matmul %1, %5, %cst_9 {dimension_numbers = #tpu.dot_dimension_numbers<[1], [0], [0], [1], [0, 0, 1, 1], [], []>} : vector<8x32xf32>, vector<32x512xf32>, vector<8x512xf32> -> vector<8x512xf32>
    %7 = arith.addf %4, %6 : vector<8x512xf32>
    %c0_10 = arith.constant 0 : index
    %c0_11 = arith.constant 0 : index
    %8 = vector.load %arg7[%c0_10, %c0_11] : memref<1x512xf32, #tpu.memory_space<vmem>>, vector<1x512xf32>
    %9 = vector.broadcast %8 : vector<1x512xf32> to vector<8x512xf32>
    %10 = arith.addf %7, %9 : vector<8x512xf32>
    %11 = vector.extract_strided_slice %10 {offsets = [0, 0], sizes = [8, 32], strides = [1, 1]} : vector<8x512xf32> to vector<8x32xf32>
    %12 = arith.negf %11 : vector<8x32xf32>
    %13 = math.exp %12 : vector<8x32xf32>
    %cst_12 = arith.constant 1.000000e+00 : f32
    %14 = vector.broadcast %cst_12 : f32 to vector<8x32xf32>
    %15 = arith.addf %14, %13 : vector<8x32xf32>
    %16 = arith.divf %14, %15 : vector<8x32xf32>
    %17 = vector.extract_strided_slice %10 {offsets = [0, 128], sizes = [8, 32], strides = [1, 1]} : vector<8x512xf32> to vector<8x32xf32>
    %18 = arith.negf %17 : vector<8x32xf32>
    %19 = math.exp %18 : vector<8x32xf32>
    %cst_13 = arith.constant 1.000000e+00 : f32
    %20 = vector.broadcast %cst_13 : f32 to vector<8x32xf32>
    %21 = arith.addf %20, %19 : vector<8x32xf32>
    %22 = arith.divf %20, %21 : vector<8x32xf32>
    %23 = vector.extract_strided_slice %10 {offsets = [0, 256], sizes = [8, 32], strides = [1, 1]} : vector<8x512xf32> to vector<8x32xf32>
    %24 = math.tanh %23 : vector<8x32xf32>
    %25 = vector.extract_strided_slice %10 {offsets = [0, 384], sizes = [8, 32], strides = [1, 1]} : vector<8x512xf32> to vector<8x32xf32>
    %26 = arith.negf %25 : vector<8x32xf32>
    %27 = math.exp %26 : vector<8x32xf32>
    %cst_14 = arith.constant 1.000000e+00 : f32
    %28 = vector.broadcast %cst_14 : f32 to vector<8x32xf32>
    %29 = arith.addf %28, %27 : vector<8x32xf32>
    %30 = arith.divf %28, %29 : vector<8x32xf32>
    %31 = arith.mulf %22, %2 : vector<8x32xf32>
    %32 = arith.mulf %16, %24 : vector<8x32xf32>
    %33 = arith.addf %31, %32 : vector<8x32xf32>
    %34 = math.tanh %33 : vector<8x32xf32>
    %35 = arith.mulf %30, %34 : vector<8x32xf32>
    %c0_15 = arith.constant 0 : index
    %c0_16 = arith.constant 0 : index
    %36 = vector.load %arg13[%c0_15, %c0_16] : memref<8x32xf32, #tpu.memory_space<vmem>>, vector<8x32xf32>
    tpu.vector_store %arg13[%c0_15, %c0_16], %33 {strides = array<i32>} : memref<8x32xf32, #tpu.memory_space<vmem>>, vector<8x32xf32>,
    %c0_17 = arith.constant 0 : index
    %c0_18 = arith.constant 0 : index
    %37 = vector.load %arg8[%c0_17, %c0_18] : memref<32x32xf32, #tpu.memory_space<vmem>>, vector<32x32xf32>
    %c0_19 = arith.constant 0 : index
    %c0_20 = arith.constant 0 : index
    %38 = vector.load %arg10[%c0_19, %c0_20] : memref<32x32xf32, #tpu.memory_space<vmem>>, vector<32x32xf32>
    %c0_21 = arith.constant 0 : index
    %c0_22 = arith.constant 0 : index
    %39 = vector.load %arg9[%c0_21, %c0_22] : memref<1x32xf32, #tpu.memory_space<vmem>>, vector<1x32xf32>
    %c0_23 = arith.constant 0 : index
    %c0_24 = arith.constant 0 : index
    %40 = vector.load %arg11[%c0_23, %c0_24] : memref<1x32xf32, #tpu.memory_space<vmem>>, vector<1x32xf32>
    %c0_25 = arith.constant 0 : index
    %c0_26 = arith.constant 0 : index
    %41 = vector.load %arg4[%c0_25, %c0_26] : memref<8x1xf32, #tpu.memory_space<vmem>>, vector<8x1xf32>
    %cst_27 = arith.constant 0.333333343 : f32
    %42 = vector.broadcast %cst_27 : f32 to vector<8x1xf32>
    %43 = arith.mulf %41, %42 : vector<8x1xf32>
    %44 = vector.shape_cast %43 : vector<8x1xf32> to vector<8x1xf32>
    %45 = vector.broadcast %44 : vector<8x1xf32> to vector<8x32xf32>
    %c0_i32 = arith.constant 0 : i32
    %cst_28 = arith.constant dense<0.000000e+00> : vector<8x32xf32>
    %46 = tpu.matmul %35, %37, %cst_28 {dimension_numbers = #tpu.dot_dimension_numbers<[1], [0], [0], [1], [0, 0, 1, 1], [], []>} : vector<8x32xf32>, vector<32x32xf32>, vector<8x32xf32> -> vector<8x32xf32>
    %47 = vector.broadcast %39 : vector<1x32xf32> to vector<8x32xf32>
    %48 = arith.addf %46, %47 : vector<8x32xf32>
    %49 = math.tanh %48 : vector<8x32xf32>
    %cst_29 = arith.constant dense<0.000000e+00> : vector<8x32xf32>
    %50 = tpu.matmul %49, %38, %cst_29 {dimension_numbers = #tpu.dot_dimension_numbers<[1], [0], [0], [1], [0, 0, 1, 1], [], []>} : vector<8x32xf32>, vector<32x32xf32>, vector<8x32xf32> -> vector<8x32xf32>
    %51 = vector.broadcast %40 : vector<1x32xf32> to vector<8x32xf32>
    %52 = arith.addf %50, %51 : vector<8x32xf32>
    %cst_30 = arith.constant 5.000000e-01 : f32
    %53 = vector.broadcast %cst_30 : f32 to vector<8x32xf32>
    %54 = arith.mulf %52, %53 : vector<8x32xf32>
    %55 = arith.mulf %54, %45 : vector<8x32xf32>
    %56 = arith.addf %35, %55 : vector<8x32xf32>
    %cst_31 = arith.constant dense<0.000000e+00> : vector<8x32xf32>
    %57 = tpu.matmul %56, %37, %cst_31 {dimension_numbers = #tpu.dot_dimension_numbers<[1], [0], [0], [1], [0, 0, 1, 1], [], []>} : vector<8x32xf32>, vector<32x32xf32>, vector<8x32xf32> -> vector<8x32xf32>
    %58 = vector.broadcast %39 : vector<1x32xf32> to vector<8x32xf32>
    %59 = arith.addf %57, %58 : vector<8x32xf32>
    %60 = math.tanh %59 : vector<8x32xf32>
    %cst_32 = arith.constant dense<0.000000e+00> : vector<8x32xf32>
    %61 = tpu.matmul %60, %38, %cst_32 {dimension_numbers = #tpu.dot_dimension_numbers<[1], [0], [0], [1], [0, 0, 1, 1], [], []>} : vector<8x32xf32>, vector<32x32xf32>, vector<8x32xf32> -> vector<8x32xf32>
    %62 = vector.broadcast %40 : vector<1x32xf32> to vector<8x32xf32>
    %63 = arith.addf %61, %62 : vector<8x32xf32>
    %cst_33 = arith.constant 2.000000e+00 : f32
    %64 = vector.broadcast %cst_33 : f32 to vector<8x32xf32>
    %65 = arith.mulf %64, %63 : vector<8x32xf32>
    %66 = arith.addf %52, %65 : vector<8x32xf32>
    %cst_34 = arith.constant 5.000000e-01 : f32
    %67 = vector.broadcast %cst_34 : f32 to vector<8x32xf32>
    %68 = arith.mulf %63, %67 : vector<8x32xf32>
    %69 = arith.mulf %68, %45 : vector<8x32xf32>
    %70 = arith.addf %35, %69 : vector<8x32xf32>
    %cst_35 = arith.constant dense<0.000000e+00> : vector<8x32xf32>
    %71 = tpu.matmul %70, %37, %cst_35 {dimension_numbers = #tpu.dot_dimension_numbers<[1], [0], [0], [1], [0, 0, 1, 1], [], []>} : vector<8x32xf32>, vector<32x32xf32>, vector<8x32xf32> -> vector<8x32xf32>
    %72 = vector.broadcast %39 : vector<1x32xf32> to vector<8x32xf32>
    %73 = arith.addf %71, %72 : vector<8x32xf32>
    %74 = math.tanh %73 : vector<8x32xf32>
    %cst_36 = arith.constant dense<0.000000e+00> : vector<8x32xf32>
    %75 = tpu.matmul %74, %38, %cst_36 {dimension_numbers = #tpu.dot_dimension_numbers<[1], [0], [0], [1], [0, 0, 1, 1], [], []>} : vector<8x32xf32>, vector<32x32xf32>, vector<8x32xf32> -> vector<8x32xf32>
    %76 = vector.broadcast %40 : vector<1x32xf32> to vector<8x32xf32>
    %77 = arith.addf %75, %76 : vector<8x32xf32>
    %cst_37 = arith.constant 2.000000e+00 : f32
    %78 = vector.broadcast %cst_37 : f32 to vector<8x32xf32>
    %79 = arith.mulf %78, %77 : vector<8x32xf32>
    %80 = arith.addf %66, %79 : vector<8x32xf32>
    %81 = arith.mulf %77, %45 : vector<8x32xf32>
    %82 = arith.addf %35, %81 : vector<8x32xf32>
    %cst_38 = arith.constant dense<0.000000e+00> : vector<8x32xf32>
    %83 = tpu.matmul %82, %37, %cst_38 {dimension_numbers = #tpu.dot_dimension_numbers<[1], [0], [0], [1], [0, 0, 1, 1], [], []>} : vector<8x32xf32>, vector<32x32xf32>, vector<8x32xf32> -> vector<8x32xf32>
    %84 = vector.broadcast %39 : vector<1x32xf32> to vector<8x32xf32>
    %85 = arith.addf %83, %84 : vector<8x32xf32>
    %86 = math.tanh %85 : vector<8x32xf32>
    %cst_39 = arith.constant dense<0.000000e+00> : vector<8x32xf32>
    %87 = tpu.matmul %86, %38, %cst_39 {dimension_numbers = #tpu.dot_dimension_numbers<[1], [0], [0], [1], [0, 0, 1, 1], [], []>} : vector<8x32xf32>, vector<32x32xf32>, vector<8x32xf32> -> vector<8x32xf32>
    %88 = vector.broadcast %40 : vector<1x32xf32> to vector<8x32xf32>
    %89 = arith.addf %87, %88 : vector<8x32xf32>
    %90 = arith.addf %80, %89 : vector<8x32xf32>
    %cst_40 = arith.constant 0.166666672 : f32
    %91 = vector.broadcast %cst_40 : f32 to vector<8x32xf32>
    %92 = arith.mulf %90, %91 : vector<8x32xf32>
    %93 = arith.mulf %45, %92 : vector<8x32xf32>
    %94 = arith.addf %35, %93 : vector<8x32xf32>
    %c1_i32 = arith.constant 1 : i32
    %cst_41 = arith.constant dense<0.000000e+00> : vector<8x32xf32>
    %95 = tpu.matmul %94, %37, %cst_41 {dimension_numbers = #tpu.dot_dimension_numbers<[1], [0], [0], [1], [0, 0, 1, 1], [], []>} : vector<8x32xf32>, vector<32x32xf32>, vector<8x32xf32> -> vector<8x32xf32>
    %96 = vector.broadcast %39 : vector<1x32xf32> to vector<8x32xf32>
    %97 = arith.addf %95, %96 : vector<8x32xf32>
    %98 = math.tanh %97 : vector<8x32xf32>
    %cst_42 = arith.constant dense<0.000000e+00> : vector<8x32xf32>
    %99 = tpu.matmul %98, %38, %cst_42 {dimension_numbers = #tpu.dot_dimension_numbers<[1], [0], [0], [1], [0, 0, 1, 1], [], []>} : vector<8x32xf32>, vector<32x32xf32>, vector<8x32xf32> -> vector<8x32xf32>
    %100 = vector.broadcast %40 : vector<1x32xf32> to vector<8x32xf32>
    %101 = arith.addf %99, %100 : vector<8x32xf32>
    %cst_43 = arith.constant 5.000000e-01 : f32
    %102 = vector.broadcast %cst_43 : f32 to vector<8x32xf32>
    %103 = arith.mulf %101, %102 : vector<8x32xf32>
    %104 = arith.mulf %103, %45 : vector<8x32xf32>
    %105 = arith.addf %94, %104 : vector<8x32xf32>
    %cst_44 = arith.constant dense<0.000000e+00> : vector<8x32xf32>
    %106 = tpu.matmul %105, %37, %cst_44 {dimension_numbers = #tpu.dot_dimension_numbers<[1], [0], [0], [1], [0, 0, 1, 1], [], []>} : vector<8x32xf32>, vector<32x32xf32>, vector<8x32xf32> -> vector<8x32xf32>
    %107 = vector.broadcast %39 : vector<1x32xf32> to vector<8x32xf32>
    %108 = arith.addf %106, %107 : vector<8x32xf32>
    %109 = math.tanh %108 : vector<8x32xf32>
    %cst_45 = arith.constant dense<0.000000e+00> : vector<8x32xf32>
    %110 = tpu.matmul %109, %38, %cst_45 {dimension_numbers = #tpu.dot_dimension_numbers<[1], [0], [0], [1], [0, 0, 1, 1], [], []>} : vector<8x32xf32>, vector<32x32xf32>, vector<8x32xf32> -> vector<8x32xf32>
    %111 = vector.broadcast %40 : vector<1x32xf32> to vector<8x32xf32>
    %112 = arith.addf %110, %111 : vector<8x32xf32>
    %cst_46 = arith.constant 2.000000e+00 : f32
    %113 = vector.broadcast %cst_46 : f32 to vector<8x32xf32>
    %114 = arith.mulf %113, %112 : vector<8x32xf32>
    %115 = arith.addf %101, %114 : vector<8x32xf32>
    %cst_47 = arith.constant 5.000000e-01 : f32
    %116 = vector.broadcast %cst_47 : f32 to vector<8x32xf32>
    %117 = arith.mulf %112, %116 : vector<8x32xf32>
    %118 = arith.mulf %117, %45 : vector<8x32xf32>
    %119 = arith.addf %94, %118 : vector<8x32xf32>
    %cst_48 = arith.constant dense<0.000000e+00> : vector<8x32xf32>
    %120 = tpu.matmul %119, %37, %cst_48 {dimension_numbers = #tpu.dot_dimension_numbers<[1], [0], [0], [1], [0, 0, 1, 1], [], []>} : vector<8x32xf32>, vector<32x32xf32>, vector<8x32xf32> -> vector<8x32xf32>
    %121 = vector.broadcast %39 : vector<1x32xf32> to vector<8x32xf32>
    %122 = arith.addf %120, %121 : vector<8x32xf32>
    %123 = math.tanh %122 : vector<8x32xf32>
    %cst_49 = arith.constant dense<0.000000e+00> : vector<8x32xf32>
    %124 = tpu.matmul %123, %38, %cst_49 {dimension_numbers = #tpu.dot_dimension_numbers<[1], [0], [0], [1], [0, 0, 1, 1], [], []>} : vector<8x32xf32>, vector<32x32xf32>, vector<8x32xf32> -> vector<8x32xf32>
    %125 = vector.broadcast %40 : vector<1x32xf32> to vector<8x32xf32>
    %126 = arith.addf %124, %125 : vector<8x32xf32>
    %cst_50 = arith.constant 2.000000e+00 : f32
    %127 = vector.broadcast %cst_50 : f32 to vector<8x32xf32>
    %128 = arith.mulf %127, %126 : vector<8x32xf32>
    %129 = arith.addf %115, %128 : vector<8x32xf32>
    %130 = arith.mulf %126, %45 : vector<8x32xf32>
    %131 = arith.addf %94, %130 : vector<8x32xf32>
    %cst_51 = arith.constant dense<0.000000e+00> : vector<8x32xf32>
    %132 = tpu.matmul %131, %37, %cst_51 {dimension_numbers = #tpu.dot_dimension_numbers<[1], [0], [0], [1], [0, 0, 1, 1], [], []>} : vector<8x32xf32>, vector<32x32xf32>, vector<8x32xf32> -> vector<8x32xf32>
    %133 = vector.broadcast %39 : vector<1x32xf32> to vector<8x32xf32>
    %134 = arith.addf %132, %133 : vector<8x32xf32>
    %135 = math.tanh %134 : vector<8x32xf32>
    %cst_52 = arith.constant dense<0.000000e+00> : vector<8x32xf32>
    %136 = tpu.matmul %135, %38, %cst_52 {dimension_numbers = #tpu.dot_dimension_numbers<[1], [0], [0], [1], [0, 0, 1, 1], [], []>} : vector<8x32xf32>, vector<32x32xf32>, vector<8x32xf32> -> vector<8x32xf32>
    %137 = vector.broadcast %40 : vector<1x32xf32> to vector<8x32xf32>
    %138 = arith.addf %136, %137 : vector<8x32xf32>
    %139 = arith.addf %129, %138 : vector<8x32xf32>
    %cst_53 = arith.constant 0.166666672 : f32
    %140 = vector.broadcast %cst_53 : f32 to vector<8x32xf32>
    %141 = arith.mulf %139, %140 : vector<8x32xf32>
    %142 = arith.mulf %45, %141 : vector<8x32xf32>
    %143 = arith.addf %94, %142 : vector<8x32xf32>
    %c2_i32 = arith.constant 2 : i32
    %cst_54 = arith.constant dense<0.000000e+00> : vector<8x32xf32>
    %144 = tpu.matmul %143, %37, %cst_54 {dimension_numbers = #tpu.dot_dimension_numbers<[1], [0], [0], [1], [0, 0, 1, 1], [], []>} : vector<8x32xf32>, vector<32x32xf32>, vector<8x32xf32> -> vector<8x32xf32>
    %145 = vector.broadcast %39 : vector<1x32xf32> to vector<8x32xf32>
    %146 = arith.addf %144, %145 : vector<8x32xf32>
    %147 = math.tanh %146 : vector<8x32xf32>
    %cst_55 = arith.constant dense<0.000000e+00> : vector<8x32xf32>
    %148 = tpu.matmul %147, %38, %cst_55 {dimension_numbers = #tpu.dot_dimension_numbers<[1], [0], [0], [1], [0, 0, 1, 1], [], []>} : vector<8x32xf32>, vector<32x32xf32>, vector<8x32xf32> -> vector<8x32xf32>
    %149 = vector.broadcast %40 : vector<1x32xf32> to vector<8x32xf32>
    %150 = arith.addf %148, %149 : vector<8x32xf32>
    %cst_56 = arith.constant 5.000000e-01 : f32
    %151 = vector.broadcast %cst_56 : f32 to vector<8x32xf32>
    %152 = arith.mulf %150, %151 : vector<8x32xf32>
    %153 = arith.mulf %152, %45 : vector<8x32xf32>
    %154 = arith.addf %143, %153 : vector<8x32xf32>
    %cst_57 = arith.constant dense<0.000000e+00> : vector<8x32xf32>
    %155 = tpu.matmul %154, %37, %cst_57 {dimension_numbers = #tpu.dot_dimension_numbers<[1], [0], [0], [1], [0, 0, 1, 1], [], []>} : vector<8x32xf32>, vector<32x32xf32>, vector<8x32xf32> -> vector<8x32xf32>
    %156 = vector.broadcast %39 : vector<1x32xf32> to vector<8x32xf32>
    %157 = arith.addf %155, %156 : vector<8x32xf32>
    %158 = math.tanh %157 : vector<8x32xf32>
    %cst_58 = arith.constant dense<0.000000e+00> : vector<8x32xf32>
    %159 = tpu.matmul %158, %38, %cst_58 {dimension_numbers = #tpu.dot_dimension_numbers<[1], [0], [0], [1], [0, 0, 1, 1], [], []>} : vector<8x32xf32>, vector<32x32xf32>, vector<8x32xf32> -> vector<8x32xf32>
    %160 = vector.broadcast %40 : vector<1x32xf32> to vector<8x32xf32>
    %161 = arith.addf %159, %160 : vector<8x32xf32>
    %cst_59 = arith.constant 2.000000e+00 : f32
    %162 = vector.broadcast %cst_59 : f32 to vector<8x32xf32>
    %163 = arith.mulf %162, %161 : vector<8x32xf32>
    %164 = arith.addf %150, %163 : vector<8x32xf32>
    %cst_60 = arith.constant 5.000000e-01 : f32
    %165 = vector.broadcast %cst_60 : f32 to vector<8x32xf32>
    %166 = arith.mulf %161, %165 : vector<8x32xf32>
    %167 = arith.mulf %166, %45 : vector<8x32xf32>
    %168 = arith.addf %143, %167 : vector<8x32xf32>
    %cst_61 = arith.constant dense<0.000000e+00> : vector<8x32xf32>
    %169 = tpu.matmul %168, %37, %cst_61 {dimension_numbers = #tpu.dot_dimension_numbers<[1], [0], [0], [1], [0, 0, 1, 1], [], []>} : vector<8x32xf32>, vector<32x32xf32>, vector<8x32xf32> -> vector<8x32xf32>
    %170 = vector.broadcast %39 : vector<1x32xf32> to vector<8x32xf32>
    %171 = arith.addf %169, %170 : vector<8x32xf32>
    %172 = math.tanh %171 : vector<8x32xf32>
    %cst_62 = arith.constant dense<0.000000e+00> : vector<8x32xf32>
    %173 = tpu.matmul %172, %38, %cst_62 {dimension_numbers = #tpu.dot_dimension_numbers<[1], [0], [0], [1], [0, 0, 1, 1], [], []>} : vector<8x32xf32>, vector<32x32xf32>, vector<8x32xf32> -> vector<8x32xf32>
    %174 = vector.broadcast %40 : vector<1x32xf32> to vector<8x32xf32>
    %175 = arith.addf %173, %174 : vector<8x32xf32>
    %cst_63 = arith.constant 2.000000e+00 : f32
    %176 = vector.broadcast %cst_63 : f32 to vector<8x32xf32>
    %177 = arith.mulf %176, %175 : vector<8x32xf32>
    %178 = arith.addf %164, %177 : vector<8x32xf32>
    %179 = arith.mulf %175, %45 : vector<8x32xf32>
    %180 = arith.addf %143, %179 : vector<8x32xf32>
    %cst_64 = arith.constant dense<0.000000e+00> : vector<8x32xf32>
    %181 = tpu.matmul %180, %37, %cst_64 {dimension_numbers = #tpu.dot_dimension_numbers<[1], [0], [0], [1], [0, 0, 1, 1], [], []>} : vector<8x32xf32>, vector<32x32xf32>, vector<8x32xf32> -> vector<8x32xf32>
    %182 = vector.broadcast %39 : vector<1x32xf32> to vector<8x32xf32>
    %183 = arith.addf %181, %182 : vector<8x32xf32>
    %184 = math.tanh %183 : vector<8x32xf32>
    %cst_65 = arith.constant dense<0.000000e+00> : vector<8x32xf32>
    %185 = tpu.matmul %184, %38, %cst_65 {dimension_numbers = #tpu.dot_dimension_numbers<[1], [0], [0], [1], [0, 0, 1, 1], [], []>} : vector<8x32xf32>, vector<32x32xf32>, vector<8x32xf32> -> vector<8x32xf32>
    %186 = vector.broadcast %40 : vector<1x32xf32> to vector<8x32xf32>
    %187 = arith.addf %185, %186 : vector<8x32xf32>
    %188 = arith.addf %178, %187 : vector<8x32xf32>
    %cst_66 = arith.constant 0.166666672 : f32
    %189 = vector.broadcast %cst_66 : f32 to vector<8x32xf32>
    %190 = arith.mulf %188, %189 : vector<8x32xf32>
    %191 = arith.mulf %45, %190 : vector<8x32xf32>
    %192 = arith.addf %143, %191 : vector<8x32xf32>
    %c0_67 = arith.constant 0 : index
    %c0_68 = arith.constant 0 : index
    %193 = vector.load %arg12[%c0_67, %c0_68] : memref<8x32xf32, #tpu.memory_space<vmem>>, vector<8x32xf32>
    tpu.vector_store %arg12[%c0_67, %c0_68], %192 {strides = array<i32>} : memref<8x32xf32, #tpu.memory_space<vmem>>, vector<8x32xf32>,
    return
  }
  func.func @transform_0(%arg0: i32) -> (i32, i32) {
    %c0_i32 = arith.constant 0 : i32
    %c0_i32_0 = arith.constant 0 : i32
    return %arg0, %c0_i32 : i32, i32
  }
  func.func @transform_1(%arg0: i32) -> (i32, i32) {
    %c0_i32 = arith.constant 0 : i32
    %c0_i32_0 = arith.constant 0 : i32
    return %arg0, %c0_i32 : i32, i32
  }
  func.func @transform_2(%arg0: i32) -> (i32, i32) {
    %c0_i32 = arith.constant 0 : i32
    %c0_i32_0 = arith.constant 0 : i32
    return %arg0, %c0_i32 : i32, i32
  }
  func.func @transform_3(%arg0: i32) -> (i32, i32) {
    %c0_i32 = arith.constant 0 : i32
    %c0_i32_0 = arith.constant 0 : i32
    return %arg0, %c0_i32 : i32, i32
  }
  func.func @transform_4(%arg0: i32) -> (i32, i32) {
    %c0_i32 = arith.constant 0 : i32
    %c0_i32_0 = arith.constant 0 : i32
    %c0_i32_1 = arith.constant 0 : i32
    return %c0_i32, %c0_i32_0 : i32, i32
  }
  func.func @transform_5(%arg0: i32) -> (i32, i32) {
    %c0_i32 = arith.constant 0 : i32
    %c0_i32_0 = arith.constant 0 : i32
    %c0_i32_1 = arith.constant 0 : i32
    return %c0_i32, %c0_i32_0 : i32, i32
  }
  func.func @transform_6(%arg0: i32) -> (i32, i32) {
    %c0_i32 = arith.constant 0 : i32
    %c0_i32_0 = arith.constant 0 : i32
    %c0_i32_1 = arith.constant 0 : i32
    return %c0_i32, %c0_i32_0 : i32, i32
  }
  func.func @transform_7(%arg0: i32) -> (i32, i32) {
    %c0_i32 = arith.constant 0 : i32
    %c0_i32_0 = arith.constant 0 : i32
    %c0_i32_1 = arith.constant 0 : i32
    return %c0_i32, %c0_i32_0 : i32, i32
  }
  func.func @transform_8(%arg0: i32) -> (i32, i32) {
    %c0_i32 = arith.constant 0 : i32
    %c0_i32_0 = arith.constant 0 : i32
    %c0_i32_1 = arith.constant 0 : i32
    return %c0_i32, %c0_i32_0 : i32, i32
  }
  func.func @transform_9(%arg0: i32) -> (i32, i32) {
    %c0_i32 = arith.constant 0 : i32
    %c0_i32_0 = arith.constant 0 : i32
    %c0_i32_1 = arith.constant 0 : i32
    return %c0_i32, %c0_i32_0 : i32, i32
  }
  func.func @transform_10(%arg0: i32) -> (i32, i32) {
    %c0_i32 = arith.constant 0 : i32
    %c0_i32_0 = arith.constant 0 : i32
    %c0_i32_1 = arith.constant 0 : i32
    return %c0_i32, %c0_i32_0 : i32, i32
  }
  func.func @transform_11(%arg0: i32) -> (i32, i32) {
    %c0_i32 = arith.constant 0 : i32
    %c0_i32_0 = arith.constant 0 : i32
    return %arg0, %c0_i32 : i32, i32
  }
  func.func @transform_12(%arg0: i32) -> (i32, i32) {
    %c0_i32 = arith.constant 0 : i32
    %c0_i32_0 = arith.constant 0 : i32
    return %arg0, %c0_i32 : i32, i32
  }
}

module attributes {stable_mosaic.version = 11 : i64} {
  func.func @odelstm_kernel(%arg0: i32, %arg1: memref<8x16xf32, #tpu.memory_space<vmem>>, %arg2: memref<8x32xf32, #tpu.memory_space<vmem>>, %arg3: memref<8x32xf32, #tpu.memory_space<vmem>>, %arg4: memref<8x1xf32, #tpu.memory_space<vmem>>, %arg5: memref<16x512xf32, #tpu.memory_space<vmem>>, %arg6: memref<32x512xf32, #tpu.memory_space<vmem>>, %arg7: memref<1x512xf32, #tpu.memory_space<vmem>>, %arg8: memref<32x32xf32, #tpu.memory_space<vmem>>, %arg9: memref<1x32xf32, #tpu.memory_space<vmem>>, %arg10: memref<32x32xf32, #tpu.memory_space<vmem>>, %arg11: memref<1x32xf32, #tpu.memory_space<vmem>>, %arg12: memref<8x32xf32, #tpu.memory_space<vmem>>, %arg13: memref<8x32xf32, #tpu.memory_space<vmem>>) attributes {dimension_semantics = [#tpu.dimension_semantics<parallel>], iteration_bounds = array<i64: 2>, scalar_prefetch = 0 : i64, scratch_operands = 0 : i64, tpu.core_type = #tpu.core_type<tc>, window_params = [{transform_indices = @transform_0, window_bounds = array<i64: 8, 16>}, {transform_indices = @transform_1, window_bounds = array<i64: 8, 32>}, {transform_indices = @transform_2, window_bounds = array<i64: 8, 32>}, {transform_indices = @transform_3, window_bounds = array<i64: 8, 1>}, {pipeline_mode = #tpu.pipeline_mode<synchronous>, transform_indices = @transform_4, window_bounds = array<i64: 16, 512>}, {pipeline_mode = #tpu.pipeline_mode<synchronous>, transform_indices = @transform_5, window_bounds = array<i64: 32, 512>}, {pipeline_mode = #tpu.pipeline_mode<synchronous>, transform_indices = @transform_6, window_bounds = array<i64: 1, 512>}, {pipeline_mode = #tpu.pipeline_mode<synchronous>, transform_indices = @transform_7, window_bounds = array<i64: 32, 32>}, {pipeline_mode = #tpu.pipeline_mode<synchronous>, transform_indices = @transform_8, window_bounds = array<i64: 1, 32>}, {pipeline_mode = #tpu.pipeline_mode<synchronous>, transform_indices = @transform_9, window_bounds = array<i64: 32, 32>}, {pipeline_mode = #tpu.pipeline_mode<synchronous>, transform_indices = @transform_10, window_bounds = array<i64: 1, 32>}, {transform_indices = @transform_11, window_bounds = array<i64: 8, 32>}, {transform_indices = @transform_12, window_bounds = array<i64: 8, 32>}]} {
    %c0 = arith.constant 0 : index
    %c0_0 = arith.constant 0 : index
    %0 = vector.load %arg1[%c0, %c0_0] : memref<8x16xf32, #tpu.memory_space<vmem>>, vector<8x16xf32>
    %c0_1 = arith.constant 0 : index
    %c0_2 = arith.constant 0 : index
    %1 = vector.load %arg2[%c0_1, %c0_2] : memref<8x32xf32, #tpu.memory_space<vmem>>, vector<8x32xf32>
    %c0_3 = arith.constant 0 : index
    %c0_4 = arith.constant 0 : index
    %2 = vector.load %arg3[%c0_3, %c0_4] : memref<8x32xf32, #tpu.memory_space<vmem>>, vector<8x32xf32>
    %c0_5 = arith.constant 0 : index
    %c0_6 = arith.constant 0 : index
    %3 = vector.load %arg5[%c0_5, %c0_6] : memref<16x512xf32, #tpu.memory_space<vmem>>, vector<16x512xf32>
    %cst = arith.constant dense<0.000000e+00> : vector<8x512xf32>
    %4 = tpu.matmul %0, %3, %cst {dimension_numbers = #tpu.dot_dimension_numbers<[1], [0], [0], [1], [0, 0, 1, 1], [], []>} : vector<8x16xf32>, vector<16x512xf32>, vector<8x512xf32> -> vector<8x512xf32>
    %c0_7 = arith.constant 0 : index
    %c0_8 = arith.constant 0 : index
    %5 = vector.load %arg6[%c0_7, %c0_8] : memref<32x512xf32, #tpu.memory_space<vmem>>, vector<32x512xf32>
    %cst_9 = arith.constant dense<0.000000e+00> : vector<8x512xf32>
    %6 = tpu.matmul %1, %5, %cst_9 {dimension_numbers = #tpu.dot_dimension_numbers<[1], [0], [0], [1], [0, 0, 1, 1], [], []>} : vector<8x32xf32>, vector<32x512xf32>, vector<8x512xf32> -> vector<8x512xf32>
    %7 = arith.addf %4, %6 : vector<8x512xf32>
    %c0_10 = arith.constant 0 : index
    %c0_11 = arith.constant 0 : index
    %8 = vector.load %arg7[%c0_10, %c0_11] : memref<1x512xf32, #tpu.memory_space<vmem>>, vector<1x512xf32>
    %9 = vector.broadcast %8 : vector<1x512xf32> to vector<8x512xf32>
    %10 = arith.addf %7, %9 : vector<8x512xf32>
    %11 = vector.extract_strided_slice %10 {offsets = [0, 0], sizes = [8, 32], strides = [1, 1]} : vector<8x512xf32> to vector<8x32xf32>
    %12 = arith.negf %11 : vector<8x32xf32>
    %13 = math.exp %12 : vector<8x32xf32>
    %cst_12 = arith.constant 1.000000e+00 : f32
    %14 = vector.broadcast %cst_12 : f32 to vector<8x32xf32>
    %15 = arith.addf %14, %13 : vector<8x32xf32>
    %16 = arith.divf %14, %15 : vector<8x32xf32>
    %17 = vector.extract_strided_slice %10 {offsets = [0, 128], sizes = [8, 32], strides = [1, 1]} : vector<8x512xf32> to vector<8x32xf32>
    %18 = arith.negf %17 : vector<8x32xf32>
    %19 = math.exp %18 : vector<8x32xf32>
    %cst_13 = arith.constant 1.000000e+00 : f32
    %20 = vector.broadcast %cst_13 : f32 to vector<8x32xf32>
    %21 = arith.addf %20, %19 : vector<8x32xf32>
    %22 = arith.divf %20, %21 : vector<8x32xf32>
    %23 = vector.extract_strided_slice %10 {offsets = [0, 256], sizes = [8, 32], strides = [1, 1]} : vector<8x512xf32> to vector<8x32xf32>
    %24 = math.tanh %23 : vector<8x32xf32>
    %25 = vector.extract_strided_slice %10 {offsets = [0, 384], sizes = [8, 32], strides = [1, 1]} : vector<8x512xf32> to vector<8x32xf32>
    %26 = arith.negf %25 : vector<8x32xf32>
    %27 = math.exp %26 : vector<8x32xf32>
    %cst_14 = arith.constant 1.000000e+00 : f32
    %28 = vector.broadcast %cst_14 : f32 to vector<8x32xf32>
    %29 = arith.addf %28, %27 : vector<8x32xf32>
    %30 = arith.divf %28, %29 : vector<8x32xf32>
    %31 = arith.mulf %22, %2 : vector<8x32xf32>
    %32 = arith.mulf %16, %24 : vector<8x32xf32>
    %33 = arith.addf %31, %32 : vector<8x32xf32>
    %34 = math.tanh %33 : vector<8x32xf32>
    %35 = arith.mulf %30, %34 : vector<8x32xf32>
    %c0_15 = arith.constant 0 : index
    %c0_16 = arith.constant 0 : index
    %36 = vector.load %arg13[%c0_15, %c0_16] : memref<8x32xf32, #tpu.memory_space<vmem>>, vector<8x32xf32>
    tpu.vector_store %arg13[%c0_15, %c0_16], %33 {strides = array<i32>} : memref<8x32xf32, #tpu.memory_space<vmem>>, vector<8x32xf32>,
    %c0_17 = arith.constant 0 : index
    %c0_18 = arith.constant 0 : index
    %37 = vector.load %arg8[%c0_17, %c0_18] : memref<32x32xf32, #tpu.memory_space<vmem>>, vector<32x32xf32>
    %c0_19 = arith.constant 0 : index
    %c0_20 = arith.constant 0 : index
    %38 = vector.load %arg10[%c0_19, %c0_20] : memref<32x32xf32, #tpu.memory_space<vmem>>, vector<32x32xf32>
    %c0_21 = arith.constant 0 : index
    %c0_22 = arith.constant 0 : index
    %39 = vector.load %arg9[%c0_21, %c0_22] : memref<1x32xf32, #tpu.memory_space<vmem>>, vector<1x32xf32>
    %c0_23 = arith.constant 0 : index
    %c0_24 = arith.constant 0 : index
    %40 = vector.load %arg11[%c0_23, %c0_24] : memref<1x32xf32, #tpu.memory_space<vmem>>, vector<1x32xf32>
    %c0_25 = arith.constant 0 : index
    %c0_26 = arith.constant 0 : index
    %41 = vector.load %arg4[%c0_25, %c0_26] : memref<8x1xf32, #tpu.memory_space<vmem>>, vector<8x1xf32>
    %cst_27 = arith.constant 0.333333343 : f32
    %42 = vector.broadcast %cst_27 : f32 to vector<8x1xf32>
    %43 = arith.mulf %41, %42 : vector<8x1xf32>
    %44 = vector.shape_cast %43 : vector<8x1xf32> to vector<8x1xf32>
    %45 = vector.broadcast %44 : vector<8x1xf32> to vector<8x32xf32>
    %c0_i32 = arith.constant 0 : i32
    %cst_28 = arith.constant dense<0.000000e+00> : vector<8x32xf32>
    %46 = tpu.matmul %35, %37, %cst_28 {dimension_numbers = #tpu.dot_dimension_numbers<[1], [0], [0], [1], [0, 0, 1, 1], [], []>} : vector<8x32xf32>, vector<32x32xf32>, vector<8x32xf32> -> vector<8x32xf32>
    %47 = vector.broadcast %39 : vector<1x32xf32> to vector<8x32xf32>
    %48 = arith.addf %46, %47 : vector<8x32xf32>
    %49 = math.tanh %48 : vector<8x32xf32>
    %cst_29 = arith.constant dense<0.000000e+00> : vector<8x32xf32>
    %50 = tpu.matmul %49, %38, %cst_29 {dimension_numbers = #tpu.dot_dimension_numbers<[1], [0], [0], [1], [0, 0, 1, 1], [], []>} : vector<8x32xf32>, vector<32x32xf32>, vector<8x32xf32> -> vector<8x32xf32>
    %51 = vector.broadcast %40 : vector<1x32xf32> to vector<8x32xf32>
    %52 = arith.addf %50, %51 : vector<8x32xf32>
    %cst_30 = arith.constant 5.000000e-01 : f32
    %53 = vector.broadcast %cst_30 : f32 to vector<8x32xf32>
    %54 = arith.mulf %52, %53 : vector<8x32xf32>
    %55 = arith.mulf %54, %45 : vector<8x32xf32>
    %56 = arith.addf %35, %55 : vector<8x32xf32>
    %cst_31 = arith.constant dense<0.000000e+00> : vector<8x32xf32>
    %57 = tpu.matmul %56, %37, %cst_31 {dimension_numbers = #tpu.dot_dimension_numbers<[1], [0], [0], [1], [0, 0, 1, 1], [], []>} : vector<8x32xf32>, vector<32x32xf32>, vector<8x32xf32> -> vector<8x32xf32>
    %58 = vector.broadcast %39 : vector<1x32xf32> to vector<8x32xf32>
    %59 = arith.addf %57, %58 : vector<8x32xf32>
    %60 = math.tanh %59 : vector<8x32xf32>
    %cst_32 = arith.constant dense<0.000000e+00> : vector<8x32xf32>
    %61 = tpu.matmul %60, %38, %cst_32 {dimension_numbers = #tpu.dot_dimension_numbers<[1], [0], [0], [1], [0, 0, 1, 1], [], []>} : vector<8x32xf32>, vector<32x32xf32>, vector<8x32xf32> -> vector<8x32xf32>
    %62 = vector.broadcast %40 : vector<1x32xf32> to vector<8x32xf32>
    %63 = arith.addf %61, %62 : vector<8x32xf32>
    %cst_33 = arith.constant 2.000000e+00 : f32
    %64 = vector.broadcast %cst_33 : f32 to vector<8x32xf32>
    %65 = arith.mulf %64, %63 : vector<8x32xf32>
    %66 = arith.addf %52, %65 : vector<8x32xf32>
    %cst_34 = arith.constant 5.000000e-01 : f32
    %67 = vector.broadcast %cst_34 : f32 to vector<8x32xf32>
    %68 = arith.mulf %63, %67 : vector<8x32xf32>
    %69 = arith.mulf %68, %45 : vector<8x32xf32>
    %70 = arith.addf %35, %69 : vector<8x32xf32>
    %cst_35 = arith.constant dense<0.000000e+00> : vector<8x32xf32>
    %71 = tpu.matmul %70, %37, %cst_35 {dimension_numbers = #tpu.dot_dimension_numbers<[1], [0], [0], [1], [0, 0, 1, 1], [], []>} : vector<8x32xf32>, vector<32x32xf32>, vector<8x32xf32> -> vector<8x32xf32>
    %72 = vector.broadcast %39 : vector<1x32xf32> to vector<8x32xf32>
    %73 = arith.addf %71, %72 : vector<8x32xf32>
    %74 = math.tanh %73 : vector<8x32xf32>
    %cst_36 = arith.constant dense<0.000000e+00> : vector<8x32xf32>
    %75 = tpu.matmul %74, %38, %cst_36 {dimension_numbers = #tpu.dot_dimension_numbers<[1], [0], [0], [1], [0, 0, 1, 1], [], []>} : vector<8x32xf32>, vector<32x32xf32>, vector<8x32xf32> -> vector<8x32xf32>
    %76 = vector.broadcast %40 : vector<1x32xf32> to vector<8x32xf32>
    %77 = arith.addf %75, %76 : vector<8x32xf32>
    %cst_37 = arith.constant 2.000000e+00 : f32
    %78 = vector.broadcast %cst_37 : f32 to vector<8x32xf32>
    %79 = arith.mulf %78, %77 : vector<8x32xf32>
    %80 = arith.addf %66, %79 : vector<8x32xf32>
    %81 = arith.mulf %77, %45 : vector<8x32xf32>
    %82 = arith.addf %35, %81 : vector<8x32xf32>
    %cst_38 = arith.constant dense<0.000000e+00> : vector<8x32xf32>
    %83 = tpu.matmul %82, %37, %cst_38 {dimension_numbers = #tpu.dot_dimension_numbers<[1], [0], [0], [1], [0, 0, 1, 1], [], []>} : vector<8x32xf32>, vector<32x32xf32>, vector<8x32xf32> -> vector<8x32xf32>
    %84 = vector.broadcast %39 : vector<1x32xf32> to vector<8x32xf32>
    %85 = arith.addf %83, %84 : vector<8x32xf32>
    %86 = math.tanh %85 : vector<8x32xf32>
    %cst_39 = arith.constant dense<0.000000e+00> : vector<8x32xf32>
    %87 = tpu.matmul %86, %38, %cst_39 {dimension_numbers = #tpu.dot_dimension_numbers<[1], [0], [0], [1], [0, 0, 1, 1], [], []>} : vector<8x32xf32>, vector<32x32xf32>, vector<8x32xf32> -> vector<8x32xf32>
    %88 = vector.broadcast %40 : vector<1x32xf32> to vector<8x32xf32>
    %89 = arith.addf %87, %88 : vector<8x32xf32>
    %90 = arith.addf %80, %89 : vector<8x32xf32>
    %cst_40 = arith.constant 0.166666672 : f32
    %91 = vector.broadcast %cst_40 : f32 to vector<8x32xf32>
    %92 = arith.mulf %90, %91 : vector<8x32xf32>
    %93 = arith.mulf %45, %92 : vector<8x32xf32>
    %94 = arith.addf %35, %93 : vector<8x32xf32>
    %c1_i32 = arith.constant 1 : i32
    %cst_41 = arith.constant dense<0.000000e+00> : vector<8x32xf32>
    %95 = tpu.matmul %94, %37, %cst_41 {dimension_numbers = #tpu.dot_dimension_numbers<[1], [0], [0], [1], [0, 0, 1, 1], [], []>} : vector<8x32xf32>, vector<32x32xf32>, vector<8x32xf32> -> vector<8x32xf32>
    %96 = vector.broadcast %39 : vector<1x32xf32> to vector<8x32xf32>
    %97 = arith.addf %95, %96 : vector<8x32xf32>
    %98 = math.tanh %97 : vector<8x32xf32>
    %cst_42 = arith.constant dense<0.000000e+00> : vector<8x32xf32>
    %99 = tpu.matmul %98, %38, %cst_42 {dimension_numbers = #tpu.dot_dimension_numbers<[1], [0], [0], [1], [0, 0, 1, 1], [], []>} : vector<8x32xf32>, vector<32x32xf32>, vector<8x32xf32> -> vector<8x32xf32>
    %100 = vector.broadcast %40 : vector<1x32xf32> to vector<8x32xf32>
    %101 = arith.addf %99, %100 : vector<8x32xf32>
    %cst_43 = arith.constant 5.000000e-01 : f32
    %102 = vector.broadcast %cst_43 : f32 to vector<8x32xf32>
    %103 = arith.mulf %101, %102 : vector<8x32xf32>
    %104 = arith.mulf %103, %45 : vector<8x32xf32>
    %105 = arith.addf %94, %104 : vector<8x32xf32>
    %cst_44 = arith.constant dense<0.000000e+00> : vector<8x32xf32>
    %106 = tpu.matmul %105, %37, %cst_44 {dimension_numbers = #tpu.dot_dimension_numbers<[1], [0], [0], [1], [0, 0, 1, 1], [], []>} : vector<8x32xf32>, vector<32x32xf32>, vector<8x32xf32> -> vector<8x32xf32>
    %107 = vector.broadcast %39 : vector<1x32xf32> to vector<8x32xf32>
    %108 = arith.addf %106, %107 : vector<8x32xf32>
    %109 = math.tanh %108 : vector<8x32xf32>
    %cst_45 = arith.constant dense<0.000000e+00> : vector<8x32xf32>
    %110 = tpu.matmul %109, %38, %cst_45 {dimension_numbers = #tpu.dot_dimension_numbers<[1], [0], [0], [1], [0, 0, 1, 1], [], []>} : vector<8x32xf32>, vector<32x32xf32>, vector<8x32xf32> -> vector<8x32xf32>
    %111 = vector.broadcast %40 : vector<1x32xf32> to vector<8x32xf32>
    %112 = arith.addf %110, %111 : vector<8x32xf32>
    %cst_46 = arith.constant 2.000000e+00 : f32
    %113 = vector.broadcast %cst_46 : f32 to vector<8x32xf32>
    %114 = arith.mulf %113, %112 : vector<8x32xf32>
    %115 = arith.addf %101, %114 : vector<8x32xf32>
    %cst_47 = arith.constant 5.000000e-01 : f32
    %116 = vector.broadcast %cst_47 : f32 to vector<8x32xf32>
    %117 = arith.mulf %112, %116 : vector<8x32xf32>
    %118 = arith.mulf %117, %45 : vector<8x32xf32>
    %119 = arith.addf %94, %118 : vector<8x32xf32>
    %cst_48 = arith.constant dense<0.000000e+00> : vector<8x32xf32>
    %120 = tpu.matmul %119, %37, %cst_48 {dimension_numbers = #tpu.dot_dimension_numbers<[1], [0], [0], [1], [0, 0, 1, 1], [], []>} : vector<8x32xf32>, vector<32x32xf32>, vector<8x32xf32> -> vector<8x32xf32>
    %121 = vector.broadcast %39 : vector<1x32xf32> to vector<8x32xf32>
    %122 = arith.addf %120, %121 : vector<8x32xf32>
    %123 = math.tanh %122 : vector<8x32xf32>
    %cst_49 = arith.constant dense<0.000000e+00> : vector<8x32xf32>
    %124 = tpu.matmul %123, %38, %cst_49 {dimension_numbers = #tpu.dot_dimension_numbers<[1], [0], [0], [1], [0, 0, 1, 1], [], []>} : vector<8x32xf32>, vector<32x32xf32>, vector<8x32xf32> -> vector<8x32xf32>
    %125 = vector.broadcast %40 : vector<1x32xf32> to vector<8x32xf32>
    %126 = arith.addf %124, %125 : vector<8x32xf32>
    %cst_50 = arith.constant 2.000000e+00 : f32
    %127 = vector.broadcast %cst_50 : f32 to vector<8x32xf32>
    %128 = arith.mulf %127, %126 : vector<8x32xf32>
    %129 = arith.addf %115, %128 : vector<8x32xf32>
    %130 = arith.mulf %126, %45 : vector<8x32xf32>
    %131 = arith.addf %94, %130 : vector<8x32xf32>
    %cst_51 = arith.constant dense<0.000000e+00> : vector<8x32xf32>
    %132 = tpu.matmul %131, %37, %cst_51 {dimension_numbers = #tpu.dot_dimension_numbers<[1], [0], [0], [1], [0, 0, 1, 1], [], []>} : vector<8x32xf32>, vector<32x32xf32>, vector<8x32xf32> -> vector<8x32xf32>
    %133 = vector.broadcast %39 : vector<1x32xf32> to vector<8x32xf32>
    %134 = arith.addf %132, %133 : vector<8x32xf32>
    %135 = math.tanh %134 : vector<8x32xf32>
    %cst_52 = arith.constant dense<0.000000e+00> : vector<8x32xf32>
    %136 = tpu.matmul %135, %38, %cst_52 {dimension_numbers = #tpu.dot_dimension_numbers<[1], [0], [0], [1], [0, 0, 1, 1], [], []>} : vector<8x32xf32>, vector<32x32xf32>, vector<8x32xf32> -> vector<8x32xf32>
    %137 = vector.broadcast %40 : vector<1x32xf32> to vector<8x32xf32>
    %138 = arith.addf %136, %137 : vector<8x32xf32>
    %139 = arith.addf %129, %138 : vector<8x32xf32>
    %cst_53 = arith.constant 0.166666672 : f32
    %140 = vector.broadcast %cst_53 : f32 to vector<8x32xf32>
    %141 = arith.mulf %139, %140 : vector<8x32xf32>
    %142 = arith.mulf %45, %141 : vector<8x32xf32>
    %143 = arith.addf %94, %142 : vector<8x32xf32>
    %c2_i32 = arith.constant 2 : i32
    %cst_54 = arith.constant dense<0.000000e+00> : vector<8x32xf32>
    %144 = tpu.matmul %143, %37, %cst_54 {dimension_numbers = #tpu.dot_dimension_numbers<[1], [0], [0], [1], [0, 0, 1, 1], [], []>} : vector<8x32xf32>, vector<32x32xf32>, vector<8x32xf32> -> vector<8x32xf32>
    %145 = vector.broadcast %39 : vector<1x32xf32> to vector<8x32xf32>
    %146 = arith.addf %144, %145 : vector<8x32xf32>
    %147 = math.tanh %146 : vector<8x32xf32>
    %cst_55 = arith.constant dense<0.000000e+00> : vector<8x32xf32>
    %148 = tpu.matmul %147, %38, %cst_55 {dimension_numbers = #tpu.dot_dimension_numbers<[1], [0], [0], [1], [0, 0, 1, 1], [], []>} : vector<8x32xf32>, vector<32x32xf32>, vector<8x32xf32> -> vector<8x32xf32>
    %149 = vector.broadcast %40 : vector<1x32xf32> to vector<8x32xf32>
    %150 = arith.addf %148, %149 : vector<8x32xf32>
    %cst_56 = arith.constant 5.000000e-01 : f32
    %151 = vector.broadcast %cst_56 : f32 to vector<8x32xf32>
    %152 = arith.mulf %150, %151 : vector<8x32xf32>
    %153 = arith.mulf %152, %45 : vector<8x32xf32>
    %154 = arith.addf %143, %153 : vector<8x32xf32>
    %cst_57 = arith.constant dense<0.000000e+00> : vector<8x32xf32>
    %155 = tpu.matmul %154, %37, %cst_57 {dimension_numbers = #tpu.dot_dimension_numbers<[1], [0], [0], [1], [0, 0, 1, 1], [], []>} : vector<8x32xf32>, vector<32x32xf32>, vector<8x32xf32> -> vector<8x32xf32>
    %156 = vector.broadcast %39 : vector<1x32xf32> to vector<8x32xf32>
    %157 = arith.addf %155, %156 : vector<8x32xf32>
    %158 = math.tanh %157 : vector<8x32xf32>
    %cst_58 = arith.constant dense<0.000000e+00> : vector<8x32xf32>
    %159 = tpu.matmul %158, %38, %cst_58 {dimension_numbers = #tpu.dot_dimension_numbers<[1], [0], [0], [1], [0, 0, 1, 1], [], []>} : vector<8x32xf32>, vector<32x32xf32>, vector<8x32xf32> -> vector<8x32xf32>
    %160 = vector.broadcast %40 : vector<1x32xf32> to vector<8x32xf32>
    %161 = arith.addf %159, %160 : vector<8x32xf32>
    %cst_59 = arith.constant 2.000000e+00 : f32
    %162 = vector.broadcast %cst_59 : f32 to vector<8x32xf32>
    %163 = arith.mulf %162, %161 : vector<8x32xf32>
    %164 = arith.addf %150, %163 : vector<8x32xf32>
    %cst_60 = arith.constant 5.000000e-01 : f32
    %165 = vector.broadcast %cst_60 : f32 to vector<8x32xf32>
    %166 = arith.mulf %161, %165 : vector<8x32xf32>
    %167 = arith.mulf %166, %45 : vector<8x32xf32>
    %168 = arith.addf %143, %167 : vector<8x32xf32>
    %cst_61 = arith.constant dense<0.000000e+00> : vector<8x32xf32>
    %169 = tpu.matmul %168, %37, %cst_61 {dimension_numbers = #tpu.dot_dimension_numbers<[1], [0], [0], [1], [0, 0, 1, 1], [], []>} : vector<8x32xf32>, vector<32x32xf32>, vector<8x32xf32> -> vector<8x32xf32>
    %170 = vector.broadcast %39 : vector<1x32xf32> to vector<8x32xf32>
    %171 = arith.addf %169, %170 : vector<8x32xf32>
    %172 = math.tanh %171 : vector<8x32xf32>
    %cst_62 = arith.constant dense<0.000000e+00> : vector<8x32xf32>
    %173 = tpu.matmul %172, %38, %cst_62 {dimension_numbers = #tpu.dot_dimension_numbers<[1], [0], [0], [1], [0, 0, 1, 1], [], []>} : vector<8x32xf32>, vector<32x32xf32>, vector<8x32xf32> -> vector<8x32xf32>
    %174 = vector.broadcast %40 : vector<1x32xf32> to vector<8x32xf32>
    %175 = arith.addf %173, %174 : vector<8x32xf32>
    %cst_63 = arith.constant 2.000000e+00 : f32
    %176 = vector.broadcast %cst_63 : f32 to vector<8x32xf32>
    %177 = arith.mulf %176, %175 : vector<8x32xf32>
    %178 = arith.addf %164, %177 : vector<8x32xf32>
    %179 = arith.mulf %175, %45 : vector<8x32xf32>
    %180 = arith.addf %143, %179 : vector<8x32xf32>
    %cst_64 = arith.constant dense<0.000000e+00> : vector<8x32xf32>
    %181 = tpu.matmul %180, %37, %cst_64 {dimension_numbers = #tpu.dot_dimension_numbers<[1], [0], [0], [1], [0, 0, 1, 1], [], []>} : vector<8x32xf32>, vector<32x32xf32>, vector<8x32xf32> -> vector<8x32xf32>
    %182 = vector.broadcast %39 : vector<1x32xf32> to vector<8x32xf32>
    %183 = arith.addf %181, %182 : vector<8x32xf32>
    %184 = math.tanh %183 : vector<8x32xf32>
    %cst_65 = arith.constant dense<0.000000e+00> : vector<8x32xf32>
    %185 = tpu.matmul %184, %38, %cst_65 {dimension_numbers = #tpu.dot_dimension_numbers<[1], [0], [0], [1], [0, 0, 1, 1], [], []>} : vector<8x32xf32>, vector<32x32xf32>, vector<8x32xf32> -> vector<8x32xf32>
    %186 = vector.broadcast %40 : vector<1x32xf32> to vector<8x32xf32>
    %187 = arith.addf %185, %186 : vector<8x32xf32>
    %188 = arith.addf %178, %187 : vector<8x32xf32>
    %cst_66 = arith.constant 0.166666672 : f32
    %189 = vector.broadcast %cst_66 : f32 to vector<8x32xf32>
    %190 = arith.mulf %188, %189 : vector<8x32xf32>
    %191 = arith.mulf %45, %190 : vector<8x32xf32>
    %192 = arith.addf %143, %191 : vector<8x32xf32>
    %c0_67 = arith.constant 0 : index
    %c0_68 = arith.constant 0 : index
    %193 = vector.load %arg12[%c0_67, %c0_68] : memref<8x32xf32, #tpu.memory_space<vmem>>, vector<8x32xf32>
    tpu.vector_store %arg12[%c0_67, %c0_68], %192 {strides = array<i32>} : memref<8x32xf32, #tpu.memory_space<vmem>>, vector<8x32xf32>,
    return
  }
  func.func @transform_0(%arg0: i32) -> (i32, i32) {
    %c0_i32 = arith.constant 0 : i32
    %c0_i32_0 = arith.constant 0 : i32
    return %arg0, %c0_i32 : i32, i32
  }
  func.func @transform_1(%arg0: i32) -> (i32, i32) {
    %c0_i32 = arith.constant 0 : i32
    %c0_i32_0 = arith.constant 0 : i32
    return %arg0, %c0_i32 : i32, i32
  }
  func.func @transform_2(%arg0: i32) -> (i32, i32) {
    %c0_i32 = arith.constant 0 : i32
    %c0_i32_0 = arith.constant 0 : i32
    return %arg0, %c0_i32 : i32, i32
  }
  func.func @transform_3(%arg0: i32) -> (i32, i32) {
    %c0_i32 = arith.constant 0 : i32
    %c0_i32_0 = arith.constant 0 : i32
    return %arg0, %c0_i32 : i32, i32
  }
  func.func @transform_4(%arg0: i32) -> (i32, i32) {
    %c0_i32 = arith.constant 0 : i32
    %c0_i32_0 = arith.constant 0 : i32
    %c0_i32_1 = arith.constant 0 : i32
    return %c0_i32, %c0_i32_0 : i32, i32
  }
  func.func @transform_5(%arg0: i32) -> (i32, i32) {
    %c0_i32 = arith.constant 0 : i32
    %c0_i32_0 = arith.constant 0 : i32
    %c0_i32_1 = arith.constant 0 : i32
    return %c0_i32, %c0_i32_0 : i32, i32
  }
  func.func @transform_6(%arg0: i32) -> (i32, i32) {
    %c0_i32 = arith.constant 0 : i32
    %c0_i32_0 = arith.constant 0 : i32
    %c0_i32_1 = arith.constant 0 : i32
    return %c0_i32, %c0_i32_0 : i32, i32
  }
  func.func @transform_7(%arg0: i32) -> (i32, i32) {
    %c0_i32 = arith.constant 0 : i32
    %c0_i32_0 = arith.constant 0 : i32
    %c0_i32_1 = arith.constant 0 : i32
    return %c0_i32, %c0_i32_0 : i32, i32
  }
  func.func @transform_8(%arg0: i32) -> (i32, i32) {
    %c0_i32 = arith.constant 0 : i32
    %c0_i32_0 = arith.constant 0 : i32
    %c0_i32_1 = arith.constant 0 : i32
    return %c0_i32, %c0_i32_0 : i32, i32
  }
  func.func @transform_9(%arg0: i32) -> (i32, i32) {
    %c0_i32 = arith.constant 0 : i32
    %c0_i32_0 = arith.constant 0 : i32
    %c0_i32_1 = arith.constant 0 : i32
    return %c0_i32, %c0_i32_0 : i32, i32
  }
  func.func @transform_10(%arg0: i32) -> (i32, i32) {
    %c0_i32 = arith.constant 0 : i32
    %c0_i32_0 = arith.constant 0 : i32
    %c0_i32_1 = arith.constant 0 : i32
    return %c0_i32, %c0_i32_0 : i32, i32
  }
  func.func @transform_11(%arg0: i32) -> (i32, i32) {
    %c0_i32 = arith.constant 0 : i32
    %c0_i32_0 = arith.constant 0 : i32
    return %arg0, %c0_i32 : i32, i32
  }
  func.func @transform_12(%arg0: i32) -> (i32, i32) {
    %c0_i32 = arith.constant 0 : i32
    %c0_i32_0 = arith.constant 0 : i32
    return %arg0, %c0_i32 : i32, i32
  }
}

</mosaic_0001>

<bundles_post_ra>
// kernel: ode_lstm_cell.1
= control target key start
LH: loop header
LB: loop body
LE: loop exit
PB: predicated region body
PF: predicated region fallthrough
CT: control target
= control target key end

     0   :  { %s4683_s0 = inlined_call_operand.hbm [shape: f32[16,16], index: 0, kind: input, shape index: {}]   ;;  %s4684_s1 = inlined_call_operand.hbm [shape: f32[16,32], index: 1, kind: input, shape index: {}]   ;;  %s4685_s2 = inlined_call_operand.hbm [shape: f32[16,32], index: 2, kind: input, shape index: {}]   ;;  %s4686_s3 = inlined_call_operand.vmem [shape: f32[16,1], index: 3, kind: input, shape index: {}]   ;;  %s4687_s4 = inlined_call_operand.hbm [shape: f32[16,512], index: 4, kind: input, shape index: {}]   ;;  %s4688_s5 = inlined_call_operand.hbm [shape: f32[32,512], index: 5, kind: input, shape index: {}]   ;;  %s4689_s6 = inlined_call_operand.hbm [shape: f32[1,512], index: 6, kind: input, shape index: {}]   ;;  %s4690_s7 = inlined_call_operand.hbm [shape: f32[32,32], index: 7, kind: input, shape index: {}]   ;;  %s4691_s8 = inlined_call_operand.vmem [shape: f32[1,32], index: 8, kind: input, shape index: {}]   ;;  %s4692_s9 = inlined_call_operand.vmem [shape: f32[32,32], index: 9, kind: input, shape index: {}]   ;;  %s4693_s10 = inlined_call_operand.vmem [shape: f32[1,32], index: 10, kind: input, shape index: {}]   ;;  %s4694_s11 = inlined_call_operand.hbm [shape: f32[16,32], index: 11, kind: output, shape index: {0}]   ;;  %s4695_s12 = inlined_call_operand.hbm [shape: f32[16,32], index: 12, kind: output, shape index: {1}]  }
   0x1   :  { %4717 = sst [smem:[#allocation29_spill]] %s4684_s1 }
   0x2   :  { %4718 = sst [smem:[#allocation30_spill]] %s4687_s4 }
   0x3   :  { %4719 = sst [smem:[#allocation31_spill]] %s4688_s5 }
   0x4   :  { %4720 = sst [smem:[#allocation32_spill]] %s4689_s6 }
   0x5   :  { %4721 = sst [smem:[#allocation33_spill]] %s4694_s11 }
   0x6   :  { %4722 = sst [smem:[#allocation34_spill]] %s4695_s12 }
   0x7   :  { %18 = vsyncpa [#allocation3], 0 }
   0x8   :  { %20 = vsyncpa [#allocation3 + $0x1], 0 }
   0x9   :  { %21 = vsyncpa [#allocation6], 0 }
   0xa   :  { %23 = vsyncpa [#allocation6 + $0x1], 0 }
   0xb   :  { %24 = vsyncpa [#allocation9], 0 }
   0xc   :  { %25 = vsyncpa [#allocation12], 0 }
   0xd   :  { %26 = vsyncpa [#allocation4], 0 }
   0xe   :  { %28 = vsyncpa [#allocation4 + $0x1], 0 }
   0xf   :  { %29 = vsyncpa [#allocation16], 0 }
  0x10   :  { %31 = vsyncpa [#allocation16 + $0x1], 0  ;;  %s3997_s21 = smov 0   ;;  %s3999_s22 = smov 0  }
  0x11   :  { %s4001_s23 = smov 0   ;;  %s4003_s24 = smov 0  }
  0x12 LB: > { %4723 = sst [smem:[#allocation23_spill]] %s3902_s21  ;;  %s3916_s25 = smov [#allocation8]   ;;  %s3914_s24 = sphi %s4003_s24, %s4762_s24   ;;  %s3910_s23 = sphi %s4001_s23, %s4766_s23   ;;  %s3906_s22 = sphi %s3999_s22, %s4765_s22   ;;  %s3902_s21 = sphi %s3997_s21, %s4764_s21  }
  0x13   : > { %4724 = sst [smem:[#allocation24_spill]] %s3914_s24  ;;  %s357_s26 = sshll.u32 %s3916_s25, 4  ;;  %s358_s26 = int_to_ptr.vmem [resolvable:$true] %s357_s26 }
  0x14   : > { %s4018_s27 = sadd.s32 4294967295, %s3914_s24   ;;  %p3024_p0 = scmp.ge.s32.totalorder %s3914_s24, 1 }
  0x15   : > { %p4709_p1 = scmp.eq.s32.totalorder %s4018_s27, 0  ;;  %p345_p2 = scmp.lt.s32.totalorder %s3914_s24, 3 }
  0x16   : > { %s3917_s29 = smov [#allocation11]   ;;  %s3631_s14 = scalar_lea.vmem %s358_s26, 1024 }
  0x17   : > { %p4023_p3 = pnand %p3024_p0, %p345_p2  ;;  %s384_s30 = sshll.u32 %s3917_s29, 4  ;;  %s385_s30 = int_to_ptr.vmem [resolvable:$true] %s384_s30 }
  0x18   : > { %p3632_p8 = scmp.ne.s32.totalorder %s358_s26, %s3631_s14  ;;  %p3639_p11 = scmp.lt.s32.totalorder %s358_s26, %s358_s26 }
  0x19   : > { %s4725_s28 = scalar_select %p4023_p3, 1, 0 }
  0x1a   : > { %p3496_p5 = pneg %p4023_p3  ;;  %p3640_p12 = scmp.lt.s32.totalorder %s3631_s14, %s3631_s14 }
  0x1c   : > { %p4032_p6 = pnand %p3496_p5, %p4709_p1  ;;  %p3641_p13 = por %p3640_p12, %p3639_p11 }
  0x1e   : > { %s4726_s13 = scalar_select %p4032_p6, 1, 0 }
  0x1f   : > { %p4696_p7 = pneg %p4032_p6 }
  0x21   : > { %p3634_p9 = pnand %p3632_p8, %p4696_p7 }
  0x23   : > { %p3635_p10 = pneg %p3634_p9 }
  0x25   : > { %p3642_p0 = pnand %p3641_p13, %p3635_p10 }
  0x27   : > { %3645 = shalt.err (!%p3642_p0)
}
  0x28   : > { %s4697_s15 = smov 512   ;;  %s4698_s16 = smov 32  }
  0x29   : > { %s4727_s4 = sld [smem:[#allocation30_spill]]  ;;  %s3657_s19 = scalar_lea.vmem %s385_s30, 64 }
  0x2a   : > { %p3658_p2 = scmp.ne.s32.totalorder %s385_s30, %s3657_s19  ;;  %p3665_p9 = scmp.lt.s32.totalorder %s385_s30, %s385_s30 }
  0x2b   : > { %p3666_p10 = scmp.lt.s32.totalorder %s3657_s19, %s3657_s19 }
  0x2c   : > { %p3660_p5 = pnand %p3658_p2, %p4696_p7 }
  0x2d   : > { %p3667_p11 = por %p3666_p10, %p3665_p9 }
  0x2e   : > { %p3661_p8 = pneg %p3660_p5 }
  0x2f   : > { %3499 = dma.hbm_to_vmem [thread:$0]  (!%p4032_p6), %s4727_s4, 1024, %s358_s26, [#allocation9], %s4697_s15, %s4697_s15, %s4698_s16  }
  0x30   : > { %p3668_p12 = pnand %p3667_p11, %p3661_p8 }
  0x32   : > { %3671 = shalt.err (!%p3668_p12)
}
  0x33   : > { %s4728_s6 = sld [smem:[#allocation32_spill]]  ;;  %s3023_s26 = sadd.s32 4294967294, %s3914_s24  }
  0x34   : > { %s4059_s29 = sadd.s32 1, %s3914_s24   ;;  %s44_s17 = sadd.s32 1, %s3910_s23 }
  0x35   : > { %4729 = sst [smem:[#allocation25_spill]] %s4059_s29  ;;  %s41_s14 = ssub.s32 %s3914_s24, %s4059_s29 }
  0x36   : > { %p42_p13 = scmp.eq.s32.totalorder %s41_s14, 0  ;;  %p51_p0 = scmp.ne.s32.totalorder %s3910_s23, %s3906_s22 }
  0x37   : > { %p52_p2 = scmp.eq.s32.totalorder %s3914_s24, 0  ;;  %p57_p5 = scmp.ne.s32.totalorder %s3906_s22, %s3902_s21 }
  0x38   : > { %s4070_s18 = scalar_select %p42_p13, %s3910_s23, %s44_s17  }
  0x39   : > { %3505 = dma.hbm_to_vmem [thread:$0]  (!%p4032_p6), %s4728_s6, 64, %s385_s30, [#allocation12]  }
  0x3a   : > { %4730 = sst [smem:[#allocation26_spill]] %s4070_s18  ;;  %p53_p8 = por %p52_p2, %p51_p0 }
  0x3b   : > { %p4074_p9 = por %p4709_p1, %p57_p5  ;;  %p306_p10 = scmp.eq.s32.totalorder %s4018_s27, 1 }
  0x3c   : > { %p312_p11 = scmp.eq.s32.totalorder %s3023_s26, 1  ;;  %p3530_p12 = scmp.lt.s32.totalorder %s3914_s24, 2 }
  0x3d   : > { %s4731_s19 = scalar_select %p4074_p9, 1, 0 }
  0x3e   : > { %s4699_s30 = sand.u32 1, %s3910_s23   ;;  %p4081_p4 = por %p306_p10, %p51_p0 }
  0x3f   : > { %p4085_p7 = por %p312_p11, %p57_p5  ;;  %s4091_s14 = sshll.u32 %s4699_s30, 3 }
  0x40   : > { %s4732_s20 = scalar_select %p4081_p4, 1, 0 }
  0x41   : > { %s4734_s25 = scalar_select %p4085_p7, 1, 0 }
  0x42   : > { %4733 = sst [smem:[#allocation27_spill]] %s4732_s20  ;;  %s4094_s17 = sshll.u32 %s3914_s24, 7 }
  0x43   : > { %4735 = sst [smem:[#allocation28_spill]] %s4734_s25  ;;  %p4096_p13 = pnand %p3530_p12, %p53_p8 }
  0x44   : > { %s435_s26 = sand.u32 1, %s3914_s24   ;;  %s4737_s1 = sld [smem:[#allocation29_spill]] }
  0x45   : > { %s439_s30 = scalar_lea.vmem [#allocation5], %s4091_s14  ;;  %s3920_s29 = smov [#allocation10]  }
  0x46   : > { %s446_s18 = sshll.u32 %s439_s30, 4  ;;  %s370_s25 = sshll.u32 %s3920_s29, 4  ;;  %s4108_s18 = int_to_ptr.vmem [resolvable:$true] %s446_s18  ;;  %s371_s25 = int_to_ptr.vmem [resolvable:$true] %s370_s25 }
  0x47   : > { %s4110_s21 = scalar_lea.sflag [#allocation6], %s435_s26  ;;  %p4116_p2 = pneg %p4096_p13 }
  0x49   : > { %s4738_s24 = scalar_select %p4116_p2, 1, 0 }
  0x4a   : > { %s4105_s6 = scalar_lea.hbm %s4737_s1, %s4094_s17  ;;  %s3677_s30 = scalar_lea.hbm %s4737_s1, 256 }
  0x4b   : > { %s3672_s11 = scalar_lea.hbm %s4105_s6, 128  ;;  %p3678_p10 = scmp.lt.s32.totalorder %s4105_s6, %s4737_s1 }
  0x4c   : > { %p3673_p0 = scmp.ne.s32.totalorder %s4105_s6, %s3672_s11  ;;  %p3679_p11 = scmp.lt.s32.totalorder %s3677_s30, %s3672_s11 }
  0x4e   : > { %p3675_p5 = pnand %p4116_p2, %p3673_p0  ;;  %p3680_p12 = por %p3679_p11, %p3678_p10 }
  0x50   : > { %p3676_p8 = pneg %p3675_p5 }
  0x52   : > { %p3681_p1 = pnand %p3680_p12, %p3676_p8 }
  0x54   : > { %3684 = shalt.err (!%p3681_p1)
}
  0x55   : > { %s3685_s29 = scalar_lea.vmem %s4108_s18, 128  ;;  %s3921_s26 = smov [#allocation5]  }
  0x56   : > { %p3686_p7 = scmp.ne.s32.totalorder %s4108_s18, %s3685_s29  ;;  %s3690_s4 = sshll.u32 %s3921_s26, 4  ;;  %s3691_s4 = int_to_ptr.vmem [resolvable:$false] %s3690_s4 }
  0x57   : > { %s3692_s16 = scalar_lea.vmem %s3691_s4, 256  ;;  %p3693_p4 = scmp.lt.s32.totalorder %s4108_s18, %s3691_s4 }
  0x58   : > { %p3688_p0 = pnand %p3686_p7, %p4116_p2  ;;  %p3694_p9 = scmp.lt.s32.totalorder %s3692_s16, %s3685_s29 }
  0x5a   : > { %p3689_p5 = pneg %p3688_p0  ;;  %p3695_p3 = por %p3694_p9, %p3693_p4 }
  0x5c   : > { %p3696_p6 = pnand %p3695_p3, %p3689_p5 }
  0x5e   : > { %3699 = shalt.err (!%p3696_p6)
}
  0x5f   : > { %3515 = dma.hbm_to_vmem [thread:$0]  (!%p4096_p13), %s4105_s6, 128, %s4108_s18, %s4110_s21  }
  0x60   : > { %s3711_s11 = scalar_lea.vmem %s371_s25, 2048  ;;  %p4739_p7 = scmp.ne.s32.totalorder %s4726_s13, 0 }
  0x61   : > { %p3712_p1 = scmp.ne.s32.totalorder %s371_s25, %s3711_s11  ;;  %p3719_p12 = scmp.lt.s32.totalorder %s371_s25, %s371_s25 }
  0x62   : > { %p4740_p8 = pneg %p4739_p7  ;;  %p3720_p0 = scmp.lt.s32.totalorder %s3711_s11, %s3711_s11 }
  0x64   : > { %p3714_p10 = pnand %p3712_p1, %p4740_p8  ;;  %p3721_p2 = por %p3720_p0, %p3719_p12 }
  0x66   : > { %p3715_p11 = pneg %p3714_p10 }
  0x68   : > { %p3722_p4 = pnand %p3721_p2, %p3715_p11 }
  0x6a   : > { %3725 = shalt.err (!%p3722_p4)
}
  0x6b   : > { %s4741_s12 = smov 32   ;;  %s4742_s20 = smov 512  }
  0x6c   : > { %s4743_s5 = sld [smem:[#allocation31_spill]]  ;;  %s3922_s6 = smov [#allocation13]  }
  0x6d   : > { %s394_s18 = sshll.u32 %s3922_s6, 4  ;;  %p4744_p6 = pmov %p4740_p8  ;;  %s395_s18 = int_to_ptr.vmem [resolvable:$true] %s394_s18 }
  0x6e   : > { %s3737_s26 = scalar_lea.vmem %s395_s18, 512  ;;  %p3745_p5 = scmp.lt.s32.totalorder %s395_s18, %s395_s18 }
  0x6f   : > { %p3738_p3 = scmp.ne.s32.totalorder %s395_s18, %s3737_s26  ;;  %p3746_p1 = scmp.lt.s32.totalorder %s3737_s26, %s3737_s26 }
  0x71   : > { %p3740_p9 = pnand %p3738_p3, %p4744_p6  ;;  %p3747_p8 = por %p3746_p1, %p3745_p5 }
  0x72   : > { %3502 = dma.hbm_to_vmem [thread:$0]  (!%p4739_p7), %s4743_s5, 2048, %s371_s25, [#allocation9], %s4742_s20, %s4742_s20, %s4741_s12  }
  0x73   : > { %p3741_p2 = pneg %p3740_p9 }
  0x75   : > { %p3748_p10 = pnand %p3747_p8, %p3741_p2 }
  0x77   : > { %3751 = shalt.err (!%p3748_p10)
}
  0x78   : > { %s3923_s4 = smov 128   ;;  %s3924_s25 = smov 8  }
  0x79   : > { %3508 = dma.hbm_to_vmem [thread:$0]  (!%p4739_p7), %s4690_s7, 512, %s395_s18, [#allocation12], %s3923_s4, %s3923_s4, %s3924_s25  }
  0x7a   : > { %s4162_s30 = scalar_lea.hbm %s4683_s0, %s4094_s17  ;;  %s421_s29 = scalar_lea.vmem [#allocation2], %s4091_s14 }
  0x7b   : > { %s428_s6 = sshll.u32 %s421_s29, 4  ;;  %s4745_s26 = sand.u32 1, %s3910_s23   ;;  %s429_s6 = int_to_ptr.vmem [resolvable:$true] %s428_s6 }
  0x7c   : > { %s418_s1 = scalar_lea.sflag [#allocation3], %s4745_s26  ;;  %s3752_s5 = scalar_lea.hbm %s4162_s30, 128 }
  0x7d   : > { %p3753_p11 = scmp.ne.s32.totalorder %s4162_s30, %s3752_s5  ;;  %p4746_p12 = scmp.ne.s32.totalorder %s4738_s24, 0 }
  0x7e   : > { %s3757_s4 = scalar_lea.hbm %s4683_s0, 256  ;;  %p3758_p7 = scmp.lt.s32.totalorder %s4162_s30, %s4683_s0 }
  0x7f   : > { %p3755_p0 = pnand %p3753_p11, %p4746_p12  ;;  %p3759_p3 = scmp.lt.s32.totalorder %s3757_s4, %s3752_s5 }
  0x81   : > { %p3756_p4 = pneg %p3755_p0  ;;  %p3760_p6 = por %p3759_p3, %p3758_p7 }
  0x83   : > { %p3761_p9 = pnand %p3760_p6, %p3756_p4 }
  0x85   : > { %3764 = shalt.err (!%p3761_p9)
}
  0x86   : > { %s3765_s11 = scalar_lea.vmem %s429_s6, 128  ;;  %s3925_s12 = smov [#allocation2]  }
  0x87   : > { %p3766_p2 = scmp.ne.s32.totalorder %s429_s6, %s3765_s11  ;;  %s3770_s20 = sshll.u32 %s3925_s12, 4  ;;  %s3771_s20 = int_to_ptr.vmem [resolvable:$false] %s3770_s20 }
  0x88   : > { %s3772_s29 = scalar_lea.vmem %s3771_s20, 256  ;;  %p3773_p8 = scmp.lt.s32.totalorder %s429_s6, %s3771_s20 }
  0x89   : > { %p3768_p5 = pnand %p3766_p2, %p4746_p12  ;;  %p3774_p10 = scmp.lt.s32.totalorder %s3772_s29, %s3765_s11 }
  0x8b   : > { %p3769_p1 = pneg %p3768_p5  ;;  %p3775_p11 = por %p3774_p10, %p3773_p8 }
  0x8d   : > { %p3776_p0 = pnand %p3775_p11, %p3769_p1 }
  0x8f   : > { %3779 = shalt.err (!%p3776_p0)
}
  0x90   : > { %3512 = dma.hbm_to_vmem [thread:$0]  (!%p4096_p13), %s4162_s30, 128, %s429_s6, %s418_s1  }
  0x91   : > { %s462_s13 = scalar_lea.hbm %s4685_s2, %s4094_s17  ;;  %s457_s18 = scalar_lea.vmem [#allocation7], %s4091_s14 }
  0x92   : > { %s464_s4 = sshll.u32 %s457_s18, 4  ;;  %s3780_s25 = scalar_lea.hbm %s462_s13, 128  ;;  %s465_s4 = int_to_ptr.vmem [resolvable:$true] %s464_s4 }
  0x93   : > { %p3781_p4 = scmp.ne.s32.totalorder %s462_s13, %s3780_s25  ;;  %s3785_s12 = scalar_lea.hbm %s4685_s2, 256 }
  0x94   : > { %p3786_p6 = scmp.lt.s32.totalorder %s462_s13, %s4685_s2  ;;  %p3787_p9 = scmp.lt.s32.totalorder %s3785_s12, %s3780_s25 }
  0x95   : > { %p3783_p7 = pnand %p3781_p4, %p4746_p12 }
  0x96   : > { %p3788_p2 = por %p3787_p9, %p3786_p6 }
  0x97   : > { %p3784_p3 = pneg %p3783_p7 }
  0x99   : > { %p3789_p5 = pnand %p3788_p2, %p3784_p3 }
  0x9b   : > { %3792 = shalt.err (!%p3789_p5)
}
  0x9c   : > { %s3793_s1 = scalar_lea.vmem %s465_s4, 128  ;;  %s3926_s14 = smov [#allocation7]  }
  0x9d   : > { %p3794_p1 = scmp.ne.s32.totalorder %s465_s4, %s3793_s1  ;;  %s3798_s17 = sshll.u32 %s3926_s14, 4  ;;  %s3799_s17 = int_to_ptr.vmem [resolvable:$false] %s3798_s17 }
  0x9e   : > { %s3800_s30 = scalar_lea.vmem %s3799_s17, 256  ;;  %p3801_p11 = scmp.lt.s32.totalorder %s465_s4, %s3799_s17 }
  0x9f   : > { %p3796_p8 = pnand %p3794_p1, %p4746_p12  ;;  %p3802_p0 = scmp.lt.s32.totalorder %s3800_s30, %s3793_s1 }
  0xa1   : > { %p3797_p10 = pneg %p3796_p8  ;;  %p3803_p4 = por %p3802_p0, %p3801_p11 }
  0xa3   : > { %p3804_p7 = pnand %p3803_p4, %p3797_p10 }
  0xa5   : > { %3807 = shalt.err (!%p3804_p7)
}
  0xa6   : > { %3518 = dma.hbm_to_vmem [thread:$0]  (!%p4096_p13), %s462_s13, 128, %s465_s4, %s4110_s21  }
  0xa7   : > { %p4747_p3 = scmp.ne.s32.totalorder %s4725_s28, 0 }
  0xa8   : > { %s4204_s24 = sand.u32 (!%p4747_p3), 1, %s3906_s22   ;;  %p4748_p12 = scmp.ne.s32.totalorder (!%p4747_p3), %s4731_s19, 0 }
  0xa9   : > { %480 = sbr.rel (%p4747_p3) target bundleno = 5383 (0x1507), region = 64  ;;  %s4207_s6 = sshll.u32 (!%p4747_p3), %s4204_s24, 3 }
  0xaa   : > { %s483_s5 = scalar_lea.sflag (!%p4747_p3), [#allocation3], %s4204_s24  ;;  %s486_s26 = scalar_lea.vmem (!%p4747_p3), [#allocation2], %s4207_s6 }
  0xae   : > { %3877 = dma.done.wait (%p4748_p12), %s483_s5, 128  }
  0xaf   : > { %3879 = vsyncadd (%p4748_p12), %s483_s5, 4294967168  ;;  %s491_s21 = sand.u32 1, %s4018_s27   ;;  %s495_s15 = scalar_lea.vmem [#allocation5], %s4207_s6 }
  0xb0   : > { %s492_s28 = scalar_lea.sflag [#allocation6], %s491_s21 }
  0xb1   : > { %3881 = dma.done.wait (%p4748_p12), %s492_s28, 256  }
  0xb2   : > { %3883 = vsyncadd (%p4748_p12), %s492_s28, 4294967040  ;;  %s504_s13 = scalar_lea.vmem [#allocation7], %s4207_s6  ;;  %p4749_p13 = scmp.eq.s32.totalorder %s4018_s27, 0 }
  0xb4   : > { %3885 = dma.done.wait (%p4749_p13), [#allocation9], 3072   ;;  %p4750_p6 = pmov %p4749_p13 }
  0xb6   : > { %3887 = vsyncadd (%p4750_p6), [#allocation9], 4294964224  ;;  %p4751_p9 = pmov %p4750_p6 }
  0xb7   : > { %p4752_p2 = pmov %p4750_p6 }
  0xb8   : > { %3889 = dma.done.wait (%p4751_p9), [#allocation12], 576  }
  0xb9   : > { %3891 = vsyncadd (%p4752_p2), [#allocation12], 4294966720  ;;  %v3927_v0 = vmov 0.0   ;;  %v608_v1 = vld [vmem:[#allocation10 + $0x68] sm:$0xff]  ;;  %v607_v2 = vld [vmem:[#allocation10 + $0x60] sm:$0xff]  ;;  %vm611_vm0 = vcmask 261120   ;;  %v905_v31 = vlaneseq }
  0xba   : > { %679 = vmatprep.mubr.f32.mxu0 %v3927_v0  ;;  %750 = vmatprep.mubr.f32.mxu1 %v3927_v0  ;;  %v604_v3 = vld [vmem:[#allocation10 + $0x48] sm:$0xff]  ;;  %v603_v4 = vld [vmem:[#allocation10 + $0x40] sm:$0xff]  ;;  %v610_v9 = vld [vmem:[#allocation10 + $0x78] sm:$0xff]  ;;  %vm757_vm1 = vcmask 130048   ;;  %vm3928_vm2 = vmmov 0   ;;  %s579_s19 = scalar_lea.vmem [#allocation15], %s4207_s6 }
  0xbb   : > { %639 = vmatprep.subr.mxu0 %v608_v1  ;;  %v600_v5 = vld [vmem:[#allocation10 + $0x28] sm:$0xff]  ;;  %v599_v6 = vld [vmem:[#allocation10 + $0x20] sm:$0xff]  ;;  %710 = vmatprep.subr.mxu1 %v610_v9  ;;  %v609_v10 = vld [vmem:[#allocation10 + $0x70] sm:$0xff]  ;;  %v906_v32 = vshrl.u32 %v905_v31, 7  ;;  %p580_p5 = scmp.lt.s32.totalorder %s4018_s27, 1  ;;  %s3082_s18 = sshll.u32 %s4018_s27, 7 }
  0xbc   : > { %640 = vmatpush1.msra.mxu0 %v607_v2  ;;  %v596_v7 = vld [vmem:[#allocation10 + $0x8] sm:$0xff]  ;;  %v595_v8 = vld [vmem:[#allocation10] sm:$0xff]  ;;  %v606_v11 = vld [vmem:[#allocation10 + $0x58] sm:$0xff]  ;;  %711 = vmatpush1.msra.mxu1 %v609_v10  ;;  %s4754_s16 = sld [smem:[#allocation34_spill]]  ;;  %s2828_s12 = sshll.u32 %s579_s19, 4  ;;  %s2829_s12 = int_to_ptr.vmem [resolvable:$true] %s2828_s12 }
  0xbd   : > { %641 = vmatprep.subr.mxu0 %v604_v3  ;;  %v605_v12 = vld [vmem:[#allocation10 + $0x50] sm:$0xff]  ;;  %v585_v13 = vld [vmem:[%s495_s15] sm:$0xff]  ;;  %712 = vmatprep.subr.mxu1 %v606_v11  ;;  %v602_v17 = vld [vmem:[#allocation10 + $0x38] sm:$0xff]  ;;  %v907_v33 = vsub.s32 0, %v906_v32  ;;  %v911_v36 = vsub.s32 1, %v906_v32  ;;  %v919_v50 = vsub.s32 3, %v906_v32 }
  0xbe   : > { %642 = vmatpush1.msra.mxu0 %v603_v4  ;;  %v592_v14 = vld [vmem:[#allocation8 + $0x28] sm:$0xff]  ;;  %v591_v15 = vld [vmem:[#allocation8 + $0x20] sm:$0xff]  ;;  %713 = vmatpush1.msra.mxu1 %v605_v12  ;;  %v601_v19 = vld [vmem:[#allocation10 + $0x30] sm:$0xff]  ;;  %v915_v55 = vsub.s32 2, %v906_v32  ;;  %s581_s1 = scalar_select %p580_p5, %s4018_s27, 1 }
  0xbf   : > { %643 = vmatprep.subr.mxu0 %v600_v5  ;;  %v588_v16 = vld [vmem:[#allocation8 + $0x8] sm:$0xff]  ;;  %v587_v18 = vld [vmem:[#allocation8] sm:$0xff]  ;;  %v584_v20 = vld [vmem:[%s486_s26] sm:$0xff]  ;;  %714 = vmatprep.subr.mxu1 %v602_v17  ;;  %s2802_s20 = scalar_lea.sflag [#allocation16], %s4204_s24  ;;  %s3808_s29 = scalar_lea.vmem %s2829_s12, 128 }
  0xc0   : > { %644 = vmatpush1.msra.mxu0 %v599_v6  ;;  %v598_v21 = vld [vmem:[#allocation10 + $0x18] sm:$0xff]  ;;  %v597_v22 = vld [vmem:[#allocation10 + $0x10] sm:$0xff]  ;;  %715 = vmatpush1.msra.mxu1 %v601_v19  ;;  %v4256_v30 = vld [vmem:[#allocation13] sm:$0xff]  ;;  %s3046_s14 = sshll.u32 %s581_s1, 3  ;;  %p3809_p1 = scmp.ne.s32.totalorder %s2829_s12, %s3808_s29 }
  0xc1   : > { %645 = vmatprep.subr.mxu0 %v596_v7  ;;  %v594_v23 = vld [vmem:[#allocation8 + $0x38] sm:$0xff]  ;;  %716 = vmatprep.subr.mxu1 %v598_v21  ;;  %v593_v24 = vld [vmem:[#allocation8 + $0x30] sm:$0xff]  ;;  %v903_v35 = vld [vmem:[#allocation11] sm:$0xf]  ;;  %s583_s5 = scalar_lea.vmem %s4686_s3, %s3046_s14  ;;  %s3930_s1 = smov [#allocation15]  }
  0xc2   : > { %646 = vmatpush1.msra.mxu0 %v595_v8  ;;  %717 = vmatpush1.msra.mxu1 %v597_v22  ;;  %v590_v25 = vld [vmem:[#allocation8 + $0x18] sm:$0xff]  ;;  %v589_v26 = vld [vmem:[#allocation8 + $0x10] sm:$0xff]  ;;  %v908_v38 = vrot.slane %v903_v35, %v907_v33  ;;  %v912_v41 = vrot.slane %v903_v35, %v911_v36  ;;  %v920_v54 = vrot.slane %v903_v35, %v919_v50  ;;  %s2826_s11 = scalar_lea.hbm %s4754_s16, %s3082_s18  ;;  %s3812_s14 = sshll.u32 %s3930_s1, 4  ;;  %s3813_s14 = int_to_ptr.vmem [resolvable:$false] %s3812_s14 }
  0xc3   : > { %3047 = vmatmul.mubr.msk.f32.vlgmr.msra.gmra.mxu0 %vm611_vm0, %v585_v13  ;;  %789 = vmatprep.subr.mxu0 %v592_v14  ;;  %v4242_v27 = vld [vmem:[#allocation13 + $0x18] sm:$0xff]  ;;  %v4244_v28 = vld [vmem:[#allocation13 + $0x10] sm:$0xff]  ;;  %v4250_v29 = vld [vmem:[#allocation13 + $0x8] sm:$0xff]  ;;  %v916_v58 = vrot.slane %v903_v35, %v915_v55  ;;  %s3814_s17 = scalar_lea.vmem %s3813_s14, 256  ;;  %p3815_p0 = scmp.lt.s32.totalorder %s2829_s12, %s3813_s14 }
  0xc4   : > { %790 = vmatpush1.msra.mxu0 %v591_v15  ;;  %825 = vmatprep.mubr.f32.mxu0 %v3927_v0  ;;  %v586_v4 = vld [vmem:[%s504_s13] sm:$0xff]  ;;  %v4285_v14 = vld [vmem:[%s4692_s9 + $0x18] sm:$0xff]  ;;  %v4290_v15 = vld [vmem:[%s4692_s9 + $0x10] sm:$0xff]  ;;  %s4753_s13 = sld [smem:[#allocation27_spill]]  ;;  %p3816_p4 = scmp.lt.s32.totalorder %s3814_s17, %s3808_s29 }
  0xc5   : > { %791 = vmatprep.subr.mxu0 %v588_v16  ;;  %3048 = vmatmul.mubr.msk.f32.vlgmr.msra.gmra.mxu1 %vm611_vm0, %v585_v13  ;;  %v4297_v16 = vld [vmem:[%s4692_s9 + $0x8] sm:$0xff]  ;;  %v4304_v17 = vld [vmem:[%s4692_s9] sm:$0xff] }
  0xc6   : > { %792 = vmatpush1.msra.mxu0 %v587_v18  ;;  %860 = vmatprep.subr.mxu1 %v594_v23  ;;  %v3929_v18 = vmov 0   ;;  %v964_v19 = vld [vmem:[%s583_s5] sm:$0xff]  ;;  %p3817_p7 = por %p3816_p4, %p3815_p0 }
  0xc7   : > { %3049 = vmatmul.mubr.msk.f32.vlgmr.msra.gmra.mxu0 %vm757_vm1, %v584_v20  ;;  %3206 = vmatprep.subr.mxu0 %v3927_v0  ;;  %v4318_v21 = vld [vmem:[%s4691_s8] ss:$0 sm:$0xff] }
  0xc8   : > { %861 = vmatpush1.msra.mxu1 %v593_v24  ;;  %896 = vmatprep.mubr.f32.mxu1 %v3927_v0 }
  0xc9   : > { %862 = vmatprep.subr.mxu1 %v590_v25  ;;  %3207 = vmatpush3.msra.mxu0 %v4242_v27 }
  0xca   : > { %863 = vmatpush1.msra.mxu1 %v589_v26  ;;  %3214 = vmatprep.mubr.msk.f32.mxu0 %vm3928_vm2, %v3927_v0  ;;  %v4335_v26 = vld [vmem:[%s4693_s10] ss:$0 sm:$0xff]  ;;  %p4755_p8 = scmp.ne.s32.totalorder %s4753_s13, 0 }
  0xcb   : > { %3050 = vmatmul.mubr.msk.f32.vlgmr.msra.gmra.mxu1 %vm757_vm1, %v584_v20  ;;  %3217 = vmatprep.subr.mxu1 %v3927_v0  ;;  %v965_v20 = vmul.f32 0.33333334, %v964_v19 }
  0xcc   : > { %3208 = vmatprep.subr.mxu0 %v3927_v0  ;;  %3225 = vmatprep.mubr.msk.f32.mxu1 %vm3928_vm2, %v3927_v0  ;;  %p3810_p10 = pnand %p3809_p1, %p4755_p8 }
  0xcd   : > { %3209 = vmatpush3.msra.mxu0 %v4244_v28  ;;  %3218 = vmatpush3.msra.mxu1 %v4285_v14 }
  0xce   : > { %3210 = vmatprep.subr.mxu0 %v3927_v0  ;;  %3219 = vmatprep.subr.mxu1 %v3927_v0  ;;  %p3811_p11 = pneg %p3810_p10 }
  0xcf   : > { %3211 = vmatpush3.msra.mxu0 %v4250_v29  ;;  %3220 = vmatpush3.msra.mxu1 %v4290_v15 }
  0xd0   : > { %3212 = vmatprep.subr.mxu0 %v3927_v0  ;;  %3221 = vmatprep.subr.mxu1 %v3927_v0  ;;  %p3818_p3 = pnand %p3817_p7, %p3811_p11 }
  0xd1   : > { %3213 = vmatpush3.msra.mxu0 %v4256_v30  ;;  %3222 = vmatpush3.msra.mxu1 %v4297_v16 }
  0xd2   : > { %3228 = vmatprep.subr.mxu0 %v3927_v0  ;;  %3223 = vmatprep.subr.mxu1 %v3927_v0 }
  0xd3   : > { %3224 = vmatpush3.msra.mxu1 %v4304_v17  ;;  %3579 = vset.pattern.permute.xlu0 %v3929_v18 }
  0xd4   : > { %3239 = vmatprep.subr.mxu1 %v3927_v0  ;;  %968 = vperm.xlu0 %3579, %v965_v20  }
 0x183   : > { %v681_v34 = vpop.f32.mrf.mxu0 }
 0x185   : > { %v683_v37 = vpop.f32.mrf.mxu0  ;;  %v752_v43 = vpop.f32.mrf.mxu1 }
 0x187   : > { %v827_v39 = vpop.f32.mrf.mxu0  ;;  %v754_v46 = vpop.f32.mrf.mxu1 }
 0x188   : > { %v828_v40 = vadd.f32 %v827_v39, %v681_v34  ;;  %v4340_v34 = vpop.permute.xlu0 %968 }
 0x189   : > { %v829_v42 = vpop.f32.mrf.mxu0 }
 0x18a   : > { %v925_v44 = vadd.f32 %v908_v38, %v828_v40  ;;  %v830_v45 = vadd.f32 %v829_v42, %v683_v37 }
 0x18b   : > { %v898_v49 = vpop.f32.mrf.mxu1 }
 0x18c   : > { %v3051_v47 = vmul.f32 -1.442695, %v925_v44  ;;  %v926_v48 = vadd.f32 %v912_v41, %v830_v45  ;;  %v899_v57 = vadd.f32 %v898_v49, %v752_v43 }
 0x18d   : > { %v900_v52 = vpop.f32.mrf.mxu1 }
 0x18e   : > { %3580 = vpow2.f32 %v3051_v47  ;;  %v3052_v51 = vmul.f32 -1.442695, %v926_v48  ;;  %v901_v53 = vadd.f32 %v900_v52, %v754_v46  ;;  %v927_v61 = vadd.f32 %v916_v58, %v899_v57 }
 0x190   : > { %3582 = vpow2.f32 %v3052_v51  ;;  %v928_v56 = vadd.f32 %v920_v54, %v901_v53 }
 0x192   : > { %v3053_v59 = vmul.f32 -1.442695, %v928_v56 }
 0x194   : > { %3584 = vpow2.f32 %v3053_v59 }
 0x19b   : > { %v3581_v60 = vpop.eup %3580 }
 0x19c   : > { %v932_v62 = vadd.f32 1.0, %v3581_v60 }
 0x19d   : > { %v3583_v63 = vpop.eup %3582 }
 0x19e   : > { %3586 = vrcp.f32 %v932_v62  ;;  %v938_v1 = vadd.f32 1.0, %v3583_v63 }
 0x19f   : > { %3588 = vtanh.f32 %v927_v61 }
 0x1a0   : > { %3590 = vrcp.f32 %v938_v1 }
 0x1a1   : > { %v3585_v2 = vpop.eup %3584 }
 0x1a2   : > { %v945_v7 = vadd.f32 1.0, %v3585_v2 }
 0x1a4   : > { %3592 = vrcp.f32 %v945_v7 }
 0x1ab   : > { %v3587_v3 = vpop.eup %3586 }
 0x1ac   : > { %v3589_v5 = vpop.eup %3588 }
 0x1ad   : > { %v3591_v6 = vpop.eup %3590  ;;  %v949_v9 = vmul.f32 %v3589_v5, %v3587_v3 }
 0x1ae   : > { %v948_v8 = vmul.f32 %v3591_v6, %v586_v4 }
 0x1b0   : > { %v950_v10 = vadd.f32 %v949_v9, %v948_v8 }
 0x1b1   : > { %v3593_v11 = vpop.eup %3592 }
 0x1b2   : > { %3594 = vtanh.f32 %v950_v10  ;;  %953 = vst.msk [vmem:[%s579_s19] sm:$0xff] %vm611_vm0, %v950_v10 }
 0x1bf   : > { %v3595_v12 = vpop.eup %3594 }
 0x1c0   : > { %v4268_v13 = vmul.f32 %v3595_v12, %v3593_v11 }
 0x1c2   : > { %3215 = vmatmul.mubr.msk.f32.vlgmr.msra.gmra.mxu0 %vm611_vm0, %v4268_v13 }
 0x1c3   : > { %3229 = vmatpush3.msra.mxu0 %v4242_v27  ;;  %3236 = vmatprep.mubr.msk.f32.mxu0 %vm3928_vm2, %v3927_v0 }
 0x1c4   : > { %3230 = vmatprep.subr.mxu0 %v3927_v0 }
 0x1c5   : > { %3231 = vmatpush3.msra.mxu0 %v4244_v28 }
 0x1c6   : > { %3232 = vmatprep.subr.mxu0 %v3927_v0 }
 0x1c7   : > { %3233 = vmatpush3.msra.mxu0 %v4250_v29 }
 0x1c8   : > { %3234 = vmatprep.subr.mxu0 %v3927_v0 }
 0x1c9   : > { %3235 = vmatpush3.msra.mxu0 %v4256_v30 }
 0x1ca   : > { %3250 = vmatprep.subr.mxu0 %v3927_v0 }
 0x282   : > { %v1046_v22 = vpop.f32.mrf.mxu0 }
 0x283   : > { %v1047_v23 = vadd.f32 %v4318_v21, %v1046_v22 }
 0x284   : > { %v3216_v24 = vpop.f32.mrf.mxu0 }
 0x285   : > { %3596 = vtanh.f32 %v1047_v23 }
 0x292   : > { %v3597_v25 = vpop.eup %3596 }
 0x293   : > { %3226 = vmatmul.mubr.msk.f32.vlgmr.msra.gmra.mxu1 %vm611_vm0, %v3597_v25 }
 0x294   : > { %3240 = vmatpush3.msra.mxu1 %v4285_v14  ;;  %3247 = vmatprep.mubr.msk.f32.mxu1 %vm3928_vm2, %v3927_v0 }
 0x295   : > { %3241 = vmatprep.subr.mxu1 %v3927_v0 }
 0x296   : > { %3242 = vmatpush3.msra.mxu1 %v4290_v15 }
 0x297   : > { %3243 = vmatprep.subr.mxu1 %v3927_v0 }
 0x298   : > { %3244 = vmatpush3.msra.mxu1 %v4297_v16 }
 0x299   : > { %3245 = vmatprep.subr.mxu1 %v3927_v0 }
 0x29a   : > { %3246 = vmatpush3.msra.mxu1 %v4304_v17 }
 0x29b   : > { %3261 = vmatprep.subr.mxu1 %v3927_v0 }
 0x353   : > { %v1126_v31 = vpop.f32.mrf.mxu1 }
 0x354   : > { %v4338_v32 = vadd.f32 %v4335_v26, %v1126_v31 }
 0x355   : > { %v3227_v33 = vpop.f32.mrf.mxu1 }
 0x356   : > { %v1130_v35 = vmul.f32 0.5, %v4338_v32 }
 0x358   : > { %v1131_v36 = vmul.f32 %v1130_v35, %v4340_v34 }
 0x35a   : > { %v1132_v37 = vadd.f32 %v1131_v36, %v4268_v13 }
 0x35c   : > { %3237 = vmatmul.mubr.msk.f32.vlgmr.msra.gmra.mxu0 %vm611_vm0, %v1132_v37 }
 0x35d   : > { %3251 = vmatpush3.msra.mxu0 %v4242_v27  ;;  %3258 = vmatprep.mubr.msk.f32.mxu0 %vm3928_vm2, %v3927_v0 }
 0x35e   : > { %3252 = vmatprep.subr.mxu0 %v3927_v0 }
 0x35f   : > { %3253 = vmatpush3.msra.mxu0 %v4244_v28 }
 0x360   : > { %3254 = vmatprep.subr.mxu0 %v3927_v0 }
 0x361   : > { %3255 = vmatpush3.msra.mxu0 %v4250_v29 }
 0x362   : > { %3256 = vmatprep.subr.mxu0 %v3927_v0 }
 0x363   : > { %3257 = vmatpush3.msra.mxu0 %v4256_v30 }
 0x364   : > { %3272 = vmatprep.subr.mxu0 %v3927_v0 }
 0x41c   : > { %v1202_v38 = vpop.f32.mrf.mxu0 }
 0x41d   : > { %v1203_v39 = vadd.f32 %v4318_v21, %v1202_v38 }
 0x41e   : > { %v3238_v40 = vpop.f32.mrf.mxu0 }
 0x41f   : > { %3598 = vtanh.f32 %v1203_v39 }
 0x42c   : > { %v3599_v41 = vpop.eup %3598 }
 0x42d   : > { %3248 = vmatmul.mubr.msk.f32.vlgmr.msra.gmra.mxu1 %vm611_vm0, %v3599_v41 }
 0x42e   : > { %3262 = vmatpush3.msra.mxu1 %v4285_v14  ;;  %3269 = vmatprep.mubr.msk.f32.mxu1 %vm3928_vm2, %v3927_v0 }
 0x42f   : > { %3263 = vmatprep.subr.mxu1 %v3927_v0 }
 0x430   : > { %3264 = vmatpush3.msra.mxu1 %v4290_v15 }
 0x431   : > { %3265 = vmatprep.subr.mxu1 %v3927_v0 }
 0x432   : > { %3266 = vmatpush3.msra.mxu1 %v4297_v16 }
 0x433   : > { %3267 = vmatprep.subr.mxu1 %v3927_v0 }
 0x434   : > { %3268 = vmatpush3.msra.mxu1 %v4304_v17 }
 0x435   : > { %3283 = vmatprep.subr.mxu1 %v3927_v0 }
 0x4ed   : > { %v1276_v42 = vpop.f32.mrf.mxu1 }
 0x4ee   : > { %v1277_v43 = vadd.f32 %v4335_v26, %v1276_v42 }
 0x4ef   : > { %v3249_v44 = vpop.f32.mrf.mxu1 }
 0x4f0   : > { %v1282_v45 = vmul.f32 0.5, %v1277_v43  ;;  %v1280_v52 = vmul.f32 2.0, %v1277_v43 }
 0x4f2   : > { %v1283_v46 = vmul.f32 %v1282_v45, %v4340_v34  ;;  %v1281_v56 = vadd.f32 %v1280_v52, %v4338_v32 }
 0x4f4   : > { %v1284_v47 = vadd.f32 %v1283_v46, %v4268_v13 }
 0x4f6   : > { %3259 = vmatmul.mubr.msk.f32.vlgmr.msra.gmra.mxu0 %vm611_vm0, %v1284_v47 }
 0x4f7   : > { %3273 = vmatpush3.msra.mxu0 %v4242_v27  ;;  %3280 = vmatprep.mubr.msk.f32.mxu0 %vm3928_vm2, %v3927_v0 }
 0x4f8   : > { %3274 = vmatprep.subr.mxu0 %v3927_v0 }
 0x4f9   : > { %3275 = vmatpush3.msra.mxu0 %v4244_v28 }
 0x4fa   : > { %3276 = vmatprep.subr.mxu0 %v3927_v0 }
 0x4fb   : > { %3277 = vmatpush3.msra.mxu0 %v4250_v29 }
 0x4fc   : > { %3278 = vmatprep.subr.mxu0 %v3927_v0 }
 0x4fd   : > { %3279 = vmatpush3.msra.mxu0 %v4256_v30 }
 0x4fe   : > { %3294 = vmatprep.subr.mxu0 %v3927_v0 }
 0x5b6   : > { %v1354_v48 = vpop.f32.mrf.mxu0 }
 0x5b7   : > { %v1355_v49 = vadd.f32 %v4318_v21, %v1354_v48 }
 0x5b8   : > { %v3260_v50 = vpop.f32.mrf.mxu0 }
 0x5b9   : > { %3600 = vtanh.f32 %v1355_v49 }
 0x5c6   : > { %v3601_v51 = vpop.eup %3600 }
 0x5c7   : > { %3270 = vmatmul.mubr.msk.f32.vlgmr.msra.gmra.mxu1 %vm611_vm0, %v3601_v51 }
 0x5c8   : > { %3284 = vmatpush3.msra.mxu1 %v4285_v14  ;;  %3291 = vmatprep.mubr.msk.f32.mxu1 %vm3928_vm2, %v3927_v0 }
 0x5c9   : > { %3285 = vmatprep.subr.mxu1 %v3927_v0 }
 0x5ca   : > { %3286 = vmatpush3.msra.mxu1 %v4290_v15 }
 0x5cb   : > { %3287 = vmatprep.subr.mxu1 %v3927_v0 }
 0x5cc   : > { %3288 = vmatpush3.msra.mxu1 %v4297_v16 }
 0x5cd   : > { %3289 = vmatprep.subr.mxu1 %v3927_v0 }
 0x5ce   : > { %3290 = vmatpush3.msra.mxu1 %v4304_v17 }
 0x5cf   : > { %3305 = vmatprep.subr.mxu1 %v3927_v0 }
 0x687   : > { %v1428_v53 = vpop.f32.mrf.mxu1 }
 0x688   : > { %v1429_v54 = vadd.f32 %v4335_v26, %v1428_v53 }
 0x689   : > { %v3271_v55 = vpop.f32.mrf.mxu1 }
 0x68a   : > { %v1432_v57 = vmul.f32 2.0, %v1429_v54  ;;  %v1434_v58 = vmul.f32 %v1429_v54, %v4340_v34 }
 0x68c   : > { %v1435_v59 = vadd.f32 %v1434_v58, %v4268_v13  ;;  %v1433_v60 = vadd.f32 %v1432_v57, %v1281_v56 }
 0x68e   : > { %3281 = vmatmul.mubr.msk.f32.vlgmr.msra.gmra.mxu0 %vm611_vm0, %v1435_v59 }
 0x68f   : > { %3295 = vmatpush3.msra.mxu0 %v4242_v27  ;;  %3302 = vmatprep.mubr.msk.f32.mxu0 %vm3928_vm2, %v3927_v0 }
 0x690   : > { %3296 = vmatprep.subr.mxu0 %v3927_v0 }
 0x691   : > { %3297 = vmatpush3.msra.mxu0 %v4244_v28 }
 0x692   : > { %3298 = vmatprep.subr.mxu0 %v3927_v0 }
 0x693   : > { %3299 = vmatpush3.msra.mxu0 %v4250_v29 }
 0x694   : > { %3300 = vmatprep.subr.mxu0 %v3927_v0 }
 0x695   : > { %3301 = vmatpush3.msra.mxu0 %v4256_v30 }
 0x696   : > { %3316 = vmatprep.subr.mxu0 %v3927_v0 }
 0x74e   : > { %v1505_v61 = vpop.f32.mrf.mxu0 }
 0x74f   : > { %v1506_v62 = vadd.f32 %v4318_v21, %v1505_v61 }
 0x750   : > { %v3282_v63 = vpop.f32.mrf.mxu0 }
 0x751   : > { %3602 = vtanh.f32 %v1506_v62 }
 0x75e   : > { %v3603_v1 = vpop.eup %3602 }
 0x75f   : > { %3292 = vmatmul.mubr.msk.f32.vlgmr.msra.gmra.mxu1 %vm611_vm0, %v3603_v1 }
 0x760   : > { %3306 = vmatpush3.msra.mxu1 %v4285_v14  ;;  %3313 = vmatprep.mubr.msk.f32.mxu1 %vm3928_vm2, %v3927_v0 }
 0x761   : > { %3307 = vmatprep.subr.mxu1 %v3927_v0 }
 0x762   : > { %3308 = vmatpush3.msra.mxu1 %v4290_v15 }
 0x763   : > { %3309 = vmatprep.subr.mxu1 %v3927_v0 }
 0x764   : > { %3310 = vmatpush3.msra.mxu1 %v4297_v16 }
 0x765   : > { %3311 = vmatprep.subr.mxu1 %v3927_v0 }
 0x766   : > { %3312 = vmatpush3.msra.mxu1 %v4304_v17 }
 0x767   : > { %3327 = vmatprep.subr.mxu1 %v3927_v0 }
 0x81f   : > { %v1579_v2 = vpop.f32.mrf.mxu1 }
 0x820   : > { %v1580_v3 = vadd.f32 %v4335_v26, %v1579_v2 }
 0x821   : > { %v3293_v4 = vpop.f32.mrf.mxu1 }
 0x822   : > { %v1583_v5 = vadd.f32 %v1580_v3, %v1433_v60 }
 0x824   : > { %v1584_v6 = vmul.f32 0.16666667, %v1583_v5 }
 0x826   : > { %v1585_v7 = vmul.f32 %v1584_v6, %v4340_v34 }
 0x828   : > { %v4424_v8 = vadd.f32 %v1585_v7, %v4268_v13 }
 0x82a   : > { %3303 = vmatmul.mubr.msk.f32.vlgmr.msra.gmra.mxu0 %vm611_vm0, %v4424_v8 }
 0x82b   : > { %3317 = vmatpush3.msra.mxu0 %v4242_v27  ;;  %3324 = vmatprep.mubr.msk.f32.mxu0 %vm3928_vm2, %v3927_v0 }
 0x82c   : > { %3318 = vmatprep.subr.mxu0 %v3927_v0 }
 0x82d   : > { %3319 = vmatpush3.msra.mxu0 %v4244_v28 }
 0x82e   : > { %3320 = vmatprep.subr.mxu0 %v3927_v0 }
 0x82f   : > { %3321 = vmatpush3.msra.mxu0 %v4250_v29 }
 0x830   : > { %3322 = vmatprep.subr.mxu0 %v3927_v0 }
 0x831   : > { %3323 = vmatpush3.msra.mxu0 %v4256_v30 }
 0x832   : > { %3338 = vmatprep.subr.mxu0 %v3927_v0 }
 0x8ea   : > { %v1656_v9 = vpop.f32.mrf.mxu0 }
 0x8eb   : > { %v1657_v10 = vadd.f32 %v4318_v21, %v1656_v9 }
 0x8ec   : > { %v3304_v11 = vpop.f32.mrf.mxu0 }
 0x8ed   : > { %3604 = vtanh.f32 %v1657_v10 }
 0x8fa   : > { %v3605_v12 = vpop.eup %3604 }
 0x8fb   : > { %3314 = vmatmul.mubr.msk.f32.vlgmr.msra.gmra.mxu1 %vm611_vm0, %v3605_v12 }
 0x8fc   : > { %3328 = vmatpush3.msra.mxu1 %v4285_v14  ;;  %3335 = vmatprep.mubr.msk.f32.mxu1 %vm3928_vm2, %v3927_v0 }
 0x8fd   : > { %3329 = vmatprep.subr.mxu1 %v3927_v0 }
 0x8fe   : > { %3330 = vmatpush3.msra.mxu1 %v4290_v15 }
 0x8ff   : > { %3331 = vmatprep.subr.mxu1 %v3927_v0 }
 0x900   : > { %3332 = vmatpush3.msra.mxu1 %v4297_v16 }
 0x901   : > { %3333 = vmatprep.subr.mxu1 %v3927_v0 }
 0x902   : > { %3334 = vmatpush3.msra.mxu1 %v4304_v17 }
 0x903   : > { %3349 = vmatprep.subr.mxu1 %v3927_v0 }
 0x9bb   : > { %v1730_v13 = vpop.f32.mrf.mxu1 }
 0x9bc   : > { %v4451_v18 = vadd.f32 %v4335_v26, %v1730_v13 }
 0x9bd   : > { %v3315_v19 = vpop.f32.mrf.mxu1 }
 0x9be   : > { %v1734_v20 = vmul.f32 0.5, %v4451_v18 }
 0x9c0   : > { %v1735_v22 = vmul.f32 %v1734_v20, %v4340_v34 }
 0x9c2   : > { %v1736_v23 = vadd.f32 %v1735_v22, %v4424_v8 }
 0x9c4   : > { %3325 = vmatmul.mubr.msk.f32.vlgmr.msra.gmra.mxu0 %vm611_vm0, %v1736_v23 }
 0x9c5   : > { %3339 = vmatpush3.msra.mxu0 %v4242_v27  ;;  %3346 = vmatprep.mubr.msk.f32.mxu0 %vm3928_vm2, %v3927_v0 }
 0x9c6   : > { %3340 = vmatprep.subr.mxu0 %v3927_v0 }
 0x9c7   : > { %3341 = vmatpush3.msra.mxu0 %v4244_v28 }
 0x9c8   : > { %3342 = vmatprep.subr.mxu0 %v3927_v0 }
 0x9c9   : > { %3343 = vmatpush3.msra.mxu0 %v4250_v29 }
 0x9ca   : > { %3344 = vmatprep.subr.mxu0 %v3927_v0 }
 0x9cb   : > { %3345 = vmatpush3.msra.mxu0 %v4256_v30 }
 0x9cc   : > { %3360 = vmatprep.subr.mxu0 %v3927_v0 }
 0xa84   : > { %v1806_v24 = vpop.f32.mrf.mxu0 }
 0xa85   : > { %v1807_v25 = vadd.f32 %v4318_v21, %v1806_v24 }
 0xa86   : > { %v3326_v31 = vpop.f32.mrf.mxu0 }
 0xa87   : > { %3606 = vtanh.f32 %v1807_v25 }
 0xa94   : > { %v3607_v32 = vpop.eup %3606 }
 0xa95   : > { %3336 = vmatmul.mubr.msk.f32.vlgmr.msra.gmra.mxu1 %vm611_vm0, %v3607_v32 }
 0xa96   : > { %3350 = vmatpush3.msra.mxu1 %v4285_v14  ;;  %3357 = vmatprep.mubr.msk.f32.mxu1 %vm3928_vm2, %v3927_v0 }
 0xa97   : > { %3351 = vmatprep.subr.mxu1 %v3927_v0 }
 0xa98   : > { %3352 = vmatpush3.msra.mxu1 %v4290_v15 }
 0xa99   : > { %3353 = vmatprep.subr.mxu1 %v3927_v0 }
 0xa9a   : > { %3354 = vmatpush3.msra.mxu1 %v4297_v16 }
 0xa9b   : > { %3355 = vmatprep.subr.mxu1 %v3927_v0 }
 0xa9c   : > { %3356 = vmatpush3.msra.mxu1 %v4304_v17 }
 0xa9d   : > { %3371 = vmatprep.subr.mxu1 %v3927_v0 }
 0xb55   : > { %v1880_v33 = vpop.f32.mrf.mxu1 }
 0xb56   : > { %v1881_v35 = vadd.f32 %v4335_v26, %v1880_v33 }
 0xb57   : > { %v3337_v36 = vpop.f32.mrf.mxu1 }
 0xb58   : > { %v1886_v37 = vmul.f32 0.5, %v1881_v35  ;;  %v1884_v44 = vmul.f32 2.0, %v1881_v35 }
 0xb5a   : > { %v1887_v38 = vmul.f32 %v1886_v37, %v4340_v34  ;;  %v1885_v48 = vadd.f32 %v1884_v44, %v4451_v18 }
 0xb5c   : > { %v1888_v39 = vadd.f32 %v1887_v38, %v4424_v8 }
 0xb5e   : > { %3347 = vmatmul.mubr.msk.f32.vlgmr.msra.gmra.mxu0 %vm611_vm0, %v1888_v39 }
 0xb5f   : > { %3361 = vmatpush3.msra.mxu0 %v4242_v27  ;;  %3368 = vmatprep.mubr.msk.f32.mxu0 %vm3928_vm2, %v3927_v0 }
 0xb60   : > { %3362 = vmatprep.subr.mxu0 %v3927_v0 }
 0xb61   : > { %3363 = vmatpush3.msra.mxu0 %v4244_v28 }
 0xb62   : > { %3364 = vmatprep.subr.mxu0 %v3927_v0 }
 0xb63   : > { %3365 = vmatpush3.msra.mxu0 %v4250_v29 }
 0xb64   : > { %3366 = vmatprep.subr.mxu0 %v3927_v0 }
 0xb65   : > { %3367 = vmatpush3.msra.mxu0 %v4256_v30 }
 0xb66   : > { %3382 = vmatprep.subr.mxu0 %v3927_v0 }
 0xc1e   : > { %v1958_v40 = vpop.f32.mrf.mxu0 }
 0xc1f   : > { %v1959_v41 = vadd.f32 %v4318_v21, %v1958_v40 }
 0xc20   : > { %v3348_v42 = vpop.f32.mrf.mxu0 }
 0xc21   : > { %3608 = vtanh.f32 %v1959_v41 }
 0xc2e   : > { %v3609_v43 = vpop.eup %3608 }
 0xc2f   : > { %3358 = vmatmul.mubr.msk.f32.vlgmr.msra.gmra.mxu1 %vm611_vm0, %v3609_v43 }
 0xc30   : > { %3372 = vmatpush3.msra.mxu1 %v4285_v14  ;;  %3379 = vmatprep.mubr.msk.f32.mxu1 %vm3928_vm2, %v3927_v0 }
 0xc31   : > { %3373 = vmatprep.subr.mxu1 %v3927_v0 }
 0xc32   : > { %3374 = vmatpush3.msra.mxu1 %v4290_v15 }
 0xc33   : > { %3375 = vmatprep.subr.mxu1 %v3927_v0 }
 0xc34   : > { %3376 = vmatpush3.msra.mxu1 %v4297_v16 }
 0xc35   : > { %3377 = vmatprep.subr.mxu1 %v3927_v0 }
 0xc36   : > { %3378 = vmatpush3.msra.mxu1 %v4304_v17 }
 0xc37   : > { %3393 = vmatprep.subr.mxu1 %v3927_v0 }
 0xcef   : > { %v2032_v45 = vpop.f32.mrf.mxu1 }
 0xcf0   : > { %v2033_v46 = vadd.f32 %v4335_v26, %v2032_v45 }
 0xcf1   : > { %v3359_v47 = vpop.f32.mrf.mxu1 }
 0xcf2   : > { %v2036_v49 = vmul.f32 2.0, %v2033_v46  ;;  %v2038_v50 = vmul.f32 %v2033_v46, %v4340_v34 }
 0xcf4   : > { %v2039_v51 = vadd.f32 %v2038_v50, %v4424_v8  ;;  %v2037_v52 = vadd.f32 %v2036_v49, %v1885_v48 }
 0xcf6   : > { %3369 = vmatmul.mubr.msk.f32.vlgmr.msra.gmra.mxu0 %vm611_vm0, %v2039_v51 }
 0xcf7   : > { %3383 = vmatpush3.msra.mxu0 %v4242_v27  ;;  %3390 = vmatprep.mubr.msk.f32.mxu0 %vm3928_vm2, %v3927_v0 }
 0xcf8   : > { %3384 = vmatprep.subr.mxu0 %v3927_v0 }
 0xcf9   : > { %3385 = vmatpush3.msra.mxu0 %v4244_v28 }
 0xcfa   : > { %3386 = vmatprep.subr.mxu0 %v3927_v0 }
 0xcfb   : > { %3387 = vmatpush3.msra.mxu0 %v4250_v29 }
 0xcfc   : > { %3388 = vmatprep.subr.mxu0 %v3927_v0 }
 0xcfd   : > { %3389 = vmatpush3.msra.mxu0 %v4256_v30 }
 0xcfe   : > { %3404 = vmatprep.subr.mxu0 %v3927_v0 }
 0xdb6   : > { %v2109_v53 = vpop.f32.mrf.mxu0 }
 0xdb7   : > { %v2110_v54 = vadd.f32 %v4318_v21, %v2109_v53 }
 0xdb8   : > { %v3370_v55 = vpop.f32.mrf.mxu0 }
 0xdb9   : > { %3610 = vtanh.f32 %v2110_v54 }
 0xdc6   : > { %v3611_v56 = vpop.eup %3610 }
 0xdc7   : > { %3380 = vmatmul.mubr.msk.f32.vlgmr.msra.gmra.mxu1 %vm611_vm0, %v3611_v56 }
 0xdc8   : > { %3394 = vmatpush3.msra.mxu1 %v4285_v14  ;;  %3401 = vmatprep.mubr.msk.f32.mxu1 %vm3928_vm2, %v3927_v0 }
 0xdc9   : > { %3395 = vmatprep.subr.mxu1 %v3927_v0 }
 0xdca   : > { %3396 = vmatpush3.msra.mxu1 %v4290_v15 }
 0xdcb   : > { %3397 = vmatprep.subr.mxu1 %v3927_v0 }
 0xdcc   : > { %3398 = vmatpush3.msra.mxu1 %v4297_v16 }
 0xdcd   : > { %3399 = vmatprep.subr.mxu1 %v3927_v0 }
 0xdce   : > { %3400 = vmatpush3.msra.mxu1 %v4304_v17 }
 0xdcf   : > { %3415 = vmatprep.subr.mxu1 %v3927_v0 }
 0xe87   : > { %v2183_v57 = vpop.f32.mrf.mxu1 }
 0xe88   : > { %v2184_v58 = vadd.f32 %v4335_v26, %v2183_v57 }
 0xe89   : > { %v3381_v59 = vpop.f32.mrf.mxu1 }
 0xe8a   : > { %v2187_v60 = vadd.f32 %v2184_v58, %v2037_v52 }
 0xe8c   : > { %v2188_v61 = vmul.f32 0.16666667, %v2187_v60 }
 0xe8e   : > { %v2189_v62 = vmul.f32 %v2188_v61, %v4340_v34 }
 0xe90   : > { %v4535_v63 = vadd.f32 %v2189_v62, %v4424_v8 }
 0xe92   : > { %3391 = vmatmul.mubr.msk.f32.vlgmr.msra.gmra.mxu0 %vm611_vm0, %v4535_v63 }
 0xe93   : > { %3405 = vmatpush3.msra.mxu0 %v4242_v27  ;;  %3412 = vmatprep.mubr.msk.f32.mxu0 %vm3928_vm2, %v3927_v0 }
 0xe94   : > { %3406 = vmatprep.subr.mxu0 %v3927_v0 }
 0xe95   : > { %3407 = vmatpush3.msra.mxu0 %v4244_v28 }
 0xe96   : > { %3408 = vmatprep.subr.mxu0 %v3927_v0 }
 0xe97   : > { %3409 = vmatpush3.msra.mxu0 %v4250_v29 }
 0xe98   : > { %3410 = vmatprep.subr.mxu0 %v3927_v0 }
 0xe99   : > { %3411 = vmatpush3.msra.mxu0 %v4256_v30 }
 0xe9a   : > { %3426 = vmatprep.subr.mxu0 %v3927_v0 }
 0xf52   : > { %v2260_v1 = vpop.f32.mrf.mxu0 }
 0xf53   : > { %v2261_v2 = vadd.f32 %v4318_v21, %v2260_v1 }
 0xf54   : > { %v3392_v3 = vpop.f32.mrf.mxu0 }
 0xf55   : > { %3612 = vtanh.f32 %v2261_v2 }
 0xf62   : > { %v3613_v4 = vpop.eup %3612 }
 0xf63   : > { %3402 = vmatmul.mubr.msk.f32.vlgmr.msra.gmra.mxu1 %vm611_vm0, %v3613_v4 }
 0xf64   : > { %3416 = vmatpush3.msra.mxu1 %v4285_v14  ;;  %3423 = vmatprep.mubr.msk.f32.mxu1 %vm3928_vm2, %v3927_v0 }
 0xf65   : > { %3417 = vmatprep.subr.mxu1 %v3927_v0 }
 0xf66   : > { %3418 = vmatpush3.msra.mxu1 %v4290_v15 }
 0xf67   : > { %3419 = vmatprep.subr.mxu1 %v3927_v0 }
 0xf68   : > { %3420 = vmatpush3.msra.mxu1 %v4297_v16 }
 0xf69   : > { %3421 = vmatprep.subr.mxu1 %v3927_v0 }
 0xf6a   : > { %3422 = vmatpush3.msra.mxu1 %v4304_v17 }
 0xf6b   : > { %3437 = vmatprep.subr.mxu1 %v3927_v0 }
0x1023   : > { %v2334_v5 = vpop.f32.mrf.mxu1 }
0x1024   : > { %v4562_v6 = vadd.f32 %v4335_v26, %v2334_v5 }
0x1025   : > { %v3403_v7 = vpop.f32.mrf.mxu1 }
0x1026   : > { %v2338_v8 = vmul.f32 0.5, %v4562_v6 }
0x1028   : > { %v2339_v9 = vmul.f32 %v2338_v8, %v4340_v34 }
0x102a   : > { %v2340_v10 = vadd.f32 %v2339_v9, %v4535_v63 }
0x102c   : > { %3413 = vmatmul.mubr.msk.f32.vlgmr.msra.gmra.mxu0 %vm611_vm0, %v2340_v10 }
0x102d   : > { %3427 = vmatpush3.msra.mxu0 %v4242_v27  ;;  %3434 = vmatprep.mubr.msk.f32.mxu0 %vm3928_vm2, %v3927_v0 }
0x102e   : > { %3428 = vmatprep.subr.mxu0 %v3927_v0 }
0x102f   : > { %3429 = vmatpush3.msra.mxu0 %v4244_v28 }
0x1030   : > { %3430 = vmatprep.subr.mxu0 %v3927_v0 }
0x1031   : > { %3431 = vmatpush3.msra.mxu0 %v4250_v29 }
0x1032   : > { %3432 = vmatprep.subr.mxu0 %v3927_v0 }
0x1033   : > { %3433 = vmatpush3.msra.mxu0 %v4256_v30 }
0x1034   : > { %3448 = vmatprep.subr.mxu0 %v3927_v0 }
0x10ec   : > { %v2410_v11 = vpop.f32.mrf.mxu0 }
0x10ed   : > { %v2411_v12 = vadd.f32 %v4318_v21, %v2410_v11 }
0x10ee   : > { %v3414_v13 = vpop.f32.mrf.mxu0 }
0x10ef   : > { %3614 = vtanh.f32 %v2411_v12 }
0x10fc   : > { %v3615_v18 = vpop.eup %3614 }
0x10fd   : > { %3424 = vmatmul.mubr.msk.f32.vlgmr.msra.gmra.mxu1 %vm611_vm0, %v3615_v18 }
0x10fe   : > { %3438 = vmatpush3.msra.mxu1 %v4285_v14  ;;  %3445 = vmatprep.mubr.msk.f32.mxu1 %vm3928_vm2, %v3927_v0 }
0x10ff   : > { %3439 = vmatprep.subr.mxu1 %v3927_v0 }
0x1100   : > { %3440 = vmatpush3.msra.mxu1 %v4290_v15 }
0x1101   : > { %3441 = vmatprep.subr.mxu1 %v3927_v0 }
0x1102   : > { %3442 = vmatpush3.msra.mxu1 %v4297_v16 }
0x1103   : > { %3443 = vmatprep.subr.mxu1 %v3927_v0 }
0x1104   : > { %3444 = vmatpush3.msra.mxu1 %v4304_v17 }
0x1105   : > { %3459 = vmatprep.subr.mxu1 %v3927_v0 }
0x11bd   : > { %v2484_v19 = vpop.f32.mrf.mxu1 }
0x11be   : > { %v2485_v20 = vadd.f32 %v4335_v26, %v2484_v19 }
0x11bf   : > { %v3425_v22 = vpop.f32.mrf.mxu1 }
0x11c0   : > { %v2490_v23 = vmul.f32 0.5, %v2485_v20 }
0x11c2   : > { %v2491_v24 = vmul.f32 %v2490_v23, %v4340_v34 }
0x11c4   : > { %v2492_v25 = vadd.f32 %v2491_v24, %v4535_v63 }
0x11c6   : > { %3435 = vmatmul.mubr.msk.f32.vlgmr.msra.gmra.mxu0 %vm611_vm0, %v2492_v25 }
0x11c7   : > { %3449 = vmatpush3.msra.mxu0 %v4242_v27  ;;  %3456 = vmatprep.mubr.msk.f32.mxu0 %vm3928_vm2, %v3927_v0 }
0x11c8   : > { %3450 = vmatprep.subr.mxu0 %v3927_v0 }
0x11c9   : > { %3451 = vmatpush3.msra.mxu0 %v4244_v28  ;;  %v2488_v28 = vmul.f32 2.0, %v2485_v20 }
0x11ca   : > { %3452 = vmatprep.subr.mxu0 %v3927_v0 }
0x11cb   : > { %3453 = vmatpush3.msra.mxu0 %v4250_v29  ;;  %v2489_v35 = vadd.f32 %v2488_v28, %v4562_v6 }
0x11cc   : > { %3454 = vmatprep.subr.mxu0 %v3927_v0 }
0x11cd   : > { %3455 = vmatpush3.msra.mxu0 %v4256_v30 }
0x1286   : > { %v2562_v31 = vpop.f32.mrf.mxu0 }
0x1287   : > { %v2563_v32 = vadd.f32 %v4318_v21, %v2562_v31 }
0x1288   : > { %v3436_v33 = vpop.f32.mrf.mxu0 }
0x1289   : > { %3616 = vtanh.f32 %v2563_v32 }
0x1296   : > { %v3617_v27 = vpop.eup %3616 }
0x1297   : > { %3446 = vmatmul.mubr.msk.f32.vlgmr.msra.gmra.mxu1 %vm611_vm0, %v3617_v27 }
0x1298   : > { %3460 = vmatpush3.msra.mxu1 %v4285_v14  ;;  %3467 = vmatprep.mubr.msk.f32.mxu1 %vm3928_vm2, %v3927_v0 }
0x1299   : > { %3461 = vmatprep.subr.mxu1 %v3927_v0 }
0x129a   : > { %3462 = vmatpush3.msra.mxu1 %v4290_v15 }
0x129b   : > { %3463 = vmatprep.subr.mxu1 %v3927_v0 }
0x129c   : > { %3464 = vmatpush3.msra.mxu1 %v4297_v16 }
0x129d   : > { %3465 = vmatprep.subr.mxu1 %v3927_v0 }
0x129e   : > { %3466 = vmatpush3.msra.mxu1 %v4304_v17 }
0x1357   : > { %v2636_v29 = vpop.f32.mrf.mxu1 }
0x1358   : > { %v2637_v30 = vadd.f32 %v4335_v26, %v2636_v29 }
0x1359   : > { %v3447_v14 = vpop.f32.mrf.mxu1 }
0x135a   : > { %v2640_v15 = vmul.f32 2.0, %v2637_v30  ;;  %v2642_v36 = vmul.f32 %v2637_v30, %v4340_v34 }
0x135c   : > { %v2643_v16 = vadd.f32 %v2642_v36, %v4535_v63  ;;  %v2641_v0 = vadd.f32 %v2640_v15, %v2489_v35 }
0x135e   : > { %3457 = vmatmul.mubr.msk.f32.vlgmr.msra.gmra.mxu0 %vm611_vm0, %v2643_v16 }
0x141e   : > { %v2713_v17 = vpop.f32.mrf.mxu0 }
0x141f   : > { %v2714_v37 = vadd.f32 %v4318_v21, %v2713_v17 }
0x1420   : > { %v3458_v38 = vpop.f32.mrf.mxu0 }
0x1421   : > { %3618 = vtanh.f32 %v2714_v37 }
0x142e   : > { %v3619_v39 = vpop.eup %3618 }
0x142f   : > { %3468 = vmatmul.mubr.msk.f32.vlgmr.msra.gmra.mxu1 %vm611_vm0, %v3619_v39 }
0x1430   : > { %3821 = shalt.err (!%p3818_p3)
}
0x1431   : > { %s3822_s30 = scalar_lea.hbm %s2826_s11, 128  ;;  %s3826_s26 = scalar_lea.hbm %s4754_s16, 256 }
0x1432   : > { %p3823_p12 = scmp.ne.s32.totalorder %s2826_s11, %s3822_s30  ;;  %p3827_p9 = scmp.lt.s32.totalorder %s2826_s11, %s4754_s16 }
0x1433   : > { %p3828_p2 = scmp.lt.s32.totalorder %s3826_s26, %s3822_s30 }
0x1434   : > { %p3824_p13 = pnand %p3823_p12, %p4755_p8 }
0x1435   : > { %p3829_p5 = por %p3828_p2, %p3827_p9 }
0x1436   : > { %p3825_p6 = pneg %p3824_p13 }
0x1438   : > { %p3830_p1 = pnand %p3829_p5, %p3825_p6 }
0x143a   : > { %3833 = shalt.err (!%p3830_p1)
}
0x143b   : > { %3493 = dma.vmem_to_hbm [thread:$0]  (%p4755_p8), %s2829_s12, 128, %s2826_s11, %s2802_s20  }
0x143c   : > { %s572_s15 = scalar_lea.vmem [#allocation14], %s4207_s6  ;;  %s4756_s1 = sld [smem:[#allocation33_spill]] }
0x143d   : > { %s2815_s4 = sshll.u32 %s572_s15, 4  ;;  %s2797_s11 = scalar_lea.sflag [#allocation4], %s4204_s24  ;;  %s2816_s4 = int_to_ptr.vmem [resolvable:$true] %s2815_s4 }
0x143e   : > { %s3834_s12 = scalar_lea.vmem %s2816_s4, 128  ;;  %s3931_s6 = smov [#allocation14]  }
0x143f   : > { %p3835_p10 = scmp.ne.s32.totalorder %s2816_s4, %s3834_s12  ;;  %s3838_s20 = sshll.u32 %s3931_s6, 4  ;;  %s3839_s20 = int_to_ptr.vmem [resolvable:$false] %s3838_s20 }
0x1440   : > { %s3840_s17 = scalar_lea.vmem %s3839_s20, 256  ;;  %p3841_p4 = scmp.lt.s32.totalorder %s2816_s4, %s3839_s20 }
0x1441   : > { %p3836_p11 = pnand %p3835_p10, %p4755_p8  ;;  %p3842_p7 = scmp.lt.s32.totalorder %s3840_s17, %s3834_s12 }
0x1442   : > { %s2813_s14 = scalar_lea.hbm %s4756_s1, %s3082_s18 }
0x1443   : > { %p3837_p0 = pneg %p3836_p11  ;;  %p3843_p3 = por %p3842_p7, %p3841_p4 }
0x1445   : > { %p3844_p12 = pnand %p3843_p3, %p3837_p0 }
0x14ef   : > { %v2787_v21 = vpop.f32.mrf.mxu1 }
0x14f0   : > { %v2788_v40 = vadd.f32 %v4335_v26, %v2787_v21 }
0x14f1   : > { %v3469_v41 = vpop.f32.mrf.mxu1 }
0x14f2   : > { %v2791_v42 = vadd.f32 %v2788_v40, %v2641_v0 }
0x14f4   : > { %v2792_v43 = vmul.f32 0.16666667, %v2791_v42 }
0x14f6   : > { %v2793_v44 = vmul.f32 %v2792_v43, %v4340_v34 }
0x14f8   : > { %v2794_v45 = vadd.f32 %v2793_v44, %v4535_v63 }
0x14fa   : > { %2795 = vst.msk [vmem:[%s572_s15] sm:$0xff] %vm611_vm0, %v2794_v45 }
0x14fb   : > { %3847 = shalt.err (!%p3844_p12)
}
0x14fc   : > { %s3848_s27 = scalar_lea.hbm %s2813_s14, 128  ;;  %s3852_s30 = scalar_lea.hbm %s4756_s1, 256 }
0x14fd   : > { %p3849_p13 = scmp.ne.s32.totalorder %s2813_s14, %s3848_s27  ;;  %p3853_p2 = scmp.lt.s32.totalorder %s2813_s14, %s4756_s1 }
0x14fe   : > { %p3854_p5 = scmp.lt.s32.totalorder %s3852_s30, %s3848_s27 }
0x14ff   : > { %p3850_p6 = pnand %p3849_p13, %p4755_p8 }
0x1500   : > { %p3855_p1 = por %p3854_p5, %p3853_p2 }
0x1501   : > { %p3851_p9 = pneg %p3850_p6 }
0x1503   : > { %p3856_p10 = pnand %p3855_p1, %p3851_p9 }
0x1505   : > { %3859 = shalt.err (!%p3856_p10)
}
0x1506   : > { %3492 = dma.vmem_to_hbm [thread:$0]  (%p4755_p8), %s2816_s4, 128, %s2813_s14, %s2797_s11  }
0x1507 PF: > { %s4757_s26 = sld [smem:[#allocation23_spill]] }
0x1508   : > { %s4758_s21 = sld [smem:[#allocation28_spill]] }
0x1509   : > { %s4759_s28 = sld [smem:[#allocation24_spill]] }
0x150d   : > { %s2840_s15 = sand.u32 1, %s4757_s26  }
0x150e   : > { %p4760_p11 = scmp.ne.s32.totalorder %s4758_s21, 0  ;;  %s2841_s25 = scalar_lea.sflag [#allocation4], %s2840_s15 }
0x150f   : > { %p4761_p0 = scmp.ge.s32.totalorder %s4759_s28, 2 }
0x1511   : > { %p3520_p4 = pnand %p4761_p0, %p4760_p11 }
0x1513   : > { %p3521_p7 = pneg %p3520_p4 }
0x1515   : > { %3893 = dma.done.wait (%p3521_p7), %s2841_s25, 128  }
0x1516   : > { %3895 = vsyncadd (%p3521_p7), %s2841_s25, 4294967168  ;;  %s2850_s29 = scalar_lea.sflag [#allocation16], %s2840_s15 }
0x1517   : > { %3897 = dma.done.wait (%p3521_p7), %s2850_s29, 128  }
0x1518   : > { %3899 = vsyncadd (%p3521_p7), %s2850_s29, 4294967168  ;;  %s4762_s24 = sld [smem:[#allocation25_spill]]  ;;  %s4764_s21 = smov %s3906_s22 }
0x1519   : > { %s4763_s13 = sld [smem:[#allocation26_spill]]  ;;  %s4765_s22 = smov %s3910_s23 }
0x151e   : > { %p34_p8 = scmp.ge.s32.totalorder %s4762_s24, 4  }
0x151f   : > { %s4766_s23 = smov %s4763_s13 }
0x1520   :  { %36 = sbr.rel (!%p34_p8) target bundleno = 18 (0x12), region = 169 }
0x1525   :  { %2855 = vsyncpa [#allocation3], 1 }
0x1526   :  { %2857 = vsyncpa [#allocation3 + $0x1], 1 }
0x1527   :  { %2858 = vsyncpa [#allocation6], 1 }
0x1528   :  { %2860 = vsyncpa [#allocation6 + $0x1], 1 }
0x1529   :  { %2861 = vsyncpa [#allocation9], 1 }
0x152a   :  { %2862 = vsyncpa [#allocation12], 1 }
0x152b   :  { %2863 = vsyncpa [#allocation4], 1 }
0x152c   :  { %2865 = vsyncpa [#allocation4 + $0x1], 1 }
0x152d   :  { %2866 = vsyncpa [#allocation16], 1 }
0x152e   :  { %2868 = vsyncpa [#allocation16 + $0x1], 1 }

// kernel: ode_lstm_cell.1
= control target key start
LH: loop header
LB: loop body
LE: loop exit
PB: predicated region body
PF: predicated region fallthrough
CT: control target
= control target key end

     0   :  { %s4683_s0 = inlined_call_operand.hbm [shape: f32[16,16], index: 0, kind: input, shape index: {}]   ;;  %s4684_s1 = inlined_call_operand.hbm [shape: f32[16,32], index: 1, kind: input, shape index: {}]   ;;  %s4685_s2 = inlined_call_operand.hbm [shape: f32[16,32], index: 2, kind: input, shape index: {}]   ;;  %s4686_s3 = inlined_call_operand.vmem [shape: f32[16,1], index: 3, kind: input, shape index: {}]   ;;  %s4687_s4 = inlined_call_operand.hbm [shape: f32[16,512], index: 4, kind: input, shape index: {}]   ;;  %s4688_s5 = inlined_call_operand.hbm [shape: f32[32,512], index: 5, kind: input, shape index: {}]   ;;  %s4689_s6 = inlined_call_operand.hbm [shape: f32[1,512], index: 6, kind: input, shape index: {}]   ;;  %s4690_s7 = inlined_call_operand.hbm [shape: f32[32,32], index: 7, kind: input, shape index: {}]   ;;  %s4691_s8 = inlined_call_operand.vmem [shape: f32[1,32], index: 8, kind: input, shape index: {}]   ;;  %s4692_s9 = inlined_call_operand.vmem [shape: f32[32,32], index: 9, kind: input, shape index: {}]   ;;  %s4693_s10 = inlined_call_operand.vmem [shape: f32[1,32], index: 10, kind: input, shape index: {}]   ;;  %s4694_s11 = inlined_call_operand.hbm [shape: f32[16,32], index: 11, kind: output, shape index: {0}]   ;;  %s4695_s12 = inlined_call_operand.hbm [shape: f32[16,32], index: 12, kind: output, shape index: {1}]  }
   0x1   :  { %4717 = sst [smem:[#allocation29_spill]] %s4684_s1 }
   0x2   :  { %4718 = sst [smem:[#allocation30_spill]] %s4687_s4 }
   0x3   :  { %4719 = sst [smem:[#allocation31_spill]] %s4688_s5 }
   0x4   :  { %4720 = sst [smem:[#allocation32_spill]] %s4689_s6 }
   0x5   :  { %4721 = sst [smem:[#allocation33_spill]] %s4694_s11 }
   0x6   :  { %4722 = sst [smem:[#allocation34_spill]] %s4695_s12 }
   0x7   :  { %18 = vsyncpa [#allocation3], 0 }
   0x8   :  { %20 = vsyncpa [#allocation3 + $0x1], 0 }
   0x9   :  { %21 = vsyncpa [#allocation6], 0 }
   0xa   :  { %23 = vsyncpa [#allocation6 + $0x1], 0 }
   0xb   :  { %24 = vsyncpa [#allocation9], 0 }
   0xc   :  { %25 = vsyncpa [#allocation12], 0 }
   0xd   :  { %26 = vsyncpa [#allocation4], 0 }
   0xe   :  { %28 = vsyncpa [#allocation4 + $0x1], 0 }
   0xf   :  { %29 = vsyncpa [#allocation16], 0 }
  0x10   :  { %31 = vsyncpa [#allocation16 + $0x1], 0  ;;  %s3997_s21 = smov 0   ;;  %s3999_s22 = smov 0  }
  0x11   :  { %s4001_s23 = smov 0   ;;  %s4003_s24 = smov 0  }
  0x12 LB: > { %4723 = sst [smem:[#allocation23_spill]] %s3902_s21  ;;  %s3916_s25 = smov [#allocation8]   ;;  %s3914_s24 = sphi %s4003_s24, %s4762_s24   ;;  %s3910_s23 = sphi %s4001_s23, %s4766_s23   ;;  %s3906_s22 = sphi %s3999_s22, %s4765_s22   ;;  %s3902_s21 = sphi %s3997_s21, %s4764_s21  }
  0x13   : > { %4724 = sst [smem:[#allocation24_spill]] %s3914_s24  ;;  %s357_s26 = sshll.u32 %s3916_s25, 4  ;;  %s358_s26 = int_to_ptr.vmem [resolvable:$true] %s357_s26 }
  0x14   : > { %s4018_s27 = sadd.s32 4294967295, %s3914_s24   ;;  %p3024_p0 = scmp.ge.s32.totalorder %s3914_s24, 1 }
  0x15   : > { %p4709_p1 = scmp.eq.s32.totalorder %s4018_s27, 0  ;;  %p345_p2 = scmp.lt.s32.totalorder %s3914_s24, 3 }
  0x16   : > { %s3917_s29 = smov [#allocation11]   ;;  %s3631_s14 = scalar_lea.vmem %s358_s26, 1024 }
  0x17   : > { %p4023_p3 = pnand %p3024_p0, %p345_p2  ;;  %s384_s30 = sshll.u32 %s3917_s29, 4  ;;  %s385_s30 = int_to_ptr.vmem [resolvable:$true] %s384_s30 }
  0x18   : > { %p3632_p8 = scmp.ne.s32.totalorder %s358_s26, %s3631_s14  ;;  %p3639_p11 = scmp.lt.s32.totalorder %s358_s26, %s358_s26 }
  0x19   : > { %s4725_s28 = scalar_select %p4023_p3, 1, 0 }
  0x1a   : > { %p3496_p5 = pneg %p4023_p3  ;;  %p3640_p12 = scmp.lt.s32.totalorder %s3631_s14, %s3631_s14 }
  0x1c   : > { %p4032_p6 = pnand %p3496_p5, %p4709_p1  ;;  %p3641_p13 = por %p3640_p12, %p3639_p11 }
  0x1e   : > { %s4726_s13 = scalar_select %p4032_p6, 1, 0 }
  0x1f   : > { %p4696_p7 = pneg %p4032_p6 }
  0x21   : > { %p3634_p9 = pnand %p3632_p8, %p4696_p7 }
  0x23   : > { %p3635_p10 = pneg %p3634_p9 }
  0x25   : > { %p3642_p0 = pnand %p3641_p13, %p3635_p10 }
  0x27   : > { %3645 = shalt.err (!%p3642_p0)
}
  0x28   : > { %s4697_s15 = smov 512   ;;  %s4698_s16 = smov 32  }
  0x29   : > { %s4727_s4 = sld [smem:[#allocation30_spill]]  ;;  %s3657_s19 = scalar_lea.vmem %s385_s30, 64 }
  0x2a   : > { %p3658_p2 = scmp.ne.s32.totalorder %s385_s30, %s3657_s19  ;;  %p3665_p9 = scmp.lt.s32.totalorder %s385_s30, %s385_s30 }
  0x2b   : > { %p3666_p10 = scmp.lt.s32.totalorder %s3657_s19, %s3657_s19 }
  0x2c   : > { %p3660_p5 = pnand %p3658_p2, %p4696_p7 }
  0x2d   : > { %p3667_p11 = por %p3666_p10, %p3665_p9 }
  0x2e   : > { %p3661_p8 = pneg %p3660_p5 }
  0x2f   : > { %3499 = dma.hbm_to_vmem [thread:$0]  (!%p4032_p6), %s4727_s4, 1024, %s358_s26, [#allocation9], %s4697_s15, %s4697_s15, %s4698_s16  }
  0x30   : > { %p3668_p12 = pnand %p3667_p11, %p3661_p8 }
  0x32   : > { %3671 = shalt.err (!%p3668_p12)
}
  0x33   : > { %s4728_s6 = sld [smem:[#allocation32_spill]]  ;;  %s3023_s26 = sadd.s32 4294967294, %s3914_s24  }
  0x34   : > { %s4059_s29 = sadd.s32 1, %s3914_s24   ;;  %s44_s17 = sadd.s32 1, %s3910_s23 }
  0x35   : > { %4729 = sst [smem:[#allocation25_spill]] %s4059_s29  ;;  %s41_s14 = ssub.s32 %s3914_s24, %s4059_s29 }
  0x36   : > { %p42_p13 = scmp.eq.s32.totalorder %s41_s14, 0  ;;  %p51_p0 = scmp.ne.s32.totalorder %s3910_s23, %s3906_s22 }
  0x37   : > { %p52_p2 = scmp.eq.s32.totalorder %s3914_s24, 0  ;;  %p57_p5 = scmp.ne.s32.totalorder %s3906_s22, %s3902_s21 }
  0x38   : > { %s4070_s18 = scalar_select %p42_p13, %s3910_s23, %s44_s17  }
  0x39   : > { %3505 = dma.hbm_to_vmem [thread:$0]  (!%p4032_p6), %s4728_s6, 64, %s385_s30, [#allocation12]  }
  0x3a   : > { %4730 = sst [smem:[#allocation26_spill]] %s4070_s18  ;;  %p53_p8 = por %p52_p2, %p51_p0 }
  0x3b   : > { %p4074_p9 = por %p4709_p1, %p57_p5  ;;  %p306_p10 = scmp.eq.s32.totalorder %s4018_s27, 1 }
  0x3c   : > { %p312_p11 = scmp.eq.s32.totalorder %s3023_s26, 1  ;;  %p3530_p12 = scmp.lt.s32.totalorder %s3914_s24, 2 }
  0x3d   : > { %s4731_s19 = scalar_select %p4074_p9, 1, 0 }
  0x3e   : > { %s4699_s30 = sand.u32 1, %s3910_s23   ;;  %p4081_p4 = por %p306_p10, %p51_p0 }
  0x3f   : > { %p4085_p7 = por %p312_p11, %p57_p5  ;;  %s4091_s14 = sshll.u32 %s4699_s30, 3 }
  0x40   : > { %s4732_s20 = scalar_select %p4081_p4, 1, 0 }
  0x41   : > { %s4734_s25 = scalar_select %p4085_p7, 1, 0 }
  0x42   : > { %4733 = sst [smem:[#allocation27_spill]] %s4732_s20  ;;  %s4094_s17 = sshll.u32 %s3914_s24, 7 }
  0x43   : > { %4735 = sst [smem:[#allocation28_spill]] %s4734_s25  ;;  %p4096_p13 = pnand %p3530_p12, %p53_p8 }
  0x44   : > { %s435_s26 = sand.u32 1, %s3914_s24   ;;  %s4737_s1 = sld [smem:[#allocation29_spill]] }
  0x45   : > { %s439_s30 = scalar_lea.vmem [#allocation5], %s4091_s14  ;;  %s3920_s29 = smov [#allocation10]  }
  0x46   : > { %s446_s18 = sshll.u32 %s439_s30, 4  ;;  %s370_s25 = sshll.u32 %s3920_s29, 4  ;;  %s4108_s18 = int_to_ptr.vmem [resolvable:$true] %s446_s18  ;;  %s371_s25 = int_to_ptr.vmem [resolvable:$true] %s370_s25 }
  0x47   : > { %s4110_s21 = scalar_lea.sflag [#allocation6], %s435_s26  ;;  %p4116_p2 = pneg %p4096_p13 }
  0x49   : > { %s4738_s24 = scalar_select %p4116_p2, 1, 0 }
  0x4a   : > { %s4105_s6 = scalar_lea.hbm %s4737_s1, %s4094_s17  ;;  %s3677_s30 = scalar_lea.hbm %s4737_s1, 256 }
  0x4b   : > { %s3672_s11 = scalar_lea.hbm %s4105_s6, 128  ;;  %p3678_p10 = scmp.lt.s32.totalorder %s4105_s6, %s4737_s1 }
  0x4c   : > { %p3673_p0 = scmp.ne.s32.totalorder %s4105_s6, %s3672_s11  ;;  %p3679_p11 = scmp.lt.s32.totalorder %s3677_s30, %s3672_s11 }
  0x4e   : > { %p3675_p5 = pnand %p4116_p2, %p3673_p0  ;;  %p3680_p12 = por %p3679_p11, %p3678_p10 }
  0x50   : > { %p3676_p8 = pneg %p3675_p5 }
  0x52   : > { %p3681_p1 = pnand %p3680_p12, %p3676_p8 }
  0x54   : > { %3684 = shalt.err (!%p3681_p1)
}
  0x55   : > { %s3685_s29 = scalar_lea.vmem %s4108_s18, 128  ;;  %s3921_s26 = smov [#allocation5]  }
  0x56   : > { %p3686_p7 = scmp.ne.s32.totalorder %s4108_s18, %s3685_s29  ;;  %s3690_s4 = sshll.u32 %s3921_s26, 4  ;;  %s3691_s4 = int_to_ptr.vmem [resolvable:$false] %s3690_s4 }
  0x57   : > { %s3692_s16 = scalar_lea.vmem %s3691_s4, 256  ;;  %p3693_p4 = scmp.lt.s32.totalorder %s4108_s18, %s3691_s4 }
  0x58   : > { %p3688_p0 = pnand %p3686_p7, %p4116_p2  ;;  %p3694_p9 = scmp.lt.s32.totalorder %s3692_s16, %s3685_s29 }
  0x5a   : > { %p3689_p5 = pneg %p3688_p0  ;;  %p3695_p3 = por %p3694_p9, %p3693_p4 }
  0x5c   : > { %p3696_p6 = pnand %p3695_p3, %p3689_p5 }
  0x5e   : > { %3699 = shalt.err (!%p3696_p6)
}
  0x5f   : > { %3515 = dma.hbm_to_vmem [thread:$0]  (!%p4096_p13), %s4105_s6, 128, %s4108_s18, %s4110_s21  }
  0x60   : > { %s3711_s11 = scalar_lea.vmem %s371_s25, 2048  ;;  %p4739_p7 = scmp.ne.s32.totalorder %s4726_s13, 0 }
  0x61   : > { %p3712_p1 = scmp.ne.s32.totalorder %s371_s25, %s3711_s11  ;;  %p3719_p12 = scmp.lt.s32.totalorder %s371_s25, %s371_s25 }
  0x62   : > { %p4740_p8 = pneg %p4739_p7  ;;  %p3720_p0 = scmp.lt.s32.totalorder %s3711_s11, %s3711_s11 }
  0x64   : > { %p3714_p10 = pnand %p3712_p1, %p4740_p8  ;;  %p3721_p2 = por %p3720_p0, %p3719_p12 }
  0x66   : > { %p3715_p11 = pneg %p3714_p10 }
  0x68   : > { %p3722_p4 = pnand %p3721_p2, %p3715_p11 }
  0x6a   : > { %3725 = shalt.err (!%p3722_p4)
}
  0x6b   : > { %s4741_s12 = smov 32   ;;  %s4742_s20 = smov 512  }
  0x6c   : > { %s4743_s5 = sld [smem:[#allocation31_spill]]  ;;  %s3922_s6 = smov [#allocation13]  }
  0x6d   : > { %s394_s18 = sshll.u32 %s3922_s6, 4  ;;  %p4744_p6 = pmov %p4740_p8  ;;  %s395_s18 = int_to_ptr.vmem [resolvable:$true] %s394_s18 }
  0x6e   : > { %s3737_s26 = scalar_lea.vmem %s395_s18, 512  ;;  %p3745_p5 = scmp.lt.s32.totalorder %s395_s18, %s395_s18 }
  0x6f   : > { %p3738_p3 = scmp.ne.s32.totalorder %s395_s18, %s3737_s26  ;;  %p3746_p1 = scmp.lt.s32.totalorder %s3737_s26, %s3737_s26 }
  0x71   : > { %p3740_p9 = pnand %p3738_p3, %p4744_p6  ;;  %p3747_p8 = por %p3746_p1, %p3745_p5 }
  0x72   : > { %3502 = dma.hbm_to_vmem [thread:$0]  (!%p4739_p7), %s4743_s5, 2048, %s371_s25, [#allocation9], %s4742_s20, %s4742_s20, %s4741_s12  }
  0x73   : > { %p3741_p2 = pneg %p3740_p9 }
  0x75   : > { %p3748_p10 = pnand %p3747_p8, %p3741_p2 }
  0x77   : > { %3751 = shalt.err (!%p3748_p10)
}
  0x78   : > { %s3923_s4 = smov 128   ;;  %s3924_s25 = smov 8  }
  0x79   : > { %3508 = dma.hbm_to_vmem [thread:$0]  (!%p4739_p7), %s4690_s7, 512, %s395_s18, [#allocation12], %s3923_s4, %s3923_s4, %s3924_s25  }
  0x7a   : > { %s4162_s30 = scalar_lea.hbm %s4683_s0, %s4094_s17  ;;  %s421_s29 = scalar_lea.vmem [#allocation2], %s4091_s14 }
  0x7b   : > { %s428_s6 = sshll.u32 %s421_s29, 4  ;;  %s4745_s26 = sand.u32 1, %s3910_s23   ;;  %s429_s6 = int_to_ptr.vmem [resolvable:$true] %s428_s6 }
  0x7c   : > { %s418_s1 = scalar_lea.sflag [#allocation3], %s4745_s26  ;;  %s3752_s5 = scalar_lea.hbm %s4162_s30, 128 }
  0x7d   : > { %p3753_p11 = scmp.ne.s32.totalorder %s4162_s30, %s3752_s5  ;;  %p4746_p12 = scmp.ne.s32.totalorder %s4738_s24, 0 }
  0x7e   : > { %s3757_s4 = scalar_lea.hbm %s4683_s0, 256  ;;  %p3758_p7 = scmp.lt.s32.totalorder %s4162_s30, %s4683_s0 }
  0x7f   : > { %p3755_p0 = pnand %p3753_p11, %p4746_p12  ;;  %p3759_p3 = scmp.lt.s32.totalorder %s3757_s4, %s3752_s5 }
  0x81   : > { %p3756_p4 = pneg %p3755_p0  ;;  %p3760_p6 = por %p3759_p3, %p3758_p7 }
  0x83   : > { %p3761_p9 = pnand %p3760_p6, %p3756_p4 }
  0x85   : > { %3764 = shalt.err (!%p3761_p9)
}
  0x86   : > { %s3765_s11 = scalar_lea.vmem %s429_s6, 128  ;;  %s3925_s12 = smov [#allocation2]  }
  0x87   : > { %p3766_p2 = scmp.ne.s32.totalorder %s429_s6, %s3765_s11  ;;  %s3770_s20 = sshll.u32 %s3925_s12, 4  ;;  %s3771_s20 = int_to_ptr.vmem [resolvable:$false] %s3770_s20 }
  0x88   : > { %s3772_s29 = scalar_lea.vmem %s3771_s20, 256  ;;  %p3773_p8 = scmp.lt.s32.totalorder %s429_s6, %s3771_s20 }
  0x89   : > { %p3768_p5 = pnand %p3766_p2, %p4746_p12  ;;  %p3774_p10 = scmp.lt.s32.totalorder %s3772_s29, %s3765_s11 }
  0x8b   : > { %p3769_p1 = pneg %p3768_p5  ;;  %p3775_p11 = por %p3774_p10, %p3773_p8 }
  0x8d   : > { %p3776_p0 = pnand %p3775_p11, %p3769_p1 }
  0x8f   : > { %3779 = shalt.err (!%p3776_p0)
}
  0x90   : > { %3512 = dma.hbm_to_vmem [thread:$0]  (!%p4096_p13), %s4162_s30, 128, %s429_s6, %s418_s1  }
  0x91   : > { %s462_s13 = scalar_lea.hbm %s4685_s2, %s4094_s17  ;;  %s457_s18 = scalar_lea.vmem [#allocation7], %s4091_s14 }
  0x92   : > { %s464_s4 = sshll.u32 %s457_s18, 4  ;;  %s3780_s25 = scalar_lea.hbm %s462_s13, 128  ;;  %s465_s4 = int_to_ptr.vmem [resolvable:$true] %s464_s4 }
  0x93   : > { %p3781_p4 = scmp.ne.s32.totalorder %s462_s13, %s3780_s25  ;;  %s3785_s12 = scalar_lea.hbm %s4685_s2, 256 }
  0x94   : > { %p3786_p6 = scmp.lt.s32.totalorder %s462_s13, %s4685_s2  ;;  %p3787_p9 = scmp.lt.s32.totalorder %s3785_s12, %s3780_s25 }
  0x95   : > { %p3783_p7 = pnand %p3781_p4, %p4746_p12 }
  0x96   : > { %p3788_p2 = por %p3787_p9, %p3786_p6 }
  0x97   : > { %p3784_p3 = pneg %p3783_p7 }
  0x99   : > { %p3789_p5 = pnand %p3788_p2, %p3784_p3 }
  0x9b   : > { %3792 = shalt.err (!%p3789_p5)
}
  0x9c   : > { %s3793_s1 = scalar_lea.vmem %s465_s4, 128  ;;  %s3926_s14 = smov [#allocation7]  }
  0x9d   : > { %p3794_p1 = scmp.ne.s32.totalorder %s465_s4, %s3793_s1  ;;  %s3798_s17 = sshll.u32 %s3926_s14, 4  ;;  %s3799_s17 = int_to_ptr.vmem [resolvable:$false] %s3798_s17 }
  0x9e   : > { %s3800_s30 = scalar_lea.vmem %s3799_s17, 256  ;;  %p3801_p11 = scmp.lt.s32.totalorder %s465_s4, %s3799_s17 }
  0x9f   : > { %p3796_p8 = pnand %p3794_p1, %p4746_p12  ;;  %p3802_p0 = scmp.lt.s32.totalorder %s3800_s30, %s3793_s1 }
  0xa1   : > { %p3797_p10 = pneg %p3796_p8  ;;  %p3803_p4 = por %p3802_p0, %p3801_p11 }
  0xa3   : > { %p3804_p7 = pnand %p3803_p4, %p3797_p10 }
  0xa5   : > { %3807 = shalt.err (!%p3804_p7)
}
  0xa6   : > { %3518 = dma.hbm_to_vmem [thread:$0]  (!%p4096_p13), %s462_s13, 128, %s465_s4, %s4110_s21  }
  0xa7   : > { %p4747_p3 = scmp.ne.s32.totalorder %s4725_s28, 0 }
  0xa8   : > { %s4204_s24 = sand.u32 (!%p4747_p3), 1, %s3906_s22   ;;  %p4748_p12 = scmp.ne.s32.totalorder (!%p4747_p3), %s4731_s19, 0 }
  0xa9   : > { %480 = sbr.rel (%p4747_p3) target bundleno = 5383 (0x1507), region = 64  ;;  %s4207_s6 = sshll.u32 (!%p4747_p3), %s4204_s24, 3 }
  0xaa   : > { %s483_s5 = scalar_lea.sflag (!%p4747_p3), [#allocation3], %s4204_s24  ;;  %s486_s26 = scalar_lea.vmem (!%p4747_p3), [#allocation2], %s4207_s6 }
  0xae   : > { %3877 = dma.done.wait (%p4748_p12), %s483_s5, 128  }
  0xaf   : > { %3879 = vsyncadd (%p4748_p12), %s483_s5, 4294967168  ;;  %s491_s21 = sand.u32 1, %s4018_s27   ;;  %s495_s15 = scalar_lea.vmem [#allocation5], %s4207_s6 }
  0xb0   : > { %s492_s28 = scalar_lea.sflag [#allocation6], %s491_s21 }
  0xb1   : > { %3881 = dma.done.wait (%p4748_p12), %s492_s28, 256  }
  0xb2   : > { %3883 = vsyncadd (%p4748_p12), %s492_s28, 4294967040  ;;  %s504_s13 = scalar_lea.vmem [#allocation7], %s4207_s6  ;;  %p4749_p13 = scmp.eq.s32.totalorder %s4018_s27, 0 }
  0xb4   : > { %3885 = dma.done.wait (%p4749_p13), [#allocation9], 3072   ;;  %p4750_p6 = pmov %p4749_p13 }
  0xb6   : > { %3887 = vsyncadd (%p4750_p6), [#allocation9], 4294964224  ;;  %p4751_p9 = pmov %p4750_p6 }
  0xb7   : > { %p4752_p2 = pmov %p4750_p6 }
  0xb8   : > { %3889 = dma.done.wait (%p4751_p9), [#allocation12], 576  }
  0xb9   : > { %3891 = vsyncadd (%p4752_p2), [#allocation12], 4294966720  ;;  %v3927_v0 = vmov 0.0   ;;  %v608_v1 = vld [vmem:[#allocation10 + $0x68] sm:$0xff]  ;;  %v607_v2 = vld [vmem:[#allocation10 + $0x60] sm:$0xff]  ;;  %vm611_vm0 = vcmask 261120   ;;  %v905_v31 = vlaneseq }
  0xba   : > { %679 = vmatprep.mubr.f32.mxu0 %v3927_v0  ;;  %750 = vmatprep.mubr.f32.mxu1 %v3927_v0  ;;  %v604_v3 = vld [vmem:[#allocation10 + $0x48] sm:$0xff]  ;;  %v603_v4 = vld [vmem:[#allocation10 + $0x40] sm:$0xff]  ;;  %v610_v9 = vld [vmem:[#allocation10 + $0x78] sm:$0xff]  ;;  %vm757_vm1 = vcmask 130048   ;;  %vm3928_vm2 = vmmov 0   ;;  %s579_s19 = scalar_lea.vmem [#allocation15], %s4207_s6 }
  0xbb   : > { %639 = vmatprep.subr.mxu0 %v608_v1  ;;  %v600_v5 = vld [vmem:[#allocation10 + $0x28] sm:$0xff]  ;;  %v599_v6 = vld [vmem:[#allocation10 + $0x20] sm:$0xff]  ;;  %710 = vmatprep.subr.mxu1 %v610_v9  ;;  %v609_v10 = vld [vmem:[#allocation10 + $0x70] sm:$0xff]  ;;  %v906_v32 = vshrl.u32 %v905_v31, 7  ;;  %p580_p5 = scmp.lt.s32.totalorder %s4018_s27, 1  ;;  %s3082_s18 = sshll.u32 %s4018_s27, 7 }
  0xbc   : > { %640 = vmatpush1.msra.mxu0 %v607_v2  ;;  %v596_v7 = vld [vmem:[#allocation10 + $0x8] sm:$0xff]  ;;  %v595_v8 = vld [vmem:[#allocation10] sm:$0xff]  ;;  %v606_v11 = vld [vmem:[#allocation10 + $0x58] sm:$0xff]  ;;  %711 = vmatpush1.msra.mxu1 %v609_v10  ;;  %s4754_s16 = sld [smem:[#allocation34_spill]]  ;;  %s2828_s12 = sshll.u32 %s579_s19, 4  ;;  %s2829_s12 = int_to_ptr.vmem [resolvable:$true] %s2828_s12 }
  0xbd   : > { %641 = vmatprep.subr.mxu0 %v604_v3  ;;  %v605_v12 = vld [vmem:[#allocation10 + $0x50] sm:$0xff]  ;;  %v585_v13 = vld [vmem:[%s495_s15] sm:$0xff]  ;;  %712 = vmatprep.subr.mxu1 %v606_v11  ;;  %v602_v17 = vld [vmem:[#allocation10 + $0x38] sm:$0xff]  ;;  %v907_v33 = vsub.s32 0, %v906_v32  ;;  %v911_v36 = vsub.s32 1, %v906_v32  ;;  %v919_v50 = vsub.s32 3, %v906_v32 }
  0xbe   : > { %642 = vmatpush1.msra.mxu0 %v603_v4  ;;  %v592_v14 = vld [vmem:[#allocation8 + $0x28] sm:$0xff]  ;;  %v591_v15 = vld [vmem:[#allocation8 + $0x20] sm:$0xff]  ;;  %713 = vmatpush1.msra.mxu1 %v605_v12  ;;  %v601_v19 = vld [vmem:[#allocation10 + $0x30] sm:$0xff]  ;;  %v915_v55 = vsub.s32 2, %v906_v32  ;;  %s581_s1 = scalar_select %p580_p5, %s4018_s27, 1 }
  0xbf   : > { %643 = vmatprep.subr.mxu0 %v600_v5  ;;  %v588_v16 = vld [vmem:[#allocation8 + $0x8] sm:$0xff]  ;;  %v587_v18 = vld [vmem:[#allocation8] sm:$0xff]  ;;  %v584_v20 = vld [vmem:[%s486_s26] sm:$0xff]  ;;  %714 = vmatprep.subr.mxu1 %v602_v17  ;;  %s2802_s20 = scalar_lea.sflag [#allocation16], %s4204_s24  ;;  %s3808_s29 = scalar_lea.vmem %s2829_s12, 128 }
  0xc0   : > { %644 = vmatpush1.msra.mxu0 %v599_v6  ;;  %v598_v21 = vld [vmem:[#allocation10 + $0x18] sm:$0xff]  ;;  %v597_v22 = vld [vmem:[#allocation10 + $0x10] sm:$0xff]  ;;  %715 = vmatpush1.msra.mxu1 %v601_v19  ;;  %v4256_v30 = vld [vmem:[#allocation13] sm:$0xff]  ;;  %s3046_s14 = sshll.u32 %s581_s1, 3  ;;  %p3809_p1 = scmp.ne.s32.totalorder %s2829_s12, %s3808_s29 }
  0xc1   : > { %645 = vmatprep.subr.mxu0 %v596_v7  ;;  %v594_v23 = vld [vmem:[#allocation8 + $0x38] sm:$0xff]  ;;  %716 = vmatprep.subr.mxu1 %v598_v21  ;;  %v593_v24 = vld [vmem:[#allocation8 + $0x30] sm:$0xff]  ;;  %v903_v35 = vld [vmem:[#allocation11] sm:$0xf]  ;;  %s583_s5 = scalar_lea.vmem %s4686_s3, %s3046_s14  ;;  %s3930_s1 = smov [#allocation15]  }
  0xc2   : > { %646 = vmatpush1.msra.mxu0 %v595_v8  ;;  %717 = vmatpush1.msra.mxu1 %v597_v22  ;;  %v590_v25 = vld [vmem:[#allocation8 + $0x18] sm:$0xff]  ;;  %v589_v26 = vld [vmem:[#allocation8 + $0x10] sm:$0xff]  ;;  %v908_v38 = vrot.slane %v903_v35, %v907_v33  ;;  %v912_v41 = vrot.slane %v903_v35, %v911_v36  ;;  %v920_v54 = vrot.slane %v903_v35, %v919_v50  ;;  %s2826_s11 = scalar_lea.hbm %s4754_s16, %s3082_s18  ;;  %s3812_s14 = sshll.u32 %s3930_s1, 4  ;;  %s3813_s14 = int_to_ptr.vmem [resolvable:$false] %s3812_s14 }
  0xc3   : > { %3047 = vmatmul.mubr.msk.f32.vlgmr.msra.gmra.mxu0 %vm611_vm0, %v585_v13  ;;  %789 = vmatprep.subr.mxu0 %v592_v14  ;;  %v4242_v27 = vld [vmem:[#allocation13 + $0x18] sm:$0xff]  ;;  %v4244_v28 = vld [vmem:[#allocation13 + $0x10] sm:$0xff]  ;;  %v4250_v29 = vld [vmem:[#allocation13 + $0x8] sm:$0xff]  ;;  %v916_v58 = vrot.slane %v903_v35, %v915_v55  ;;  %s3814_s17 = scalar_lea.vmem %s3813_s14, 256  ;;  %p3815_p0 = scmp.lt.s32.totalorder %s2829_s12, %s3813_s14 }
  0xc4   : > { %790 = vmatpush1.msra.mxu0 %v591_v15  ;;  %825 = vmatprep.mubr.f32.mxu0 %v3927_v0  ;;  %v586_v4 = vld [vmem:[%s504_s13] sm:$0xff]  ;;  %v4285_v14 = vld [vmem:[%s4692_s9 + $0x18] sm:$0xff]  ;;  %v4290_v15 = vld [vmem:[%s4692_s9 + $0x10] sm:$0xff]  ;;  %s4753_s13 = sld [smem:[#allocation27_spill]]  ;;  %p3816_p4 = scmp.lt.s32.totalorder %s3814_s17, %s3808_s29 }
  0xc5   : > { %791 = vmatprep.subr.mxu0 %v588_v16  ;;  %3048 = vmatmul.mubr.msk.f32.vlgmr.msra.gmra.mxu1 %vm611_vm0, %v585_v13  ;;  %v4297_v16 = vld [vmem:[%s4692_s9 + $0x8] sm:$0xff]  ;;  %v4304_v17 = vld [vmem:[%s4692_s9] sm:$0xff] }
  0xc6   : > { %792 = vmatpush1.msra.mxu0 %v587_v18  ;;  %860 = vmatprep.subr.mxu1 %v594_v23  ;;  %v3929_v18 = vmov 0   ;;  %v964_v19 = vld [vmem:[%s583_s5] sm:$0xff]  ;;  %p3817_p7 = por %p3816_p4, %p3815_p0 }
  0xc7   : > { %3049 = vmatmul.mubr.msk.f32.vlgmr.msra.gmra.mxu0 %vm757_vm1, %v584_v20  ;;  %3206 = vmatprep.subr.mxu0 %v3927_v0  ;;  %v4318_v21 = vld [vmem:[%s4691_s8] ss:$0 sm:$0xff] }
  0xc8   : > { %861 = vmatpush1.msra.mxu1 %v593_v24  ;;  %896 = vmatprep.mubr.f32.mxu1 %v3927_v0 }
  0xc9   : > { %862 = vmatprep.subr.mxu1 %v590_v25  ;;  %3207 = vmatpush3.msra.mxu0 %v4242_v27 }
  0xca   : > { %863 = vmatpush1.msra.mxu1 %v589_v26  ;;  %3214 = vmatprep.mubr.msk.f32.mxu0 %vm3928_vm2, %v3927_v0  ;;  %v4335_v26 = vld [vmem:[%s4693_s10] ss:$0 sm:$0xff]  ;;  %p4755_p8 = scmp.ne.s32.totalorder %s4753_s13, 0 }
  0xcb   : > { %3050 = vmatmul.mubr.msk.f32.vlgmr.msra.gmra.mxu1 %vm757_vm1, %v584_v20  ;;  %3217 = vmatprep.subr.mxu1 %v3927_v0  ;;  %v965_v20 = vmul.f32 0.33333334, %v964_v19 }
  0xcc   : > { %3208 = vmatprep.subr.mxu0 %v3927_v0  ;;  %3225 = vmatprep.mubr.msk.f32.mxu1 %vm3928_vm2, %v3927_v0  ;;  %p3810_p10 = pnand %p3809_p1, %p4755_p8 }
  0xcd   : > { %3209 = vmatpush3.msra.mxu0 %v4244_v28  ;;  %3218 = vmatpush3.msra.mxu1 %v4285_v14 }
  0xce   : > { %3210 = vmatprep.subr.mxu0 %v3927_v0  ;;  %3219 = vmatprep.subr.mxu1 %v3927_v0  ;;  %p3811_p11 = pneg %p3810_p10 }
  0xcf   : > { %3211 = vmatpush3.msra.mxu0 %v4250_v29  ;;  %3220 = vmatpush3.msra.mxu1 %v4290_v15 }
  0xd0   : > { %3212 = vmatprep.subr.mxu0 %v3927_v0  ;;  %3221 = vmatprep.subr.mxu1 %v3927_v0  ;;  %p3818_p3 = pnand %p3817_p7, %p3811_p11 }
  0xd1   : > { %3213 = vmatpush3.msra.mxu0 %v4256_v30  ;;  %3222 = vmatpush3.msra.mxu1 %v4297_v16 }
  0xd2   : > { %3228 = vmatprep.subr.mxu0 %v3927_v0  ;;  %3223 = vmatprep.subr.mxu1 %v3927_v0 }
  0xd3   : > { %3224 = vmatpush3.msra.mxu1 %v4304_v17  ;;  %3579 = vset.pattern.permute.xlu0 %v3929_v18 }
  0xd4   : > { %3239 = vmatprep.subr.mxu1 %v3927_v0  ;;  %968 = vperm.xlu0 %3579, %v965_v20  }
 0x183   : > { %v681_v34 = vpop.f32.mrf.mxu0 }
 0x185   : > { %v683_v37 = vpop.f32.mrf.mxu0  ;;  %v752_v43 = vpop.f32.mrf.mxu1 }
 0x187   : > { %v827_v39 = vpop.f32.mrf.mxu0  ;;  %v754_v46 = vpop.f32.mrf.mxu1 }
 0x188   : > { %v828_v40 = vadd.f32 %v827_v39, %v681_v34  ;;  %v4340_v34 = vpop.permute.xlu0 %968 }
 0x189   : > { %v829_v42 = vpop.f32.mrf.mxu0 }
 0x18a   : > { %v925_v44 = vadd.f32 %v908_v38, %v828_v40  ;;  %v830_v45 = vadd.f32 %v829_v42, %v683_v37 }
 0x18b   : > { %v898_v49 = vpop.f32.mrf.mxu1 }
 0x18c   : > { %v3051_v47 = vmul.f32 -1.442695, %v925_v44  ;;  %v926_v48 = vadd.f32 %v912_v41, %v830_v45  ;;  %v899_v57 = vadd.f32 %v898_v49, %v752_v43 }
 0x18d   : > { %v900_v52 = vpop.f32.mrf.mxu1 }
 0x18e   : > { %3580 = vpow2.f32 %v3051_v47  ;;  %v3052_v51 = vmul.f32 -1.442695, %v926_v48  ;;  %v901_v53 = vadd.f32 %v900_v52, %v754_v46  ;;  %v927_v61 = vadd.f32 %v916_v58, %v899_v57 }
 0x190   : > { %3582 = vpow2.f32 %v3052_v51  ;;  %v928_v56 = vadd.f32 %v920_v54, %v901_v53 }
 0x192   : > { %v3053_v59 = vmul.f32 -1.442695, %v928_v56 }
 0x194   : > { %3584 = vpow2.f32 %v3053_v59 }
 0x19b   : > { %v3581_v60 = vpop.eup %3580 }
 0x19c   : > { %v932_v62 = vadd.f32 1.0, %v3581_v60 }
 0x19d   : > { %v3583_v63 = vpop.eup %3582 }
 0x19e   : > { %3586 = vrcp.f32 %v932_v62  ;;  %v938_v1 = vadd.f32 1.0, %v3583_v63 }
 0x19f   : > { %3588 = vtanh.f32 %v927_v61 }
 0x1a0   : > { %3590 = vrcp.f32 %v938_v1 }
 0x1a1   : > { %v3585_v2 = vpop.eup %3584 }
 0x1a2   : > { %v945_v7 = vadd.f32 1.0, %v3585_v2 }
 0x1a4   : > { %3592 = vrcp.f32 %v945_v7 }
 0x1ab   : > { %v3587_v3 = vpop.eup %3586 }
 0x1ac   : > { %v3589_v5 = vpop.eup %3588 }
 0x1ad   : > { %v3591_v6 = vpop.eup %3590  ;;  %v949_v9 = vmul.f32 %v3589_v5, %v3587_v3 }
 0x1ae   : > { %v948_v8 = vmul.f32 %v3591_v6, %v586_v4 }
 0x1b0   : > { %v950_v10 = vadd.f32 %v949_v9, %v948_v8 }
 0x1b1   : > { %v3593_v11 = vpop.eup %3592 }
 0x1b2   : > { %3594 = vtanh.f32 %v950_v10  ;;  %953 = vst.msk [vmem:[%s579_s19] sm:$0xff] %vm611_vm0, %v950_v10 }
 0x1bf   : > { %v3595_v12 = vpop.eup %3594 }
 0x1c0   : > { %v4268_v13 = vmul.f32 %v3595_v12, %v3593_v11 }
 0x1c2   : > { %3215 = vmatmul.mubr.msk.f32.vlgmr.msra.gmra.mxu0 %vm611_vm0, %v4268_v13 }
 0x1c3   : > { %3229 = vmatpush3.msra.mxu0 %v4242_v27  ;;  %3236 = vmatprep.mubr.msk.f32.mxu0 %vm3928_vm2, %v3927_v0 }
 0x1c4   : > { %3230 = vmatprep.subr.mxu0 %v3927_v0 }
 0x1c5   : > { %3231 = vmatpush3.msra.mxu0 %v4244_v28 }
 0x1c6   : > { %3232 = vmatprep.subr.mxu0 %v3927_v0 }
 0x1c7   : > { %3233 = vmatpush3.msra.mxu0 %v4250_v29 }
 0x1c8   : > { %3234 = vmatprep.subr.mxu0 %v3927_v0 }
 0x1c9   : > { %3235 = vmatpush3.msra.mxu0 %v4256_v30 }
 0x1ca   : > { %3250 = vmatprep.subr.mxu0 %v3927_v0 }
 0x282   : > { %v1046_v22 = vpop.f32.mrf.mxu0 }
 0x283   : > { %v1047_v23 = vadd.f32 %v4318_v21, %v1046_v22 }
 0x284   : > { %v3216_v24 = vpop.f32.mrf.mxu0 }
 0x285   : > { %3596 = vtanh.f32 %v1047_v23 }
 0x292   : > { %v3597_v25 = vpop.eup %3596 }
 0x293   : > { %3226 = vmatmul.mubr.msk.f32.vlgmr.msra.gmra.mxu1 %vm611_vm0, %v3597_v25 }
 0x294   : > { %3240 = vmatpush3.msra.mxu1 %v4285_v14  ;;  %3247 = vmatprep.mubr.msk.f32.mxu1 %vm3928_vm2, %v3927_v0 }
 0x295   : > { %3241 = vmatprep.subr.mxu1 %v3927_v0 }
 0x296   : > { %3242 = vmatpush3.msra.mxu1 %v4290_v15 }
 0x297   : > { %3243 = vmatprep.subr.mxu1 %v3927_v0 }
 0x298   : > { %3244 = vmatpush3.msra.mxu1 %v4297_v16 }
 0x299   : > { %3245 = vmatprep.subr.mxu1 %v3927_v0 }
 0x29a   : > { %3246 = vmatpush3.msra.mxu1 %v4304_v17 }
 0x29b   : > { %3261 = vmatprep.subr.mxu1 %v3927_v0 }
 0x353   : > { %v1126_v31 = vpop.f32.mrf.mxu1 }
 0x354   : > { %v4338_v32 = vadd.f32 %v4335_v26, %v1126_v31 }
 0x355   : > { %v3227_v33 = vpop.f32.mrf.mxu1 }
 0x356   : > { %v1130_v35 = vmul.f32 0.5, %v4338_v32 }
 0x358   : > { %v1131_v36 = vmul.f32 %v1130_v35, %v4340_v34 }
 0x35a   : > { %v1132_v37 = vadd.f32 %v1131_v36, %v4268_v13 }
 0x35c   : > { %3237 = vmatmul.mubr.msk.f32.vlgmr.msra.gmra.mxu0 %vm611_vm0, %v1132_v37 }
 0x35d   : > { %3251 = vmatpush3.msra.mxu0 %v4242_v27  ;;  %3258 = vmatprep.mubr.msk.f32.mxu0 %vm3928_vm2, %v3927_v0 }
 0x35e   : > { %3252 = vmatprep.subr.mxu0 %v3927_v0 }
 0x35f   : > { %3253 = vmatpush3.msra.mxu0 %v4244_v28 }
 0x360   : > { %3254 = vmatprep.subr.mxu0 %v3927_v0 }
 0x361   : > { %3255 = vmatpush3.msra.mxu0 %v4250_v29 }
 0x362   : > { %3256 = vmatprep.subr.mxu0 %v3927_v0 }
 0x363   : > { %3257 = vmatpush3.msra.mxu0 %v4256_v30 }
 0x364   : > { %3272 = vmatprep.subr.mxu0 %v3927_v0 }
 0x41c   : > { %v1202_v38 = vpop.f32.mrf.mxu0 }
 0x41d   : > { %v1203_v39 = vadd.f32 %v4318_v21, %v1202_v38 }
 0x41e   : > { %v3238_v40 = vpop.f32.mrf.mxu0 }
 0x41f   : > { %3598 = vtanh.f32 %v1203_v39 }
 0x42c   : > { %v3599_v41 = vpop.eup %3598 }
 0x42d   : > { %3248 = vmatmul.mubr.msk.f32.vlgmr.msra.gmra.mxu1 %vm611_vm0, %v3599_v41 }
 0x42e   : > { %3262 = vmatpush3.msra.mxu1 %v4285_v14  ;;  %3269 = vmatprep.mubr.msk.f32.mxu1 %vm3928_vm2, %v3927_v0 }
 0x42f   : > { %3263 = vmatprep.subr.mxu1 %v3927_v0 }
 0x430   : > { %3264 = vmatpush3.msra.mxu1 %v4290_v15 }
 0x431   : > { %3265 = vmatprep.subr.mxu1 %v3927_v0 }
 0x432   : > { %3266 = vmatpush3.msra.mxu1 %v4297_v16 }
 0x433   : > { %3267 = vmatprep.subr.mxu1 %v3927_v0 }
 0x434   : > { %3268 = vmatpush3.msra.mxu1 %v4304_v17 }
 0x435   : > { %3283 = vmatprep.subr.mxu1 %v3927_v0 }
 0x4ed   : > { %v1276_v42 = vpop.f32.mrf.mxu1 }
 0x4ee   : > { %v1277_v43 = vadd.f32 %v4335_v26, %v1276_v42 }
 0x4ef   : > { %v3249_v44 = vpop.f32.mrf.mxu1 }
 0x4f0   : > { %v1282_v45 = vmul.f32 0.5, %v1277_v43  ;;  %v1280_v52 = vmul.f32 2.0, %v1277_v43 }
 0x4f2   : > { %v1283_v46 = vmul.f32 %v1282_v45, %v4340_v34  ;;  %v1281_v56 = vadd.f32 %v1280_v52, %v4338_v32 }
 0x4f4   : > { %v1284_v47 = vadd.f32 %v1283_v46, %v4268_v13 }
 0x4f6   : > { %3259 = vmatmul.mubr.msk.f32.vlgmr.msra.gmra.mxu0 %vm611_vm0, %v1284_v47 }
 0x4f7   : > { %3273 = vmatpush3.msra.mxu0 %v4242_v27  ;;  %3280 = vmatprep.mubr.msk.f32.mxu0 %vm3928_vm2, %v3927_v0 }
 0x4f8   : > { %3274 = vmatprep.subr.mxu0 %v3927_v0 }
 0x4f9   : > { %3275 = vmatpush3.msra.mxu0 %v4244_v28 }
 0x4fa   : > { %3276 = vmatprep.subr.mxu0 %v3927_v0 }
 0x4fb   : > { %3277 = vmatpush3.msra.mxu0 %v4250_v29 }
 0x4fc   : > { %3278 = vmatprep.subr.mxu0 %v3927_v0 }
 0x4fd   : > { %3279 = vmatpush3.msra.mxu0 %v4256_v30 }
 0x4fe   : > { %3294 = vmatprep.subr.mxu0 %v3927_v0 }
 0x5b6   : > { %v1354_v48 = vpop.f32.mrf.mxu0 }
 0x5b7   : > { %v1355_v49 = vadd.f32 %v4318_v21, %v1354_v48 }
 0x5b8   : > { %v3260_v50 = vpop.f32.mrf.mxu0 }
 0x5b9   : > { %3600 = vtanh.f32 %v1355_v49 }
 0x5c6   : > { %v3601_v51 = vpop.eup %3600 }
 0x5c7   : > { %3270 = vmatmul.mubr.msk.f32.vlgmr.msra.gmra.mxu1 %vm611_vm0, %v3601_v51 }
 0x5c8   : > { %3284 = vmatpush3.msra.mxu1 %v4285_v14  ;;  %3291 = vmatprep.mubr.msk.f32.mxu1 %vm3928_vm2, %v3927_v0 }
 0x5c9   : > { %3285 = vmatprep.subr.mxu1 %v3927_v0 }
 0x5ca   : > { %3286 = vmatpush3.msra.mxu1 %v4290_v15 }
 0x5cb   : > { %3287 = vmatprep.subr.mxu1 %v3927_v0 }
 0x5cc   : > { %3288 = vmatpush3.msra.mxu1 %v4297_v16 }
 0x5cd   : > { %3289 = vmatprep.subr.mxu1 %v3927_v0 }
 0x5ce   : > { %3290 = vmatpush3.msra.mxu1 %v4304_v17 }
 0x5cf   : > { %3305 = vmatprep.subr.mxu1 %v3927_v0 }
 0x687   : > { %v1428_v53 = vpop.f32.mrf.mxu1 }
 0x688   : > { %v1429_v54 = vadd.f32 %v4335_v26, %v1428_v53 }
 0x689   : > { %v3271_v55 = vpop.f32.mrf.mxu1 }
 0x68a   : > { %v1432_v57 = vmul.f32 2.0, %v1429_v54  ;;  %v1434_v58 = vmul.f32 %v1429_v54, %v4340_v34 }
 0x68c   : > { %v1435_v59 = vadd.f32 %v1434_v58, %v4268_v13  ;;  %v1433_v60 = vadd.f32 %v1432_v57, %v1281_v56 }
 0x68e   : > { %3281 = vmatmul.mubr.msk.f32.vlgmr.msra.gmra.mxu0 %vm611_vm0, %v1435_v59 }
 0x68f   : > { %3295 = vmatpush3.msra.mxu0 %v4242_v27  ;;  %3302 = vmatprep.mubr.msk.f32.mxu0 %vm3928_vm2, %v3927_v0 }
 0x690   : > { %3296 = vmatprep.subr.mxu0 %v3927_v0 }
 0x691   : > { %3297 = vmatpush3.msra.mxu0 %v4244_v28 }
 0x692   : > { %3298 = vmatprep.subr.mxu0 %v3927_v0 }
 0x693   : > { %3299 = vmatpush3.msra.mxu0 %v4250_v29 }
 0x694   : > { %3300 = vmatprep.subr.mxu0 %v3927_v0 }
 0x695   : > { %3301 = vmatpush3.msra.mxu0 %v4256_v30 }
 0x696   : > { %3316 = vmatprep.subr.mxu0 %v3927_v0 }
 0x74e   : > { %v1505_v61 = vpop.f32.mrf.mxu0 }
 0x74f   : > { %v1506_v62 = vadd.f32 %v4318_v21, %v1505_v61 }
 0x750   : > { %v3282_v63 = vpop.f32.mrf.mxu0 }
 0x751   : > { %3602 = vtanh.f32 %v1506_v62 }
 0x75e   : > { %v3603_v1 = vpop.eup %3602 }
 0x75f   : > { %3292 = vmatmul.mubr.msk.f32.vlgmr.msra.gmra.mxu1 %vm611_vm0, %v3603_v1 }
 0x760   : > { %3306 = vmatpush3.msra.mxu1 %v4285_v14  ;;  %3313 = vmatprep.mubr.msk.f32.mxu1 %vm3928_vm2, %v3927_v0 }
 0x761   : > { %3307 = vmatprep.subr.mxu1 %v3927_v0 }
 0x762   : > { %3308 = vmatpush3.msra.mxu1 %v4290_v15 }
 0x763   : > { %3309 = vmatprep.subr.mxu1 %v3927_v0 }
 0x764   : > { %3310 = vmatpush3.msra.mxu1 %v4297_v16 }
 0x765   : > { %3311 = vmatprep.subr.mxu1 %v3927_v0 }
 0x766   : > { %3312 = vmatpush3.msra.mxu1 %v4304_v17 }
 0x767   : > { %3327 = vmatprep.subr.mxu1 %v3927_v0 }
 0x81f   : > { %v1579_v2 = vpop.f32.mrf.mxu1 }
 0x820   : > { %v1580_v3 = vadd.f32 %v4335_v26, %v1579_v2 }
 0x821   : > { %v3293_v4 = vpop.f32.mrf.mxu1 }
 0x822   : > { %v1583_v5 = vadd.f32 %v1580_v3, %v1433_v60 }
 0x824   : > { %v1584_v6 = vmul.f32 0.16666667, %v1583_v5 }
 0x826   : > { %v1585_v7 = vmul.f32 %v1584_v6, %v4340_v34 }
 0x828   : > { %v4424_v8 = vadd.f32 %v1585_v7, %v4268_v13 }
 0x82a   : > { %3303 = vmatmul.mubr.msk.f32.vlgmr.msra.gmra.mxu0 %vm611_vm0, %v4424_v8 }
 0x82b   : > { %3317 = vmatpush3.msra.mxu0 %v4242_v27  ;;  %3324 = vmatprep.mubr.msk.f32.mxu0 %vm3928_vm2, %v3927_v0 }
 0x82c   : > { %3318 = vmatprep.subr.mxu0 %v3927_v0 }
 0x82d   : > { %3319 = vmatpush3.msra.mxu0 %v4244_v28 }
 0x82e   : > { %3320 = vmatprep.subr.mxu0 %v3927_v0 }
 0x82f   : > { %3321 = vmatpush3.msra.mxu0 %v4250_v29 }
 0x830   : > { %3322 = vmatprep.subr.mxu0 %v3927_v0 }
 0x831   : > { %3323 = vmatpush3.msra.mxu0 %v4256_v30 }
 0x832   : > { %3338 = vmatprep.subr.mxu0 %v3927_v0 }
 0x8ea   : > { %v1656_v9 = vpop.f32.mrf.mxu0 }
 0x8eb   : > { %v1657_v10 = vadd.f32 %v4318_v21, %v1656_v9 }
 0x8ec   : > { %v3304_v11 = vpop.f32.mrf.mxu0 }
 0x8ed   : > { %3604 = vtanh.f32 %v1657_v10 }
 0x8fa   : > { %v3605_v12 = vpop.eup %3604 }
 0x8fb   : > { %3314 = vmatmul.mubr.msk.f32.vlgmr.msra.gmra.mxu1 %vm611_vm0, %v3605_v12 }
 0x8fc   : > { %3328 = vmatpush3.msra.mxu1 %v4285_v14  ;;  %3335 = vmatprep.mubr.msk.f32.mxu1 %vm3928_vm2, %v3927_v0 }
 0x8fd   : > { %3329 = vmatprep.subr.mxu1 %v3927_v0 }
 0x8fe   : > { %3330 = vmatpush3.msra.mxu1 %v4290_v15 }
 0x8ff   : > { %3331 = vmatprep.subr.mxu1 %v3927_v0 }
 0x900   : > { %3332 = vmatpush3.msra.mxu1 %v4297_v16 }
 0x901   : > { %3333 = vmatprep.subr.mxu1 %v3927_v0 }
 0x902   : > { %3334 = vmatpush3.msra.mxu1 %v4304_v17 }
 0x903   : > { %3349 = vmatprep.subr.mxu1 %v3927_v0 }
 0x9bb   : > { %v1730_v13 = vpop.f32.mrf.mxu1 }
 0x9bc   : > { %v4451_v18 = vadd.f32 %v4335_v26, %v1730_v13 }
 0x9bd   : > { %v3315_v19 = vpop.f32.mrf.mxu1 }
 0x9be   : > { %v1734_v20 = vmul.f32 0.5, %v4451_v18 }
 0x9c0   : > { %v1735_v22 = vmul.f32 %v1734_v20, %v4340_v34 }
 0x9c2   : > { %v1736_v23 = vadd.f32 %v1735_v22, %v4424_v8 }
 0x9c4   : > { %3325 = vmatmul.mubr.msk.f32.vlgmr.msra.gmra.mxu0 %vm611_vm0, %v1736_v23 }
 0x9c5   : > { %3339 = vmatpush3.msra.mxu0 %v4242_v27  ;;  %3346 = vmatprep.mubr.msk.f32.mxu0 %vm3928_vm2, %v3927_v0 }
 0x9c6   : > { %3340 = vmatprep.subr.mxu0 %v3927_v0 }
 0x9c7   : > { %3341 = vmatpush3.msra.mxu0 %v4244_v28 }
 0x9c8   : > { %3342 = vmatprep.subr.mxu0 %v3927_v0 }
 0x9c9   : > { %3343 = vmatpush3.msra.mxu0 %v4250_v29 }
 0x9ca   : > { %3344 = vmatprep.subr.mxu0 %v3927_v0 }
 0x9cb   : > { %3345 = vmatpush3.msra.mxu0 %v4256_v30 }
 0x9cc   : > { %3360 = vmatprep.subr.mxu0 %v3927_v0 }
 0xa84   : > { %v1806_v24 = vpop.f32.mrf.mxu0 }
 0xa85   : > { %v1807_v25 = vadd.f32 %v4318_v21, %v1806_v24 }
 0xa86   : > { %v3326_v31 = vpop.f32.mrf.mxu0 }
 0xa87   : > { %3606 = vtanh.f32 %v1807_v25 }
 0xa94   : > { %v3607_v32 = vpop.eup %3606 }
 0xa95   : > { %3336 = vmatmul.mubr.msk.f32.vlgmr.msra.gmra.mxu1 %vm611_vm0, %v3607_v32 }
 0xa96   : > { %3350 = vmatpush3.msra.mxu1 %v4285_v14  ;;  %3357 = vmatprep.mubr.msk.f32.mxu1 %vm3928_vm2, %v3927_v0 }
 0xa97   : > { %3351 = vmatprep.subr.mxu1 %v3927_v0 }
 0xa98   : > { %3352 = vmatpush3.msra.mxu1 %v4290_v15 }
 0xa99   : > { %3353 = vmatprep.subr.mxu1 %v3927_v0 }
 0xa9a   : > { %3354 = vmatpush3.msra.mxu1 %v4297_v16 }
 0xa9b   : > { %3355 = vmatprep.subr.mxu1 %v3927_v0 }
 0xa9c   : > { %3356 = vmatpush3.msra.mxu1 %v4304_v17 }
 0xa9d   : > { %3371 = vmatprep.subr.mxu1 %v3927_v0 }
 0xb55   : > { %v1880_v33 = vpop.f32.mrf.mxu1 }
 0xb56   : > { %v1881_v35 = vadd.f32 %v4335_v26, %v1880_v33 }
 0xb57   : > { %v3337_v36 = vpop.f32.mrf.mxu1 }
 0xb58   : > { %v1886_v37 = vmul.f32 0.5, %v1881_v35  ;;  %v1884_v44 = vmul.f32 2.0, %v1881_v35 }
 0xb5a   : > { %v1887_v38 = vmul.f32 %v1886_v37, %v4340_v34  ;;  %v1885_v48 = vadd.f32 %v1884_v44, %v4451_v18 }
 0xb5c   : > { %v1888_v39 = vadd.f32 %v1887_v38, %v4424_v8 }
 0xb5e   : > { %3347 = vmatmul.mubr.msk.f32.vlgmr.msra.gmra.mxu0 %vm611_vm0, %v1888_v39 }
 0xb5f   : > { %3361 = vmatpush3.msra.mxu0 %v4242_v27  ;;  %3368 = vmatprep.mubr.msk.f32.mxu0 %vm3928_vm2, %v3927_v0 }
 0xb60   : > { %3362 = vmatprep.subr.mxu0 %v3927_v0 }
 0xb61   : > { %3363 = vmatpush3.msra.mxu0 %v4244_v28 }
 0xb62   : > { %3364 = vmatprep.subr.mxu0 %v3927_v0 }
 0xb63   : > { %3365 = vmatpush3.msra.mxu0 %v4250_v29 }
 0xb64   : > { %3366 = vmatprep.subr.mxu0 %v3927_v0 }
 0xb65   : > { %3367 = vmatpush3.msra.mxu0 %v4256_v30 }
 0xb66   : > { %3382 = vmatprep.subr.mxu0 %v3927_v0 }
 0xc1e   : > { %v1958_v40 = vpop.f32.mrf.mxu0 }
 0xc1f   : > { %v1959_v41 = vadd.f32 %v4318_v21, %v1958_v40 }
 0xc20   : > { %v3348_v42 = vpop.f32.mrf.mxu0 }
 0xc21   : > { %3608 = vtanh.f32 %v1959_v41 }
 0xc2e   : > { %v3609_v43 = vpop.eup %3608 }
 0xc2f   : > { %3358 = vmatmul.mubr.msk.f32.vlgmr.msra.gmra.mxu1 %vm611_vm0, %v3609_v43 }
 0xc30   : > { %3372 = vmatpush3.msra.mxu1 %v4285_v14  ;;  %3379 = vmatprep.mubr.msk.f32.mxu1 %vm3928_vm2, %v3927_v0 }
 0xc31   : > { %3373 = vmatprep.subr.mxu1 %v3927_v0 }
 0xc32   : > { %3374 = vmatpush3.msra.mxu1 %v4290_v15 }
 0xc33   : > { %3375 = vmatprep.subr.mxu1 %v3927_v0 }
 0xc34   : > { %3376 = vmatpush3.msra.mxu1 %v4297_v16 }
 0xc35   : > { %3377 = vmatprep.subr.mxu1 %v3927_v0 }
 0xc36   : > { %3378 = vmatpush3.msra.mxu1 %v4304_v17 }
 0xc37   : > { %3393 = vmatprep.subr.mxu1 %v3927_v0 }
 0xcef   : > { %v2032_v45 = vpop.f32.mrf.mxu1 }
 0xcf0   : > { %v2033_v46 = vadd.f32 %v4335_v26, %v2032_v45 }
 0xcf1   : > { %v3359_v47 = vpop.f32.mrf.mxu1 }
 0xcf2   : > { %v2036_v49 = vmul.f32 2.0, %v2033_v46  ;;  %v2038_v50 = vmul.f32 %v2033_v46, %v4340_v34 }
 0xcf4   : > { %v2039_v51 = vadd.f32 %v2038_v50, %v4424_v8  ;;  %v2037_v52 = vadd.f32 %v2036_v49, %v1885_v48 }
 0xcf6   : > { %3369 = vmatmul.mubr.msk.f32.vlgmr.msra.gmra.mxu0 %vm611_vm0, %v2039_v51 }
 0xcf7   : > { %3383 = vmatpush3.msra.mxu0 %v4242_v27  ;;  %3390 = vmatprep.mubr.msk.f32.mxu0 %vm3928_vm2, %v3927_v0 }
 0xcf8   : > { %3384 = vmatprep.subr.mxu0 %v3927_v0 }
 0xcf9   : > { %3385 = vmatpush3.msra.mxu0 %v4244_v28 }
 0xcfa   : > { %3386 = vmatprep.subr.mxu0 %v3927_v0 }
 0xcfb   : > { %3387 = vmatpush3.msra.mxu0 %v4250_v29 }
 0xcfc   : > { %3388 = vmatprep.subr.mxu0 %v3927_v0 }
 0xcfd   : > { %3389 = vmatpush3.msra.mxu0 %v4256_v30 }
 0xcfe   : > { %3404 = vmatprep.subr.mxu0 %v3927_v0 }
 0xdb6   : > { %v2109_v53 = vpop.f32.mrf.mxu0 }
 0xdb7   : > { %v2110_v54 = vadd.f32 %v4318_v21, %v2109_v53 }
 0xdb8   : > { %v3370_v55 = vpop.f32.mrf.mxu0 }
 0xdb9   : > { %3610 = vtanh.f32 %v2110_v54 }
 0xdc6   : > { %v3611_v56 = vpop.eup %3610 }
 0xdc7   : > { %3380 = vmatmul.mubr.msk.f32.vlgmr.msra.gmra.mxu1 %vm611_vm0, %v3611_v56 }
 0xdc8   : > { %3394 = vmatpush3.msra.mxu1 %v4285_v14  ;;  %3401 = vmatprep.mubr.msk.f32.mxu1 %vm3928_vm2, %v3927_v0 }
 0xdc9   : > { %3395 = vmatprep.subr.mxu1 %v3927_v0 }
 0xdca   : > { %3396 = vmatpush3.msra.mxu1 %v4290_v15 }
 0xdcb   : > { %3397 = vmatprep.subr.mxu1 %v3927_v0 }
 0xdcc   : > { %3398 = vmatpush3.msra.mxu1 %v4297_v16 }
 0xdcd   : > { %3399 = vmatprep.subr.mxu1 %v3927_v0 }
 0xdce   : > { %3400 = vmatpush3.msra.mxu1 %v4304_v17 }
 0xdcf   : > { %3415 = vmatprep.subr.mxu1 %v3927_v0 }
 0xe87   : > { %v2183_v57 = vpop.f32.mrf.mxu1 }
 0xe88   : > { %v2184_v58 = vadd.f32 %v4335_v26, %v2183_v57 }
 0xe89   : > { %v3381_v59 = vpop.f32.mrf.mxu1 }
 0xe8a   : > { %v2187_v60 = vadd.f32 %v2184_v58, %v2037_v52 }
 0xe8c   : > { %v2188_v61 = vmul.f32 0.16666667, %v2187_v60 }
 0xe8e   : > { %v2189_v62 = vmul.f32 %v2188_v61, %v4340_v34 }
 0xe90   : > { %v4535_v63 = vadd.f32 %v2189_v62, %v4424_v8 }
 0xe92   : > { %3391 = vmatmul.mubr.msk.f32.vlgmr.msra.gmra.mxu0 %vm611_vm0, %v4535_v63 }
 0xe93   : > { %3405 = vmatpush3.msra.mxu0 %v4242_v27  ;;  %3412 = vmatprep.mubr.msk.f32.mxu0 %vm3928_vm2, %v3927_v0 }
 0xe94   : > { %3406 = vmatprep.subr.mxu0 %v3927_v0 }
 0xe95   : > { %3407 = vmatpush3.msra.mxu0 %v4244_v28 }
 0xe96   : > { %3408 = vmatprep.subr.mxu0 %v3927_v0 }
 0xe97   : > { %3409 = vmatpush3.msra.mxu0 %v4250_v29 }
 0xe98   : > { %3410 = vmatprep.subr.mxu0 %v3927_v0 }
 0xe99   : > { %3411 = vmatpush3.msra.mxu0 %v4256_v30 }
 0xe9a   : > { %3426 = vmatprep.subr.mxu0 %v3927_v0 }
 0xf52   : > { %v2260_v1 = vpop.f32.mrf.mxu0 }
 0xf53   : > { %v2261_v2 = vadd.f32 %v4318_v21, %v2260_v1 }
 0xf54   : > { %v3392_v3 = vpop.f32.mrf.mxu0 }
 0xf55   : > { %3612 = vtanh.f32 %v2261_v2 }
 0xf62   : > { %v3613_v4 = vpop.eup %3612 }
 0xf63   : > { %3402 = vmatmul.mubr.msk.f32.vlgmr.msra.gmra.mxu1 %vm611_vm0, %v3613_v4 }
 0xf64   : > { %3416 = vmatpush3.msra.mxu1 %v4285_v14  ;;  %3423 = vmatprep.mubr.msk.f32.mxu1 %vm3928_vm2, %v3927_v0 }
 0xf65   : > { %3417 = vmatprep.subr.mxu1 %v3927_v0 }
 0xf66   : > { %3418 = vmatpush3.msra.mxu1 %v4290_v15 }
 0xf67   : > { %3419 = vmatprep.subr.mxu1 %v3927_v0 }
 0xf68   : > { %3420 = vmatpush3.msra.mxu1 %v4297_v16 }
 0xf69   : > { %3421 = vmatprep.subr.mxu1 %v3927_v0 }
 0xf6a   : > { %3422 = vmatpush3.msra.mxu1 %v4304_v17 }
 0xf6b   : > { %3437 = vmatprep.subr.mxu1 %v3927_v0 }
0x1023   : > { %v2334_v5 = vpop.f32.mrf.mxu1 }
0x1024   : > { %v4562_v6 = vadd.f32 %v4335_v26, %v2334_v5 }
0x1025   : > { %v3403_v7 = vpop.f32.mrf.mxu1 }
0x1026   : > { %v2338_v8 = vmul.f32 0.5, %v4562_v6 }
0x1028   : > { %v2339_v9 = vmul.f32 %v2338_v8, %v4340_v34 }
0x102a   : > { %v2340_v10 = vadd.f32 %v2339_v9, %v4535_v63 }
0x102c   : > { %3413 = vmatmul.mubr.msk.f32.vlgmr.msra.gmra.mxu0 %vm611_vm0, %v2340_v10 }
0x102d   : > { %3427 = vmatpush3.msra.mxu0 %v4242_v27  ;;  %3434 = vmatprep.mubr.msk.f32.mxu0 %vm3928_vm2, %v3927_v0 }
0x102e   : > { %3428 = vmatprep.subr.mxu0 %v3927_v0 }
0x102f   : > { %3429 = vmatpush3.msra.mxu0 %v4244_v28 }
0x1030   : > { %3430 = vmatprep.subr.mxu0 %v3927_v0 }
0x1031   : > { %3431 = vmatpush3.msra.mxu0 %v4250_v29 }
0x1032   : > { %3432 = vmatprep.subr.mxu0 %v3927_v0 }
0x1033   : > { %3433 = vmatpush3.msra.mxu0 %v4256_v30 }
0x1034   : > { %3448 = vmatprep.subr.mxu0 %v3927_v0 }
0x10ec   : > { %v2410_v11 = vpop.f32.mrf.mxu0 }
0x10ed   : > { %v2411_v12 = vadd.f32 %v4318_v21, %v2410_v11 }
0x10ee   : > { %v3414_v13 = vpop.f32.mrf.mxu0 }
0x10ef   : > { %3614 = vtanh.f32 %v2411_v12 }
0x10fc   : > { %v3615_v18 = vpop.eup %3614 }
0x10fd   : > { %3424 = vmatmul.mubr.msk.f32.vlgmr.msra.gmra.mxu1 %vm611_vm0, %v3615_v18 }
0x10fe   : > { %3438 = vmatpush3.msra.mxu1 %v4285_v14  ;;  %3445 = vmatprep.mubr.msk.f32.mxu1 %vm3928_vm2, %v3927_v0 }
0x10ff   : > { %3439 = vmatprep.subr.mxu1 %v3927_v0 }
0x1100   : > { %3440 = vmatpush3.msra.mxu1 %v4290_v15 }
0x1101   : > { %3441 = vmatprep.subr.mxu1 %v3927_v0 }
0x1102   : > { %3442 = vmatpush3.msra.mxu1 %v4297_v16 }
0x1103   : > { %3443 = vmatprep.subr.mxu1 %v3927_v0 }
0x1104   : > { %3444 = vmatpush3.msra.mxu1 %v4304_v17 }
0x1105   : > { %3459 = vmatprep.subr.mxu1 %v3927_v0 }
0x11bd   : > { %v2484_v19 = vpop.f32.mrf.mxu1 }
0x11be   : > { %v2485_v20 = vadd.f32 %v4335_v26, %v2484_v19 }
0x11bf   : > { %v3425_v22 = vpop.f32.mrf.mxu1 }
0x11c0   : > { %v2490_v23 = vmul.f32 0.5, %v2485_v20 }
0x11c2   : > { %v2491_v24 = vmul.f32 %v2490_v23, %v4340_v34 }
0x11c4   : > { %v2492_v25 = vadd.f32 %v2491_v24, %v4535_v63 }
0x11c6   : > { %3435 = vmatmul.mubr.msk.f32.vlgmr.msra.gmra.mxu0 %vm611_vm0, %v2492_v25 }
0x11c7   : > { %3449 = vmatpush3.msra.mxu0 %v4242_v27  ;;  %3456 = vmatprep.mubr.msk.f32.mxu0 %vm3928_vm2, %v3927_v0 }
0x11c8   : > { %3450 = vmatprep.subr.mxu0 %v3927_v0 }
0x11c9   : > { %3451 = vmatpush3.msra.mxu0 %v4244_v28  ;;  %v2488_v28 = vmul.f32 2.0, %v2485_v20 }
0x11ca   : > { %3452 = vmatprep.subr.mxu0 %v3927_v0 }
0x11cb   : > { %3453 = vmatpush3.msra.mxu0 %v4250_v29  ;;  %v2489_v35 = vadd.f32 %v2488_v28, %v4562_v6 }
0x11cc   : > { %3454 = vmatprep.subr.mxu0 %v3927_v0 }
0x11cd   : > { %3455 = vmatpush3.msra.mxu0 %v4256_v30 }
0x1286   : > { %v2562_v31 = vpop.f32.mrf.mxu0 }
0x1287   : > { %v2563_v32 = vadd.f32 %v4318_v21, %v2562_v31 }
0x1288   : > { %v3436_v33 = vpop.f32.mrf.mxu0 }
0x1289   : > { %3616 = vtanh.f32 %v2563_v32 }
0x1296   : > { %v3617_v27 = vpop.eup %3616 }
0x1297   : > { %3446 = vmatmul.mubr.msk.f32.vlgmr.msra.gmra.mxu1 %vm611_vm0, %v3617_v27 }
0x1298   : > { %3460 = vmatpush3.msra.mxu1 %v4285_v14  ;;  %3467 = vmatprep.mubr.msk.f32.mxu1 %vm3928_vm2, %v3927_v0 }
0x1299   : > { %3461 = vmatprep.subr.mxu1 %v3927_v0 }
0x129a   : > { %3462 = vmatpush3.msra.mxu1 %v4290_v15 }
0x129b   : > { %3463 = vmatprep.subr.mxu1 %v3927_v0 }
0x129c   : > { %3464 = vmatpush3.msra.mxu1 %v4297_v16 }
0x129d   : > { %3465 = vmatprep.subr.mxu1 %v3927_v0 }
0x129e   : > { %3466 = vmatpush3.msra.mxu1 %v4304_v17 }
0x1357   : > { %v2636_v29 = vpop.f32.mrf.mxu1 }
0x1358   : > { %v2637_v30 = vadd.f32 %v4335_v26, %v2636_v29 }
0x1359   : > { %v3447_v14 = vpop.f32.mrf.mxu1 }
0x135a   : > { %v2640_v15 = vmul.f32 2.0, %v2637_v30  ;;  %v2642_v36 = vmul.f32 %v2637_v30, %v4340_v34 }
0x135c   : > { %v2643_v16 = vadd.f32 %v2642_v36, %v4535_v63  ;;  %v2641_v0 = vadd.f32 %v2640_v15, %v2489_v35 }
0x135e   : > { %3457 = vmatmul.mubr.msk.f32.vlgmr.msra.gmra.mxu0 %vm611_vm0, %v2643_v16 }
0x141e   : > { %v2713_v17 = vpop.f32.mrf.mxu0 }
0x141f   : > { %v2714_v37 = vadd.f32 %v4318_v21, %v2713_v17 }
0x1420   : > { %v3458_v38 = vpop.f32.mrf.mxu0 }
0x1421   : > { %3618 = vtanh.f32 %v2714_v37 }
0x142e   : > { %v3619_v39 = vpop.eup %3618 }
0x142f   : > { %3468 = vmatmul.mubr.msk.f32.vlgmr.msra.gmra.mxu1 %vm611_vm0, %v3619_v39 }
0x1430   : > { %3821 = shalt.err (!%p3818_p3)
}
0x1431   : > { %s3822_s30 = scalar_lea.hbm %s2826_s11, 128  ;;  %s3826_s26 = scalar_lea.hbm %s4754_s16, 256 }
0x1432   : > { %p3823_p12 = scmp.ne.s32.totalorder %s2826_s11, %s3822_s30  ;;  %p3827_p9 = scmp.lt.s32.totalorder %s2826_s11, %s4754_s16 }
0x1433   : > { %p3828_p2 = scmp.lt.s32.totalorder %s3826_s26, %s3822_s30 }
0x1434   : > { %p3824_p13 = pnand %p3823_p12, %p4755_p8 }
0x1435   : > { %p3829_p5 = por %p3828_p2, %p3827_p9 }
0x1436   : > { %p3825_p6 = pneg %p3824_p13 }
0x1438   : > { %p3830_p1 = pnand %p3829_p5, %p3825_p6 }
0x143a   : > { %3833 = shalt.err (!%p3830_p1)
}
0x143b   : > { %3493 = dma.vmem_to_hbm [thread:$0]  (%p4755_p8), %s2829_s12, 128, %s2826_s11, %s2802_s20  }
0x143c   : > { %s572_s15 = scalar_lea.vmem [#allocation14], %s4207_s6  ;;  %s4756_s1 = sld [smem:[#allocation33_spill]] }
0x143d   : > { %s2815_s4 = sshll.u32 %s572_s15, 4  ;;  %s2797_s11 = scalar_lea.sflag [#allocation4], %s4204_s24  ;;  %s2816_s4 = int_to_ptr.vmem [resolvable:$true] %s2815_s4 }
0x143e   : > { %s3834_s12 = scalar_lea.vmem %s2816_s4, 128  ;;  %s3931_s6 = smov [#allocation14]  }
0x143f   : > { %p3835_p10 = scmp.ne.s32.totalorder %s2816_s4, %s3834_s12  ;;  %s3838_s20 = sshll.u32 %s3931_s6, 4  ;;  %s3839_s20 = int_to_ptr.vmem [resolvable:$false] %s3838_s20 }
0x1440   : > { %s3840_s17 = scalar_lea.vmem %s3839_s20, 256  ;;  %p3841_p4 = scmp.lt.s32.totalorder %s2816_s4, %s3839_s20 }
0x1441   : > { %p3836_p11 = pnand %p3835_p10, %p4755_p8  ;;  %p3842_p7 = scmp.lt.s32.totalorder %s3840_s17, %s3834_s12 }
0x1442   : > { %s2813_s14 = scalar_lea.hbm %s4756_s1, %s3082_s18 }
0x1443   : > { %p3837_p0 = pneg %p3836_p11  ;;  %p3843_p3 = por %p3842_p7, %p3841_p4 }
0x1445   : > { %p3844_p12 = pnand %p3843_p3, %p3837_p0 }
0x14ef   : > { %v2787_v21 = vpop.f32.mrf.mxu1 }
0x14f0   : > { %v2788_v40 = vadd.f32 %v4335_v26, %v2787_v21 }
0x14f1   : > { %v3469_v41 = vpop.f32.mrf.mxu1 }
0x14f2   : > { %v2791_v42 = vadd.f32 %v2788_v40, %v2641_v0 }
0x14f4   : > { %v2792_v43 = vmul.f32 0.16666667, %v2791_v42 }
0x14f6   : > { %v2793_v44 = vmul.f32 %v2792_v43, %v4340_v34 }
0x14f8   : > { %v2794_v45 = vadd.f32 %v2793_v44, %v4535_v63 }
0x14fa   : > { %2795 = vst.msk [vmem:[%s572_s15] sm:$0xff] %vm611_vm0, %v2794_v45 }
0x14fb   : > { %3847 = shalt.err (!%p3844_p12)
}
0x14fc   : > { %s3848_s27 = scalar_lea.hbm %s2813_s14, 128  ;;  %s3852_s30 = scalar_lea.hbm %s4756_s1, 256 }
0x14fd   : > { %p3849_p13 = scmp.ne.s32.totalorder %s2813_s14, %s3848_s27  ;;  %p3853_p2 = scmp.lt.s32.totalorder %s2813_s14, %s4756_s1 }
0x14fe   : > { %p3854_p5 = scmp.lt.s32.totalorder %s3852_s30, %s3848_s27 }
0x14ff   : > { %p3850_p6 = pnand %p3849_p13, %p4755_p8 }
0x1500   : > { %p3855_p1 = por %p3854_p5, %p3853_p2 }
0x1501   : > { %p3851_p9 = pneg %p3850_p6 }
0x1503   : > { %p3856_p10 = pnand %p3855_p1, %p3851_p9 }
0x1505   : > { %3859 = shalt.err (!%p3856_p10)
}
0x1506   : > { %3492 = dma.vmem_to_hbm [thread:$0]  (%p4755_p8), %s2816_s4, 128, %s2813_s14, %s2797_s11  }
0x1507 PF: > { %s4757_s26 = sld [smem:[#allocation23_spill]] }
0x1508   : > { %s4758_s21 = sld [smem:[#allocation28_spill]] }
0x1509   : > { %s4759_s28 = sld [smem:[#allocation24_spill]] }
0x150d   : > { %s2840_s15 = sand.u32 1, %s4757_s26  }
0x150e   : > { %p4760_p11 = scmp.ne.s32.totalorder %s4758_s21, 0  ;;  %s2841_s25 = scalar_lea.sflag [#allocation4], %s2840_s15 }
0x150f   : > { %p4761_p0 = scmp.ge.s32.totalorder %s4759_s28, 2 }
0x1511   : > { %p3520_p4 = pnand %p4761_p0, %p4760_p11 }
0x1513   : > { %p3521_p7 = pneg %p3520_p4 }
0x1515   : > { %3893 = dma.done.wait (%p3521_p7), %s2841_s25, 128  }
0x1516   : > { %3895 = vsyncadd (%p3521_p7), %s2841_s25, 4294967168  ;;  %s2850_s29 = scalar_lea.sflag [#allocation16], %s2840_s15 }
0x1517   : > { %3897 = dma.done.wait (%p3521_p7), %s2850_s29, 128  }
0x1518   : > { %3899 = vsyncadd (%p3521_p7), %s2850_s29, 4294967168  ;;  %s4762_s24 = sld [smem:[#allocation25_spill]]  ;;  %s4764_s21 = smov %s3906_s22 }
0x1519   : > { %s4763_s13 = sld [smem:[#allocation26_spill]]  ;;  %s4765_s22 = smov %s3910_s23 }
0x151e   : > { %p34_p8 = scmp.ge.s32.totalorder %s4762_s24, 4  }
0x151f   : > { %s4766_s23 = smov %s4763_s13 }
0x1520   :  { %36 = sbr.rel (!%p34_p8) target bundleno = 18 (0x12), region = 169 }
0x1525   :  { %2855 = vsyncpa [#allocation3], 1 }
0x1526   :  { %2857 = vsyncpa [#allocation3 + $0x1], 1 }
0x1527   :  { %2858 = vsyncpa [#allocation6], 1 }
0x1528   :  { %2860 = vsyncpa [#allocation6 + $0x1], 1 }
0x1529   :  { %2861 = vsyncpa [#allocation9], 1 }
0x152a   :  { %2862 = vsyncpa [#allocation12], 1 }
0x152b   :  { %2863 = vsyncpa [#allocation4], 1 }
0x152c   :  { %2865 = vsyncpa [#allocation4 + $0x1], 1 }
0x152d   :  { %2866 = vsyncpa [#allocation16], 1 }
0x152e   :  { %2868 = vsyncpa [#allocation16 + $0x1], 1 }

</bundles_post_ra>
